<compile_context>
chip_gen: v6e
topology: v6e:2x2x1
jax: 0.10.0
libtpu: 0.0.40
codegen_flags: <defaults>
</compile_context>

<pallas_src>
from functools import partial

import numpy as np
import jax
import jax.numpy as jnp
from jax.experimental import pallas as pl
from jax.experimental.pallas import tpu as pltpu


# ------------------------------ Pallas kernel -------------------------------

def _cam_kernel(x_ref, prm_ref, o_ref, *, hid, inv_hw):
    """Fused CAM for a tile of Bt batch samples.

    x_ref  : (Bt, C, HW)      activations, NCHW with spatial flattened on lanes
    prm_ref: (2*hid+2, C)     packed params:
                              rows [0:hid]        = W1            (hid, C)
                              rows [hid:2*hid]    = W2.T          (hid, C)
                              row  [2*hid]        = b2            (1,  C)
                              row  [2*hid+1,:hid] = b1            (1,  hid)
    o_ref  : (Bt, C, HW)
    """
    x = x_ref[...]                                         # (Bt, C, HW)
    xf = x.astype(jnp.float32)

    # Adaptive avg / max pool over all spatial positions (cross-lane reduce).
    # Block covers the full HW extent, so the reduces see the exact logical
    # shape (HW=256 here is also 128-aligned; Mosaic masks vreg padding).
    avg_p = jnp.sum(xf, axis=-1) * inv_hw                  # (Bt, C)
    max_p = jnp.max(xf, axis=-1)                           # (Bt, C)

    w1 = prm_ref[0:hid, :]                                 # (hid, C)
    w2t = prm_ref[hid:2 * hid, :]                          # (hid, C)
    b2 = prm_ref[2 * hid:2 * hid + 1, :]                   # (1, C)
    b1 = prm_ref[2 * hid + 1:2 * hid + 2, 0:hid]           # (1, hid)

    def shared_mlp(p):                                     # p: (Bt, C)
        # h[b, j] = relu(sum_c p[b, c] * W1[j, c] + b1[j])   -> lane reduce
        h = jnp.sum(p[:, None, :] * w1[None, :, :], axis=-1) + b1      # (Bt, hid)
        h = jnp.maximum(h, 0.0)
        # o[b, c] = sum_j h[b, j] * W2[c, j] + b2[c]          -> sublane reduce
        return jnp.sum(h[:, :, None] * w2t[None, :, :], axis=1) + b2   # (Bt, C)

    ca = jax.nn.sigmoid(shared_mlp(avg_p) + shared_mlp(max_p))         # (Bt, C)

    # Channel re-scale, broadcast over the HW lane axis (lane-dense store).
    o_ref[...] = (xf * ca[:, :, None]).astype(o_ref.dtype)


# --------------------------------- wrapper ----------------------------------

def _pick_bt(B, C, HW, itemsize, cap=32, vmem_budget=8 * 1024 * 1024):
    """Largest batch-tile that (a) divides B, (b) fits the VMEM budget with
    double-buffered in+out tiles, (c) keeps >= 2 grid steps when B >= 2
    (so v7x's two TensorCores both get work)."""
    bytes_per_sample = C * HW * itemsize
    fit = max(1, vmem_budget // (4 * bytes_per_sample))    # 2 bufs x (in + out)
    hi = min(cap, fit, B if B < 2 else max(1, B // 2))
    for bt in range(int(hi), 0, -1):
        if B % bt == 0:
            return bt
    return 1


def cam_forward(x_nchw, w1, b1, w2, b2):
    """CAM forward.

    x_nchw: (B, C, H, W)  (PyTorch NCHW layout)
    w1: (hid, C), b1: (hid,)   -- nn.Linear(channels, channels // r)
    w2: (C, hid), b2: (C,)     -- nn.Linear(channels // r, channels)
    returns (B, C, H, W), same dtype as x_nchw.
    """
    B, C, H, W = x_nchw.shape
    HW = H * W
    hid = w1.shape[0]

    x = x_nchw.reshape(B, C, HW)

    # Pack all parameters into one small lane-dense f32 slab (1 DMA, 1 BlockSpec).
    prm = jnp.zeros((2 * hid + 2, C), jnp.float32)
    prm = prm.at[0:hid, :].set(w1.astype(jnp.float32))
    prm = prm.at[hid:2 * hid, :].set(jnp.transpose(w2).astype(jnp.float32))
    prm = prm.at[2 * hid, :].set(b2.astype(jnp.float32))
    prm = prm.at[2 * hid + 1, 0:hid].set(b1.astype(jnp.float32))

    bt = _pick_bt(B, C, HW, np.dtype(x.dtype).itemsize)
    grid = (B // bt,)

    kernel = partial(_cam_kernel, hid=hid, inv_hw=1.0 / HW)
    out = pl.pallas_call(
        kernel,
        out_shape=jax.ShapeDtypeStruct((B, C, HW), x.dtype),
        grid_spec=pltpu.PrefetchScalarGridSpec(
            num_scalar_prefetch=0,
            grid=grid,                                     # Bt samples per step
            in_specs=[
                pl.BlockSpec((bt, C, HW), lambda b: (b, 0, 0)),
                pl.BlockSpec((2 * hid + 2, C), lambda b: (0, 0)),
            ],
            out_specs=pl.BlockSpec((bt, C, HW), lambda b: (b, 0, 0)),
        ),
        compiler_params=pltpu.CompilerParams(
            dimension_semantics=("parallel",),             # megacore batch split
            vmem_limit_bytes=32 * 1024 * 1024,
        ),
    )(x, prm)
    return out.reshape(B, C, H, W)


# ------------------------------ pure-JAX reference ---------------------------

def cam_reference(x, w1, b1, w2, b2):
    avg = jnp.mean(x, axis=(2, 3))                         # (B, C)
    mx = jnp.max(x, axis=(2, 3))                           # (B, C)

    def mlp(p):
        h = jax.nn.relu(p @ w1.T + b1)
        return h @ w2.T + b2

    ca = jax.nn.sigmoid(mlp(avg) + mlp(mx))                # (B, C)
    return x * ca[:, :, None, None]


# ----------------------------------- main ------------------------------------

if __name__ == "__main__":
    key = jax.random.PRNGKey(0)
    kx, k1, k2, k3, k4 = jax.random.split(key, 5)

    B, C, H, W = 8, 64, 16, 16
    reduction_ratio = 16
    hid = C // reduction_ratio                             # = 4

    x = jax.random.normal(kx, (B, C, H, W), jnp.float32)
    w1 = jax.random.normal(k1, (hid, C), jnp.float32) / np.sqrt(C)
    b1 = 0.1 * jax.random.normal(k2, (hid,), jnp.float32)
    w2 = jax.random.normal(k3, (C, hid), jnp.float32) / np.sqrt(hid)
    b2 = 0.1 * jax.random.normal(k4, (C,), jnp.float32)

    out = jax.jit(cam_forward)(x, w1, b1, w2, b2)
    out = jax.block_until_ready(out)

    ref = cam_reference(x, w1, b1, w2, b2)
    assert out.shape == (B, C, H, W)
    max_err = float(jnp.max(jnp.abs(out - ref)))
    assert jnp.allclose(out, ref, atol=1e-4, rtol=1e-4), max_err

    print("KERNEL_OK")
</pallas_src>

<mosaic_0001>
module attributes {stable_mosaic.version = 11 : i64} {
  func.func @_cam_kernel(%arg0: i32, %arg1: memref<4x64x256xf32, #tpu.memory_space<vmem>>, %arg2: memref<10x64xf32, #tpu.memory_space<vmem>>, %arg3: memref<4x64x256xf32, #tpu.memory_space<vmem>>) attributes {dimension_semantics = [#tpu.dimension_semantics<parallel>], iteration_bounds = array<i64: 2>, scalar_prefetch = 0 : i64, scratch_operands = 0 : i64, tpu.core_type = #tpu.core_type<tc>, window_params = [{transform_indices = @transform_0, window_bounds = array<i64: 4, 64, 256>}, {pipeline_mode = #tpu.pipeline_mode<synchronous>, transform_indices = @transform_1, window_bounds = array<i64: 10, 64>}, {transform_indices = @transform_2, window_bounds = array<i64: 4, 64, 256>}]} {
    %c0 = arith.constant 0 : index
    %c0_0 = arith.constant 0 : index
    %c0_1 = arith.constant 0 : index
    %0 = vector.load %arg1[%c0, %c0_0, %c0_1] : memref<4x64x256xf32, #tpu.memory_space<vmem>>, vector<4x64x256xf32>
    %cst = arith.constant dense<0.000000e+00> : vector<4x64xf32>
    %1 = vector.multi_reduction <add>, %0, %cst [2] : vector<4x64x256xf32> to vector<4x64xf32>
    %cst_2 = arith.constant 3.906250e-03 : f32
    %2 = vector.broadcast %cst_2 : f32 to vector<4x64xf32>
    %3 = arith.mulf %1, %2 : vector<4x64xf32>
    %cst_3 = arith.constant dense<0xFF800000> : vector<4x64xf32>
    %4 = vector.multi_reduction <maximumf>, %0, %cst_3 [2] : vector<4x64x256xf32> to vector<4x64xf32>
    %c0_4 = arith.constant 0 : index
    %c0_5 = arith.constant 0 : index
    %5 = vector.load %arg2[%c0_4, %c0_5] : memref<10x64xf32, #tpu.memory_space<vmem>>, vector<4x64xf32>
    %c4 = arith.constant 4 : index
    %c0_6 = arith.constant 0 : index
    %6 = vector.load %arg2[%c4, %c0_6] : memref<10x64xf32, #tpu.memory_space<vmem>>, vector<4x64xf32>
    %c8 = arith.constant 8 : index
    %c0_7 = arith.constant 0 : index
    %7 = vector.load %arg2[%c8, %c0_7] : memref<10x64xf32, #tpu.memory_space<vmem>>, vector<1x64xf32>
    %c9 = arith.constant 9 : index
    %c0_8 = arith.constant 0 : index
    %8 = vector.load %arg2[%c9, %c0_8] : memref<10x64xf32, #tpu.memory_space<vmem>>, vector<1x4xf32>
    %9 = vector.shape_cast %3 : vector<4x64xf32> to vector<4x1x64xf32>
    %10 = vector.shape_cast %5 : vector<4x64xf32> to vector<1x4x64xf32>
    %11 = vector.broadcast %9 : vector<4x1x64xf32> to vector<4x4x64xf32>
    %12 = vector.broadcast %10 : vector<1x4x64xf32> to vector<4x4x64xf32>
    %13 = arith.mulf %11, %12 : vector<4x4x64xf32>
    %cst_9 = arith.constant dense<0.000000e+00> : vector<4x4xf32>
    %14 = vector.multi_reduction <add>, %13, %cst_9 [2] : vector<4x4x64xf32> to vector<4x4xf32>
    %15 = vector.broadcast %8 : vector<1x4xf32> to vector<4x4xf32>
    %16 = arith.addf %14, %15 : vector<4x4xf32>
    %cst_10 = arith.constant 0.000000e+00 : f32
    %17 = vector.broadcast %cst_10 : f32 to vector<4x4xf32>
    %18 = arith.maximumf %16, %17 : vector<4x4xf32>
    %19 = vector.shape_cast %18 : vector<4x4xf32> to vector<4x4x1xf32>
    %20 = vector.shape_cast %6 : vector<4x64xf32> to vector<1x4x64xf32>
    %21 = vector.broadcast %19 : vector<4x4x1xf32> to vector<4x4x64xf32>
    %22 = vector.broadcast %20 : vector<1x4x64xf32> to vector<4x4x64xf32>
    %23 = arith.mulf %21, %22 : vector<4x4x64xf32>
    %cst_11 = arith.constant dense<0.000000e+00> : vector<4x64xf32>
    %24 = vector.multi_reduction <add>, %23, %cst_11 [1] : vector<4x4x64xf32> to vector<4x64xf32>
    %25 = vector.broadcast %7 : vector<1x64xf32> to vector<4x64xf32>
    %26 = arith.addf %24, %25 : vector<4x64xf32>
    %27 = vector.shape_cast %4 : vector<4x64xf32> to vector<4x1x64xf32>
    %28 = vector.shape_cast %5 : vector<4x64xf32> to vector<1x4x64xf32>
    %29 = vector.broadcast %27 : vector<4x1x64xf32> to vector<4x4x64xf32>
    %30 = vector.broadcast %28 : vector<1x4x64xf32> to vector<4x4x64xf32>
    %31 = arith.mulf %29, %30 : vector<4x4x64xf32>
    %cst_12 = arith.constant dense<0.000000e+00> : vector<4x4xf32>
    %32 = vector.multi_reduction <add>, %31, %cst_12 [2] : vector<4x4x64xf32> to vector<4x4xf32>
    %33 = vector.broadcast %8 : vector<1x4xf32> to vector<4x4xf32>
    %34 = arith.addf %32, %33 : vector<4x4xf32>
    %cst_13 = arith.constant 0.000000e+00 : f32
    %35 = vector.broadcast %cst_13 : f32 to vector<4x4xf32>
    %36 = arith.maximumf %34, %35 : vector<4x4xf32>
    %37 = vector.shape_cast %36 : vector<4x4xf32> to vector<4x4x1xf32>
    %38 = vector.shape_cast %6 : vector<4x64xf32> to vector<1x4x64xf32>
    %39 = vector.broadcast %37 : vector<4x4x1xf32> to vector<4x4x64xf32>
    %40 = vector.broadcast %38 : vector<1x4x64xf32> to vector<4x4x64xf32>
    %41 = arith.mulf %39, %40 : vector<4x4x64xf32>
    %cst_14 = arith.constant dense<0.000000e+00> : vector<4x64xf32>
    %42 = vector.multi_reduction <add>, %41, %cst_14 [1] : vector<4x4x64xf32> to vector<4x64xf32>
    %43 = vector.broadcast %7 : vector<1x64xf32> to vector<4x64xf32>
    %44 = arith.addf %42, %43 : vector<4x64xf32>
    %45 = arith.addf %26, %44 : vector<4x64xf32>
    %46 = arith.negf %45 : vector<4x64xf32>
    %47 = math.exp %46 : vector<4x64xf32>
    %cst_15 = arith.constant 1.000000e+00 : f32
    %48 = vector.broadcast %cst_15 : f32 to vector<4x64xf32>
    %49 = arith.addf %48, %47 : vector<4x64xf32>
    %50 = arith.divf %48, %49 : vector<4x64xf32>
    %51 = vector.shape_cast %50 : vector<4x64xf32> to vector<4x64x1xf32>
    %52 = vector.broadcast %51 : vector<4x64x1xf32> to vector<4x64x256xf32>
    %53 = arith.mulf %0, %52 : vector<4x64x256xf32>
    %c0_16 = arith.constant 0 : index
    %c0_17 = arith.constant 0 : index
    %c0_18 = arith.constant 0 : index
    %54 = vector.load %arg3[%c0_16, %c0_17, %c0_18] : memref<4x64x256xf32, #tpu.memory_space<vmem>>, vector<4x64x256xf32>
    tpu.vector_store %arg3[%c0_16, %c0_17, %c0_18], %53 {strides = array<i32>} : memref<4x64x256xf32, #tpu.memory_space<vmem>>, vector<4x64x256xf32>,
    return
  }
  func.func @transform_0(%arg0: i32) -> (i32, i32, i32) {
    %c0_i32 = arith.constant 0 : i32
    %c0_i32_0 = arith.constant 0 : i32
    %c0_i32_1 = arith.constant 0 : i32
    return %arg0, %c0_i32, %c0_i32_0 : i32, i32, i32
  }
  func.func @transform_1(%arg0: i32) -> (i32, i32) {
    %c0_i32 = arith.constant 0 : i32
    %c0_i32_0 = arith.constant 0 : i32
    %c0_i32_1 = arith.constant 0 : i32
    return %c0_i32, %c0_i32_0 : i32, i32
  }
  func.func @transform_2(%arg0: i32) -> (i32, i32, i32) {
    %c0_i32 = arith.constant 0 : i32
    %c0_i32_0 = arith.constant 0 : i32
    %c0_i32_1 = arith.constant 0 : i32
    return %arg0, %c0_i32, %c0_i32_0 : i32, i32, i32
  }
}

</mosaic_0001>

<bundles_post_ra>
// kernel: cam_forward.1
= control target key start
LH: loop header
LB: loop body
LE: loop exit
PB: predicated region body
PF: predicated region fallthrough
CT: control target
= control target key end

     0   :  { %s3852_s9 = smov 0   ;;  %s6081_s0 = inlined_call_operand.vmem [shape: f32[8,64,256], index: 0, kind: input, shape index: {}]   ;;  %s6082_s1 = inlined_call_operand.vmem [shape: f32[10,64], index: 1, kind: input, shape index: {}]   ;;  %s6083_s2 = inlined_call_operand.vmem [shape: f32[8,64,256], index: 2, kind: output, shape index: {}]  }
   0x1 LB: > { %s3716_s10 = sadd.s32 4294967295, %s3834_s9   ;;  %p3720_p0 = scmp.ge.s32.totalorder %s3834_s9, 1  ;;  %s3834_s9 = sphi %s3852_s9, %s12_s9  }
   0x2   : > { %p114_p1 = scmp.lt.s32.totalorder %s3834_s9, 3 }
   0x4   : > { %p115_p2 = pnand %p3720_p0, %p114_p1 }
   0x6   : > { %118 = sbr.rel (%p115_p2) target bundleno = 1795 (0x703), region = 28 }
   0xb   : > { %s3721_s11 = sshll.u32 %s3716_s10, 2  ;;  %v445_v40 = vlaneseq  ;;  %vm1268_vm0 = vcmask 130112   ;;  %vm1275_vm1 = vcmask 195712   ;;  %vm1282_vm2 = vcmask 261312  }
   0xc   : > { %p139_p3 = scmp.lt.s32.totalorder %s3721_s11, 7  ;;  %vm1289_vm3 = vcmask 326912   ;;  %vm1296_vm4 = vcmask 392512   ;;  %vm1303_vm5 = vcmask 458112   ;;  %vm1310_vm6 = vcmask 523712  }
   0xd   : > { %v3994_v47 = vshrl.u32 %v445_v40, 7  ;;  %v1258_v48 = vand.u32 127, %v445_v40  ;;  %vm1897_vm7 = vcmask 1041409   ;;  %vm1899_vm8 = vcmask 1042434  }
   0xe   : > { %s6472_s11 = smov (!%p139_p3, %s3721_s11), 7  ;;  %vm1901_vm9 = vcmask 1043459   ;;  %vm1916_vm10 = vcmask 519168  }
   0xf   : > { %s3735_s12 = sshll.u32 %s6472_s11, 7  ;;  %6218 = vst [vmem:[#allocation2_spill] sm:$0xff] %v3994_v47  ;;  %v4007_v53 = vsub.s32 %v1258_v48, %v3994_v47  ;;  %v1263_v54 = vadd.s32 4294967288, %v1258_v48  ;;  %v1270_v55 = vadd.s32 4294967280, %v1258_v48  ;;  %v1277_v56 = vadd.s32 4294967272, %v1258_v48 }
  0x10   : > { %s3868_s15 = scalar_lea.vmem %s6081_s0, %s3735_s12  ;;  %v1284_v59 = vadd.s32 4294967264, %v1258_v48  ;;  %v1291_v60 = vadd.s32 4294967256, %v1258_v48  ;;  %v1298_v61 = vadd.s32 4294967248, %v1258_v48  ;;  %v1305_v62 = vadd.s32 4294967240, %v1258_v48  ;;  %s5947_s26 = scalar_lea.vmem %s6083_s2, %s3735_s12 }
  0x11   : > { %v3871_v0 = vld [vmem:[%s3868_s15 + $0x20] sm:$0xff]  ;;  %v3874_v1 = vld [vmem:[%s3868_s15 + $0x28] sm:$0xff]  ;;  %v3885_v5 = vld [vmem:[%s3868_s15 + $0x30] sm:$0xff]  ;;  %6219 = vst [vmem:[#allocation3_spill] sm:$0xff] %v4007_v53 }
  0x12   : > { %v3877_v2 = vld [vmem:[%s3868_s15] sm:$0xff]  ;;  %v222_v3 = vadd.f32 %v3874_v1, %v3871_v0  ;;  %v3882_v4 = vld [vmem:[%s3868_s15 + $0x8] sm:$0xff]  ;;  %v3888_v6 = vld [vmem:[%s3868_s15 + $0x38] sm:$0xff] }
  0x13   : > { %v216_v7 = vadd.f32 %v3882_v4, %v3877_v2  ;;  %v3893_v8 = vld [vmem:[%s3868_s15 + $0x10] sm:$0xff]  ;;  %v3896_v9 = vld [vmem:[%s3868_s15 + $0x18] sm:$0xff]  ;;  %v225_v10 = vadd.f32 %v3888_v6, %v3885_v5  ;;  %v3909_v14 = vld [vmem:[%s3868_s15 + $0x40] sm:$0xff] }
  0x14   : > { %223 = vadd.xlane.f32.xlu1 %v222_v3  ;;  %v219_v11 = vadd.f32 %v3896_v9, %v3893_v8  ;;  %v3903_v12 = vld [vmem:[%s3868_s15 + $0x50] sm:$0xff]  ;;  %v3906_v13 = vld [vmem:[%s3868_s15 + $0x58] sm:$0xff]  ;;  %v3912_v15 = vld [vmem:[%s3868_s15 + $0x48] sm:$0xff]  ;;  %v4018_v3 = vsub.s32 %v1263_v54, %v3994_v47 }
  0x15   : > { %217 = vadd.xlane.f32.xlu0 %v216_v7  ;;  %v231_v16 = vadd.f32 %v3906_v13, %v3903_v12  ;;  %v228_v17 = vadd.f32 %v3912_v15, %v3909_v14  ;;  %v3919_v18 = vld [vmem:[%s3868_s15 + $0x70] sm:$0xff]  ;;  %v3922_v19 = vld [vmem:[%s3868_s15 + $0x78] sm:$0xff]  ;;  %v3925_v20 = vld [vmem:[%s3868_s15 + $0x60] sm:$0xff]  ;;  %v4021_v7 = vsub.s32 %v1270_v55, %v3994_v47 }
  0x16   : > { %v3928_v21 = vld [vmem:[%s3868_s15 + $0x68] sm:$0xff]  ;;  %v237_v22 = vadd.f32 %v3922_v19, %v3919_v18  ;;  %v3935_v24 = vld [vmem:[%s3868_s15 + $0x90] sm:$0xff]  ;;  %v3938_v25 = vld [vmem:[%s3868_s15 + $0x98] sm:$0xff]  ;;  %6220 = vst [vmem:[#allocation4_spill] sm:$0xff] %v4018_v3 }
  0x17   : > { %v234_v23 = vadd.f32 %v3928_v21, %v3925_v20  ;;  %v3941_v26 = vld [vmem:[%s3868_s15 + $0x80] sm:$0xff]  ;;  %v3944_v27 = vld [vmem:[%s3868_s15 + $0x88] sm:$0xff]  ;;  %v243_v28 = vadd.f32 %v3938_v25, %v3935_v24  ;;  %v3951_v30 = vld [vmem:[%s3868_s15 + $0xb0] sm:$0xff]  ;;  %6221 = vst [vmem:[#allocation5_spill] sm:$0xff] %v4021_v7 }
  0x18   : > { %226 = vadd.xlane.f32.xlu1 %v225_v10  ;;  %v240_v29 = vadd.f32 %v3944_v27, %v3941_v26  ;;  %v3954_v31 = vld [vmem:[%s3868_s15 + $0xb8] sm:$0xff]  ;;  %v3957_v32 = vld [vmem:[%s3868_s15 + $0xa0] sm:$0xff]  ;;  %v3960_v33 = vld [vmem:[%s3868_s15 + $0xa8] sm:$0xff]  ;;  %v4024_v10 = vsub.s32 %v1277_v56, %v3994_v47 }
  0x19   : > { %220 = vadd.xlane.f32.xlu0 %v219_v11  ;;  %v249_v34 = vadd.f32 %v3954_v31, %v3951_v30  ;;  %v246_v35 = vadd.f32 %v3960_v33, %v3957_v32  ;;  %v3967_v36 = vld [vmem:[%s3868_s15 + $0xd0] sm:$0xff]  ;;  %v3970_v37 = vld [vmem:[%s3868_s15 + $0xd8] sm:$0xff]  ;;  %v3973_v38 = vld [vmem:[%s3868_s15 + $0xc0] sm:$0xff]  ;;  %v4027_v11 = vsub.s32 %v1284_v59, %v3994_v47 }
  0x1a   : > { %v3976_v39 = vld [vmem:[%s3868_s15 + $0xc8] sm:$0xff]  ;;  %v255_v41 = vadd.f32 %v3970_v37, %v3967_v36  ;;  %v3981_v42 = vld [vmem:[%s3868_s15 + $0xf0] sm:$0xff]  ;;  %v3986_v44 = vld [vmem:[%s3868_s15 + $0xf8] sm:$0xff]  ;;  %6222 = vst [vmem:[#allocation6_spill] sm:$0xff] %v4024_v10 }
  0x1b   : > { %v252_v43 = vadd.f32 %v3976_v39, %v3973_v38  ;;  %v3989_v45 = vld [vmem:[%s3868_s15 + $0xe0] sm:$0xff]  ;;  %v3992_v46 = vld [vmem:[%s3868_s15 + $0xe8] sm:$0xff]  ;;  %v261_v49 = vadd.f32 %v3986_v44, %v3981_v42  ;;  %v4001_v51 = vld [vmem:[%s3868_s15 + $0x110] sm:$0xff]  ;;  %6223 = vst [vmem:[#allocation7_spill] sm:$0xff] %v4027_v11 }
  0x1c   : > { %232 = vadd.xlane.f32.xlu1 %v231_v16  ;;  %v258_v50 = vadd.f32 %v3992_v46, %v3989_v45  ;;  %v4004_v52 = vld [vmem:[%s3868_s15 + $0x118] sm:$0xff]  ;;  %v4010_v57 = vld [vmem:[%s3868_s15 + $0x100] sm:$0xff]  ;;  %v4013_v58 = vld [vmem:[%s3868_s15 + $0x108] sm:$0xff]  ;;  %v4030_v16 = vsub.s32 %v1291_v60, %v3994_v47 }
  0x1d   : > { %229 = vadd.xlane.f32.xlu0 %v228_v17  ;;  %v267_v63 = vadd.f32 %v4004_v52, %v4001_v51  ;;  %v4033_v17 = vsub.s32 %v1298_v61, %v3994_v47  ;;  %v4060_v48 = vld [vmem:[%s3868_s15 + $0x158] sm:$0xff]  ;;  %v4073_v56 = vld [vmem:[%s3868_s15 + $0x170] sm:$0xff]  ;;  %v4079_v60 = vld [vmem:[%s3868_s15 + $0x160] sm:$0xff] }
  0x1e   : > { %6224 = vst [vmem:[#allocation8_spill] sm:$0xff] %v4030_v16  ;;  %v4076_v59 = vld [vmem:[%s3868_s15 + $0x178] sm:$0xff]  ;;  %v4082_v61 = vld [vmem:[%s3868_s15 + $0x168] sm:$0xff]  ;;  %v4111_v11 = vld [vmem:[%s3868_s15 + $0x1a0] sm:$0xff] }
  0x1f   : > { %6225 = vst [vmem:[#allocation9_spill] sm:$0xff] %v4033_v17  ;;  %v4105_v17 = vld [vmem:[%s3868_s15 + $0x1b0] sm:$0xff]  ;;  %v4108_v16 = vld [vmem:[%s3868_s15 + $0x1b8] sm:$0xff]  ;;  %6230 = vst [vmem:[#allocation14_spill] sm:$0xff] %v4111_v11 }
  0x20   : > { %238 = vadd.xlane.f32.xlu1 %v237_v22  ;;  %v4036_v22 = vsub.s32 %v1305_v62, %v3994_v47  ;;  %v285_v62 = vadd.f32 %v4076_v59, %v4073_v56  ;;  %6228 = vst [vmem:[#allocation12_spill] sm:$0xff] %v4105_v17  ;;  %6229 = vst [vmem:[#allocation13_spill] sm:$0xff] %v4108_v16  ;;  %v4114_v10 = vld [vmem:[%s3868_s15 + $0x1a8] sm:$0xff]  ;;  %v4121_v7 = vld [vmem:[%s3868_s15 + $0x1d0] sm:$0xff] }
  0x21   : > { %235 = vadd.xlane.f32.xlu0 %v234_v23  ;;  %v264_v23 = vadd.f32 %v4013_v58, %v4010_v57  ;;  %6231 = vst [vmem:[#allocation15_spill] sm:$0xff] %v4114_v10  ;;  %v4124_v53 = vld [vmem:[%s3868_s15 + $0x1d8] sm:$0xff]  ;;  %v4127_v3 = vld [vmem:[%s3868_s15 + $0x1c0] sm:$0xff]  ;;  %v4130_v47 = vld [vmem:[%s3868_s15 + $0x1c8] sm:$0xff] }
  0x22   : > { %6226 = vst [vmem:[#allocation10_spill] sm:$0xff] %v4036_v22  ;;  %v4098_v22 = vld [vmem:[%s3868_s15 + $0x188] sm:$0xff]  ;;  %6232 = vst [vmem:[#allocation16_spill] sm:$0xff] %v4127_v3 }
  0x23   : > { %6233 = vst [vmem:[#allocation17_spill] sm:$0xff] %v4130_v47 }
  0x24   : > { %244 = vadd.xlane.f32.xlu1 %v243_v28  ;;  %v4041_v28 = vld [vmem:[%s3868_s15 + $0x130] sm:$0xff] }
  0x25   : > { %241 = vadd.xlane.f32.xlu0 %v240_v29  ;;  %v4044_v29 = vld [vmem:[%s3868_s15 + $0x138] sm:$0xff] }
  0x26   : > { %v273_v40 = vadd.f32 %v4044_v29, %v4041_v28 }
  0x28   : > { %250 = vadd.xlane.f32.xlu1 %v249_v34  ;;  %v4047_v34 = vld [vmem:[%s3868_s15 + $0x120] sm:$0xff] }
  0x29   : > { %247 = vadd.xlane.f32.xlu0 %v246_v35  ;;  %v4050_v35 = vld [vmem:[%s3868_s15 + $0x128] sm:$0xff] }
  0x2c   : > { %256 = vadd.xlane.f32.xlu1 %v255_v41  ;;  %v270_v41 = vadd.f32 %v4050_v35, %v4047_v34 }
  0x2d   : > { %253 = vadd.xlane.f32.xlu0 %v252_v43  ;;  %v4057_v43 = vld [vmem:[%s3868_s15 + $0x150] sm:$0xff] }
  0x2e   : > { %v279_v54 = vadd.f32 %v4060_v48, %v4057_v43 }
  0x30   : > { %262 = vadd.xlane.f32.xlu1 %v261_v49  ;;  %v4063_v49 = vld [vmem:[%s3868_s15 + $0x140] sm:$0xff] }
  0x31   : > { %259 = vadd.xlane.f32.xlu0 %v258_v50  ;;  %v4066_v50 = vld [vmem:[%s3868_s15 + $0x148] sm:$0xff] }
  0x32   : > { %v276_v55 = vadd.f32 %v4066_v50, %v4063_v49 }
  0x34   : > { %268 = vadd.xlane.f32.xlu1 %v267_v63  ;;  %v282_v63 = vadd.f32 %v4082_v61, %v4079_v60 }
  0x35   : > { %265 = vadd.xlane.f32.xlu0 %v264_v23  ;;  %v4089_v23 = vld [vmem:[%s3868_s15 + $0x190] sm:$0xff] }
  0x38   : > { %274 = vadd.xlane.f32.xlu1 %v273_v40  ;;  %v4092_v40 = vld [vmem:[%s3868_s15 + $0x198] sm:$0xff] }
  0x39   : > { %271 = vadd.xlane.f32.xlu0 %v270_v41  ;;  %v4095_v41 = vld [vmem:[%s3868_s15 + $0x180] sm:$0xff] }
  0x3a   : > { %6227 = vst [vmem:[#allocation11_spill] sm:$0xff] %v4095_v41 }
  0x3c   : > { %280 = vadd.xlane.f32.xlu1 %v279_v54  ;;  %v291_v54 = vadd.f32 %v4092_v40, %v4089_v23 }
  0x3d   : > { %277 = vadd.xlane.f32.xlu0 %v276_v55  ;;  %v288_v55 = vadd.f32 %v4098_v22, %v4095_v41  ;;  %v303_v41 = vadd.f32 %v4124_v53, %v4121_v7 }
  0x40   : > { %286 = vadd.xlane.f32.xlu1 %v285_v62  ;;  %v297_v62 = vadd.f32 %v4108_v16, %v4105_v17  ;;  %v4140_v17 = vld [vmem:[%s3868_s15 + $0x1f8] sm:$0xff] }
  0x41   : > { %283 = vadd.xlane.f32.xlu0 %v282_v63  ;;  %v294_v63 = vadd.f32 %v4114_v10, %v4111_v11  ;;  %v4143_v11 = vld [vmem:[%s3868_s15 + $0x1e0] sm:$0xff]  ;;  %v4146_v10 = vld [vmem:[%s3868_s15 + $0x1e8] sm:$0xff] }
  0x44   : > { %292 = vadd.xlane.f32.xlu1 %v291_v54  ;;  %v300_v54 = vadd.f32 %v4130_v47, %v4127_v3  ;;  %v344_v3 = vmax.f32 %v3877_v2, %v3882_v4  ;;  %v353_v47 = vmax.f32 %v3885_v5, %v3888_v6  ;;  %v365_v2 = vmax.f32 %v3919_v18, %v3922_v19 }
  0x45   : > { %289 = vadd.xlane.f32.xlu0 %v288_v55  ;;  %v4137_v55 = vld [vmem:[%s3868_s15 + $0x1f0] sm:$0xff]  ;;  %v362_v4 = vmax.f32 %v3925_v20, %v3928_v21  ;;  %v377_v5 = vmax.f32 %v3951_v30, %v3954_v31  ;;  %v374_v6 = vmax.f32 %v3957_v32, %v3960_v33  ;;  %v392_v18 = vmax.f32 %v4010_v57, %v4013_v58  ;;  %v6234_v30 = vld [vmem:[#allocation11_spill] sm:$0xff]  ;;  %v6235_v32 = vld [vmem:[#allocation13_spill] sm:$0xff] }
  0x46   : > { %v309_v16 = vadd.f32 %v4140_v17, %v4137_v55  ;;  %v401_v19 = vmax.f32 %v4041_v28, %v4044_v29  ;;  %v398_v20 = vmax.f32 %v4047_v34, %v4050_v35  ;;  %v407_v21 = vmax.f32 %v4057_v43, %v4060_v48  ;;  %v6236_v33 = vld [vmem:[#allocation12_spill] sm:$0xff] }
  0x47   : > { %v416_v31 = vmax.f32 %v6234_v30, %v4098_v22 }
  0x48   : > { %298 = vadd.xlane.f32.xlu1 %v297_v62  ;;  %v306_v62 = vadd.f32 %v4146_v10, %v4143_v11 }
  0x49   : > { %295 = vadd.xlane.f32.xlu0 %v294_v63  ;;  %v347_v63 = vmax.f32 %v3893_v8, %v3896_v9  ;;  %v356_v8 = vmax.f32 %v3909_v14, %v3912_v15  ;;  %v383_v9 = vmax.f32 %v3967_v36, %v3970_v37  ;;  %v386_v14 = vmax.f32 %v3989_v45, %v3992_v46  ;;  %v6237_v37 = vld [vmem:[#allocation15_spill] sm:$0xff]  ;;  %v6240_v45 = vld [vmem:[#allocation16_spill] sm:$0xff] }
  0x4a   : > { %v395_v15 = vmax.f32 %v4001_v51, %v4004_v52  ;;  %v425_v36 = vmax.f32 %v6236_v33, %v6235_v32  ;;  %v434_v51 = vmax.f32 %v4143_v11, %v4146_v10  ;;  %v6241_v52 = vld [vmem:[#allocation2_spill] sm:$0xff] }
  0x4b   : > { %v4217_v57 = vsub.s32 0, %v6241_v52  ;;  %v482_v34 = vsub.s32 1, %v6241_v52 }
  0x4c   : > { %304 = vadd.xlane.f32.xlu1 %v303_v41  ;;  %v350_v41 = vmax.f32 %v3871_v0, %v3874_v1  ;;  %v371_v0 = vmax.f32 %v3935_v24, %v3938_v25  ;;  %v368_v1 = vmax.f32 %v3941_v26, %v3944_v27  ;;  %v404_v24 = vmax.f32 %v4063_v49, %v4066_v50 }
  0x4d   : > { %301 = vadd.xlane.f32.xlu0 %v300_v54  ;;  %v359_v54 = vmax.f32 %v3903_v12, %v3906_v13  ;;  %v380_v12 = vmax.f32 %v3973_v38, %v3976_v39  ;;  %v389_v13 = vmax.f32 %v3981_v42, %v3986_v44  ;;  %v413_v25 = vmax.f32 %v4073_v56, %v4076_v59  ;;  %v6238_v38 = vld [vmem:[#allocation14_spill] sm:$0xff]  ;;  %v6239_v44 = vld [vmem:[#allocation17_spill] sm:$0xff] }
  0x4e   : > { %v410_v26 = vmax.f32 %v4079_v60, %v4082_v61  ;;  %v419_v27 = vmax.f32 %v4089_v23, %v4092_v40  ;;  %v422_v39 = vmax.f32 %v6238_v38, %v6237_v37  ;;  %v431_v42 = vmax.f32 %v4121_v7, %v4124_v53  ;;  %6242 = vst [vmem:[#allocation11_spill] sm:$0xff] %v4217_v57  ;;  %v440_v53 = vld [vmem:[%s6082_s1] sm:$0xf] }
  0x4f   : > { %v428_v46 = vmax.f32 %v6240_v45, %v6239_v44  ;;  %v483_v48 = vrot.slane %v440_v53, %v482_v34  ;;  %v517_v23 = vsub.s32 2, %v6241_v52 }
  0x50   : > { %310 = vadd.xlane.f32.xlu1 %v309_v16  ;;  %v3836_v16 = vmov 0  }
  0x51   : > { %307 = vadd.xlane.f32.xlu0 %v306_v62  ;;  %3747 = vset.pattern.permute.xlu1 %v3836_v16  ;;  %v518_v62 = vrot.slane %v440_v53, %v517_v23 }
  0x52   : > { %3746 = vset.pattern.permute.xlu0 %v3836_v16 }
  0x54   : > { %348 = vmax.xlane.f32.xlu1 %v347_v63 }
  0x55   : > { %345 = vmax.xlane.f32.xlu0 %v344_v3  ;;  %v448_v3 = vrot.slane %v440_v53, %v4217_v57 }
  0x58   : > { %354 = vmax.xlane.f32.xlu1 %v353_v47  ;;  %v437_v47 = vmax.f32 %v4137_v55, %v4140_v17 }
  0x59   : > { %351 = vmax.xlane.f32.xlu0 %v350_v41 }
  0x5c   : > { %360 = vmax.xlane.f32.xlu1 %v359_v54 }
  0x5d   : > { %357 = vmax.xlane.f32.xlu0 %v356_v8 }
  0x60   : > { %366 = vmax.xlane.f32.xlu1 %v365_v2 }
  0x61   : > { %363 = vmax.xlane.f32.xlu0 %v362_v4 }
  0x64   : > { %372 = vmax.xlane.f32.xlu1 %v371_v0  ;;  %v552_v0 = vsub.s32 3, %v6241_v52 }
  0x65   : > { %369 = vmax.xlane.f32.xlu0 %v368_v1 }
  0x68   : > { %378 = vmax.xlane.f32.xlu1 %v377_v5 }
  0x69   : > { %375 = vmax.xlane.f32.xlu0 %v374_v6  ;;  %v553_v6 = vrot.slane %v440_v53, %v552_v0 }
  0x6c   : > { %384 = vmax.xlane.f32.xlu1 %v383_v9 }
  0x6d   : > { %381 = vmax.xlane.f32.xlu0 %v380_v12 }
  0x70   : > { %390 = vmax.xlane.f32.xlu1 %v389_v13 }
  0x71   : > { %387 = vmax.xlane.f32.xlu0 %v386_v14 }
  0x74   : > { %396 = vmax.xlane.f32.xlu1 %v395_v15 }
  0x75   : > { %393 = vmax.xlane.f32.xlu0 %v392_v18 }
  0x78   : > { %402 = vmax.xlane.f32.xlu1 %v401_v19 }
  0x79   : > { %399 = vmax.xlane.f32.xlu0 %v398_v20 }
  0x7c   : > { %408 = vmax.xlane.f32.xlu1 %v407_v21 }
  0x7d   : > { %405 = vmax.xlane.f32.xlu0 %v404_v24 }
  0x80   : > { %414 = vmax.xlane.f32.xlu1 %v413_v25 }
  0x81   : > { %411 = vmax.xlane.f32.xlu0 %v410_v26 }
  0x84   : > { %420 = vmax.xlane.f32.xlu1 %v419_v27 }
  0x85   : > { %417 = vmax.xlane.f32.xlu0 %v416_v31 }
  0x88   : > { %426 = vmax.xlane.f32.xlu1 %v425_v36 }
  0x89   : > { %423 = vmax.xlane.f32.xlu0 %v422_v39 }
  0x8c   : > { %432 = vmax.xlane.f32.xlu1 %v431_v42 }
  0x8d   : > { %429 = vmax.xlane.f32.xlu0 %v428_v46 }
  0x90   : > { %438 = vmax.xlane.f32.xlu1 %v437_v47 }
  0x91   : > { %435 = vmax.xlane.f32.xlu0 %v434_v51 }
  0x9d   : > { %v4222_v58 = vpop.xlane.xlu1 %223 }
  0x9e   : > { %v4225_v7 = vpop.xlane.xlu0 %217 }
  0xa1   : > { %v4227_v17 = vpop.xlane.xlu1 %226  ;;  %454 = vbcast.lane.b32.xlu1 %v448_v3, 264 }
  0xa2   : > { %v4229_v10 = vpop.xlane.xlu0 %220 }
  0xa5   : > { %v4231_v11 = vpop.xlane.xlu1 %232  ;;  %458 = vbcast.lane.b32.xlu1 %v448_v3, 272 }
  0xa6   : > { %v4233_v22 = vpop.xlane.xlu0 %229 }
  0xa7   : > { %450 = vbcast.lane.b32.xlu0 %v448_v3, 256 }
  0xa9   : > { %v4235_v28 = vpop.xlane.xlu1 %238  ;;  %462 = vbcast.lane.b32.xlu1 %v448_v3, 280 }
  0xaa   : > { %v4237_v29 = vpop.xlane.xlu0 %235 }
  0xab   : > { %466 = vbcast.lane.b32.xlu0 %v448_v3, 288 }
  0xad   : > { %v4240_v35 = vpop.xlane.xlu1 %244  ;;  %470 = vbcast.lane.b32.xlu1 %v448_v3, 296 }
  0xae   : > { %v4242_v43 = vpop.xlane.xlu0 %241 }
  0xaf   : > { %474 = vbcast.lane.b32.xlu0 %v448_v3, 304 }
  0xb1   : > { %v4244_v49 = vpop.xlane.xlu1 %250  ;;  %478 = vbcast.lane.b32.xlu1 %v448_v3, 312 }
  0xb2   : > { %v4246_v50 = vpop.xlane.xlu0 %247 }
  0xb3   : > { %485 = vbcast.lane.b32.xlu0 %v483_v48, 256 }
  0xb5   : > { %v4248_v56 = vpop.xlane.xlu1 %256  ;;  %489 = vbcast.lane.b32.xlu1 %v483_v48, 264 }
  0xb6   : > { %v4250_v59 = vpop.xlane.xlu0 %253 }
  0xb7   : > { %493 = vbcast.lane.b32.xlu0 %v483_v48, 272 }
  0xb9   : > { %v4252_v60 = vpop.xlane.xlu1 %262  ;;  %497 = vbcast.lane.b32.xlu1 %v483_v48, 280 }
  0xba   : > { %v4254_v61 = vpop.xlane.xlu0 %259 }
  0xbb   : > { %6243 = vst [vmem:[#allocation13_spill] sm:$0xff] %v4254_v61  ;;  %501 = vbcast.lane.b32.xlu0 %v483_v48, 288 }
  0xbd   : > { %v4257_v40 = vpop.xlane.xlu1 %268  ;;  %505 = vbcast.lane.b32.xlu1 %v483_v48, 296 }
  0xbe   : > { %v4259_v55 = vpop.xlane.xlu0 %265 }
  0xbf   : > { %6244 = vst [vmem:[#allocation12_spill] sm:$0xff] %v4259_v55  ;;  %509 = vbcast.lane.b32.xlu0 %v483_v48, 304 }
  0xc1   : > { %v4261_v63 = vpop.xlane.xlu1 %274  ;;  %513 = vbcast.lane.b32.xlu1 %v483_v48, 312 }
  0xc2   : > { %v4263_v41 = vpop.xlane.xlu0 %271 }
  0xc3   : > { %6245 = vst [vmem:[#allocation15_spill] sm:$0xff] %v4263_v41  ;;  %520 = vbcast.lane.b32.xlu0 %v518_v62, 256 }
  0xc5   : > { %v4265_v54 = vpop.xlane.xlu1 %280  ;;  %524 = vbcast.lane.b32.xlu1 %v518_v62, 264 }
  0xc6   : > { %v4267_v8 = vpop.xlane.xlu0 %277 }
  0xc7   : > { %6246 = vst [vmem:[#allocation14_spill] sm:$0xff] %v4267_v8  ;;  %528 = vbcast.lane.b32.xlu0 %v518_v62, 272 }
  0xc9   : > { %v4269_v2 = vpop.xlane.xlu1 %286  ;;  %532 = vbcast.lane.b32.xlu1 %v518_v62, 280 }
  0xca   : > { %v4271_v4 = vpop.xlane.xlu0 %283 }
  0xcb   : > { %6247 = vst [vmem:[#allocation17_spill] sm:$0xff] %v4271_v4  ;;  %536 = vbcast.lane.b32.xlu0 %v518_v62, 288 }
  0xcd   : > { %v4274_v1 = vpop.xlane.xlu1 %292  ;;  %540 = vbcast.lane.b32.xlu1 %v518_v62, 296 }
  0xce   : > { %v4276_v5 = vpop.xlane.xlu0 %289 }
  0xcf   : > { %6248 = vst [vmem:[#allocation16_spill] sm:$0xff] %v4276_v5  ;;  %544 = vbcast.lane.b32.xlu0 %v518_v62, 304 }
  0xd1   : > { %v4278_v9 = vpop.xlane.xlu1 %298  ;;  %548 = vbcast.lane.b32.xlu1 %v518_v62, 312 }
  0xd2   : > { %v4280_v12 = vpop.xlane.xlu0 %295 }
  0xd3   : > { %6249 = vst [vmem:[#allocation2_spill] sm:$0xff] %v4280_v12  ;;  %555 = vbcast.lane.b32.xlu0 %v553_v6, 256 }
  0xd5   : > { %v4282_v13 = vpop.xlane.xlu1 %304  ;;  %559 = vbcast.lane.b32.xlu1 %v553_v6, 264 }
  0xd6   : > { %v4284_v14 = vpop.xlane.xlu0 %301 }
  0xd7   : > { %6250 = vst [vmem:[#allocation18_spill] sm:$0xff] %v4284_v14  ;;  %563 = vbcast.lane.b32.xlu0 %v553_v6, 272 }
  0xd9   : > { %v4286_v15 = vpop.xlane.xlu1 %310  ;;  %567 = vbcast.lane.b32.xlu1 %v553_v6, 280 }
  0xda   : > { %v4288_v18 = vpop.xlane.xlu0 %307 }
  0xdb   : > { %6251 = vst [vmem:[#allocation19_spill] sm:$0xff] %v4288_v18  ;;  %571 = vbcast.lane.b32.xlu0 %v553_v6, 288 }
  0xdd   : > { %v4290_v19 = vpop.xlane.xlu1 %348  ;;  %575 = vbcast.lane.b32.xlu1 %v553_v6, 296 }
  0xde   : > { %6252 = vst [vmem:[#allocation20_spill] sm:$0xff] %v4290_v19  ;;  %v4292_v20 = vpop.xlane.xlu0 %345 }
  0xdf   : > { %6253 = vst [vmem:[#allocation21_spill] sm:$0xff] %v4292_v20  ;;  %579 = vbcast.lane.b32.xlu0 %v553_v6, 304 }
  0xe1   : > { %v4294_v21 = vpop.xlane.xlu1 %354  ;;  %583 = vbcast.lane.b32.xlu1 %v553_v6, 312 }
  0xe2   : > { %6254 = vst [vmem:[#allocation22_spill] sm:$0xff] %v4294_v21  ;;  %v4296_v24 = vpop.xlane.xlu0 %351 }
  0xe3   : > { %6255 = vst [vmem:[#allocation23_spill] sm:$0xff] %v4296_v24 }
  0xe5   : > { %v4298_v25 = vpop.xlane.xlu1 %360 }
  0xe6   : > { %6256 = vst [vmem:[#allocation24_spill] sm:$0xff] %v4298_v25  ;;  %v4300_v26 = vpop.xlane.xlu0 %357 }
  0xe7   : > { %6257 = vst [vmem:[#allocation25_spill] sm:$0xff] %v4300_v26 }
  0xe9   : > { %v4302_v27 = vpop.xlane.xlu1 %366 }
  0xea   : > { %6258 = vst [vmem:[#allocation26_spill] sm:$0xff] %v4302_v27  ;;  %v4304_v30 = vpop.xlane.xlu0 %363 }
  0xeb   : > { %6259 = vst [vmem:[#allocation27_spill] sm:$0xff] %v4304_v30 }
  0xed   : > { %v4306_v31 = vpop.xlane.xlu1 %372 }
  0xee   : > { %6260 = vst [vmem:[#allocation28_spill] sm:$0xff] %v4306_v31  ;;  %v4308_v32 = vpop.xlane.xlu0 %369  ;;  %v4381_v31 = vmul.f32 0.00390625, %v4233_v22 }
  0xef   : > { %6261 = vst [vmem:[#allocation29_spill] sm:$0xff] %v4308_v32 }
  0xf1   : > { %v4310_v33 = vpop.xlane.xlu1 %378 }
  0xf2   : > { %6262 = vst [vmem:[#allocation30_spill] sm:$0xff] %v4310_v33  ;;  %v4312_v36 = vpop.xlane.xlu0 %375 }
  0xf3   : > { %6263 = vst [vmem:[#allocation31_spill] sm:$0xff] %v4312_v36 }
  0xf5   : > { %v4314_v37 = vpop.xlane.xlu1 %384 }
  0xf6   : > { %6264 = vst [vmem:[#allocation32_spill] sm:$0xff] %v4314_v37  ;;  %v4316_v38 = vpop.xlane.xlu0 %381 }
  0xf7   : > { %6265 = vst [vmem:[#allocation33_spill] sm:$0xff] %v4316_v38 }
  0xf9   : > { %v4318_v39 = vpop.xlane.xlu1 %390 }
  0xfa   : > { %6266 = vst [vmem:[#allocation34_spill] sm:$0xff] %v4318_v39  ;;  %v4320_v42 = vpop.xlane.xlu0 %387 }
  0xfb   : > { %6267 = vst [vmem:[#allocation35_spill] sm:$0xff] %v4320_v42 }
  0xfd   : > { %v4322_v44 = vpop.xlane.xlu1 %396 }
  0xfe   : > { %6268 = vst [vmem:[#allocation36_spill] sm:$0xff] %v4322_v44  ;;  %v4324_v45 = vpop.xlane.xlu0 %393 }
  0xff   : > { %6269 = vst [vmem:[#allocation37_spill] sm:$0xff] %v4324_v45 }
 0x101   : > { %v4326_v46 = vpop.xlane.xlu1 %402 }
 0x102   : > { %6270 = vst [vmem:[#allocation38_spill] sm:$0xff] %v4326_v46  ;;  %v4328_v47 = vpop.xlane.xlu0 %399  ;;  %v4392_v46 = vmul.f32 0.00390625, %v4231_v11 }
 0x103   : > { %6271 = vst [vmem:[#allocation39_spill] sm:$0xff] %v4328_v47 }
 0x105   : > { %v4330_v51 = vpop.xlane.xlu1 %408 }
 0x106   : > { %6272 = vst [vmem:[#allocation40_spill] sm:$0xff] %v4330_v51  ;;  %v4332_v52 = vpop.xlane.xlu0 %405  ;;  %v4355_v51 = vmul.f32 0.00390625, %v4229_v10 }
 0x107   : > { %6273 = vst [vmem:[#allocation41_spill] sm:$0xff] %v4332_v52 }
 0x109   : > { %v4334_v53 = vpop.xlane.xlu1 %414 }
 0x10a   : > { %6274 = vst [vmem:[#allocation42_spill] sm:$0xff] %v4334_v53  ;;  %v4336_v3 = vpop.xlane.xlu0 %411  ;;  %v4358_v53 = vmul.f32 0.00390625, %v4225_v7 }
 0x10b   : > { %6275 = vst [vmem:[#allocation43_spill] sm:$0xff] %v4336_v3 }
 0x10d   : > { %v4338_v16 = vpop.xlane.xlu1 %420 }
 0x10e   : > { %6276 = vst [vmem:[#allocation44_spill] sm:$0xff] %v4338_v16  ;;  %v4340_v34 = vpop.xlane.xlu0 %417  ;;  %v4406_v16 = vmul.f32 0.00390625, %v4235_v28 }
 0x10f   : > { %6277 = vst [vmem:[#allocation45_spill] sm:$0xff] %v4340_v34 }
 0x111   : > { %v4342_v48 = vpop.xlane.xlu1 %426 }
 0x112   : > { %6278 = vst [vmem:[#allocation46_spill] sm:$0xff] %v4342_v48  ;;  %v4344_v23 = vpop.xlane.xlu0 %423 }
 0x113   : > { %6279 = vst [vmem:[#allocation47_spill] sm:$0xff] %v4344_v23 }
 0x115   : > { %v4346_v62 = vpop.xlane.xlu1 %432 }
 0x116   : > { %6280 = vst [vmem:[#allocation48_spill] sm:$0xff] %v4346_v62  ;;  %v4348_v0 = vpop.xlane.xlu0 %429 }
 0x117   : > { %6281 = vst [vmem:[#allocation49_spill] sm:$0xff] %v4348_v0  ;;  %v4378_v0 = vmul.f32 0.00390625, %v4227_v17  ;;  %v4395_v17 = vmul.f32 0.00390625, %v4237_v29 }
 0x119   : > { %v4350_v6 = vpop.xlane.xlu1 %438 }
 0x11a   : > { %6282 = vst [vmem:[#allocation50_spill] sm:$0xff] %v4350_v6  ;;  %v4352_v57 = vpop.xlane.xlu0 %435  ;;  %v4369_v6 = vmul.f32 0.00390625, %v4222_v58 }
 0x11b   : > { %6283 = vst [vmem:[#allocation51_spill] sm:$0xff] %v4352_v57 }
 0x11d   : > { %v4360_v39 = vpop.permute.xlu1 %454 }
 0x11e   : > { %6284 = vst [vmem:[#allocation52_spill] sm:$0xff] %v4360_v39  ;;  %v4362_v37 = vpop.permute.xlu0 %450  ;;  %v618_v33 = vmul.f32 %v4360_v39, %v4355_v51 }
 0x11f   : > { %6285 = vst [vmem:[#allocation53_spill] sm:$0xff] %v4362_v37  ;;  %v617_v62 = vmul.f32 %v4362_v37, %v4358_v53 }
 0x120   : > { %877 = vperm.xlu1 %3747, %v618_v33  }
 0x121   : > { %874 = vperm.xlu0 %3746, %v617_v62   ;;  %v4371_v10 = vpop.permute.xlu1 %458 }
 0x122   : > { %6286 = vst [vmem:[#allocation54_spill] sm:$0xff] %v4371_v10  ;;  %v4373_v57 = vpop.permute.xlu0 %466  ;;  %v619_v7 = vmul.f32 %v4371_v10, %v4369_v6 }
 0x123   : > { %6287 = vst [vmem:[#allocation55_spill] sm:$0xff] %v4373_v57  ;;  %v621_v62 = vmul.f32 %v4373_v57, %v4381_v31 }
 0x124   : > { %880 = vperm.xlu1 %3747, %v619_v7  }
 0x125   : > { %v4383_v48 = vpop.permute.xlu1 %462 }
 0x126   : > { %6288 = vst [vmem:[#allocation56_spill] sm:$0xff] %v4383_v48  ;;  %v4385_v58 = vpop.permute.xlu0 %474  ;;  %v620_v33 = vmul.f32 %v4383_v48, %v4378_v0 }
 0x127   : > { %6289 = vst [vmem:[#allocation57_spill] sm:$0xff] %v4385_v58  ;;  %v623_v23 = vmul.f32 %v4385_v58, %v4395_v17 }
 0x128   : > { %883 = vperm.xlu0 %3746, %v620_v33   ;;  %886 = vperm.xlu1 %3747, %v621_v62  }
 0x129   : > { %v4397_v22 = vpop.permute.xlu1 %470 }
 0x12a   : > { %6290 = vst [vmem:[#allocation58_spill] sm:$0xff] %v4397_v22  ;;  %v4399_v7 = vpop.permute.xlu0 %485  ;;  %v622_v34 = vmul.f32 %v4397_v22, %v4392_v46 }
 0x12b   : > { %6291 = vst [vmem:[#allocation59_spill] sm:$0xff] %v4399_v7  ;;  %v625_v62 = vmul.f32 %v4399_v7, %v4358_v53 }
 0x12c   : > { %889 = vperm.xlu0 %3746, %v622_v34   ;;  %892 = vperm.xlu1 %3747, %v623_v23  }
 0x12d   : > { %v4408_v11 = vpop.permute.xlu1 %478 }
 0x12e   : > { %6292 = vst [vmem:[#allocation60_spill] sm:$0xff] %v4408_v11  ;;  %v4410_v29 = vpop.permute.xlu0 %493  ;;  %v624_v33 = vmul.f32 %v4408_v11, %v4406_v16 }
 0x12f   : > { %6293 = vst [vmem:[#allocation61_spill] sm:$0xff] %v4410_v29  ;;  %v627_v34 = vmul.f32 %v4410_v29, %v4369_v6 }
 0x130   : > { %895 = vperm.xlu0 %3746, %v624_v33   ;;  %898 = vperm.xlu1 %3747, %v625_v62  }
 0x131   : > { %v4416_v44 = vpop.permute.xlu1 %489 }
 0x132   : > { %6294 = vst [vmem:[#allocation62_spill] sm:$0xff] %v4416_v44  ;;  %v4418_v3 = vpop.permute.xlu0 %501  ;;  %v626_v28 = vmul.f32 %v4416_v44, %v4355_v51 }
 0x133   : > { %6295 = vst [vmem:[#allocation63_spill] sm:$0xff] %v4418_v3  ;;  %v629_v62 = vmul.f32 %v4418_v3, %v4381_v31 }
 0x134   : > { %901 = vperm.xlu0 %3746, %v626_v28   ;;  %904 = vperm.xlu1 %3747, %v627_v34  }
 0x135   : > { %v4424_v23 = vpop.permute.xlu1 %497 }
 0x136   : > { %6296 = vst [vmem:[#allocation64_spill] sm:$0xff] %v4424_v23  ;;  %v4426_v52 = vpop.permute.xlu0 %509  ;;  %v628_v33 = vmul.f32 %v4424_v23, %v4378_v0 }
 0x137   : > { %6297 = vst [vmem:[#allocation65_spill] sm:$0xff] %v4426_v52  ;;  %v631_v34 = vmul.f32 %v4426_v52, %v4395_v17  ;;  %v6317_v52 = vld [vmem:[#allocation3_spill] sm:$0xff] }
 0x138   : > { %907 = vperm.xlu0 %3746, %v628_v33   ;;  %910 = vperm.xlu1 %3747, %v629_v62  }
 0x139   : > { %v4432_v27 = vpop.permute.xlu1 %505 }
 0x13a   : > { %6298 = vst [vmem:[#allocation66_spill] sm:$0xff] %v4432_v27  ;;  %v4434_v47 = vpop.permute.xlu0 %520  ;;  %v630_v28 = vmul.f32 %v4432_v27, %v4392_v46 }
 0x13b   : > { %6299 = vst [vmem:[#allocation67_spill] sm:$0xff] %v4434_v47  ;;  %v633_v62 = vmul.f32 %v4434_v47, %v4358_v53 }
 0x13c   : > { %913 = vperm.xlu0 %3746, %v630_v28   ;;  %916 = vperm.xlu1 %3747, %v631_v34  }
 0x13d   : > { %v4440_v25 = vpop.permute.xlu1 %513 }
 0x13e   : > { %6300 = vst [vmem:[#allocation68_spill] sm:$0xff] %v4440_v25  ;;  %v4442_v45 = vpop.permute.xlu0 %528  ;;  %v632_v33 = vmul.f32 %v4440_v25, %v4406_v16 }
 0x13f   : > { %6301 = vst [vmem:[#allocation69_spill] sm:$0xff] %v4442_v45  ;;  %v635_v34 = vmul.f32 %v4442_v45, %v4369_v6 }
 0x140   : > { %919 = vperm.xlu0 %3746, %v632_v33   ;;  %922 = vperm.xlu1 %3747, %v633_v62  }
 0x141   : > { %v4448_v21 = vpop.permute.xlu1 %524 }
 0x142   : > { %6302 = vst [vmem:[#allocation70_spill] sm:$0xff] %v4448_v21  ;;  %v4450_v19 = vpop.permute.xlu0 %536  ;;  %v634_v28 = vmul.f32 %v4448_v21, %v4355_v51 }
 0x143   : > { %6303 = vst [vmem:[#allocation71_spill] sm:$0xff] %v4450_v19  ;;  %v637_v62 = vmul.f32 %v4450_v19, %v4381_v31 }
 0x144   : > { %925 = vperm.xlu0 %3746, %v634_v28   ;;  %928 = vperm.xlu1 %3747, %v635_v34  }
 0x145   : > { %v4456_v42 = vpop.permute.xlu1 %532 }
 0x146   : > { %6304 = vst [vmem:[#allocation72_spill] sm:$0xff] %v4456_v42  ;;  %v4458_v38 = vpop.permute.xlu0 %544  ;;  %v636_v33 = vmul.f32 %v4456_v42, %v4378_v0 }
 0x147   : > { %6305 = vst [vmem:[#allocation73_spill] sm:$0xff] %v4458_v38  ;;  %v639_v34 = vmul.f32 %v4458_v38, %v4395_v17 }
 0x148   : > { %931 = vperm.xlu0 %3746, %v636_v33   ;;  %934 = vperm.xlu1 %3747, %v637_v62  }
 0x149   : > { %v4464_v36 = vpop.permute.xlu1 %540 }
 0x14a   : > { %6306 = vst [vmem:[#allocation74_spill] sm:$0xff] %v4464_v36  ;;  %v4466_v32 = vpop.permute.xlu0 %555  ;;  %v638_v28 = vmul.f32 %v4464_v36, %v4392_v46 }
 0x14b   : > { %6307 = vst [vmem:[#allocation75_spill] sm:$0xff] %v4466_v32  ;;  %v641_v62 = vmul.f32 %v4466_v32, %v4358_v53 }
 0x14c   : > { %937 = vperm.xlu0 %3746, %v638_v28   ;;  %940 = vperm.xlu1 %3747, %v639_v34  }
 0x14d   : > { %v4472_v30 = vpop.permute.xlu1 %548 }
 0x14e   : > { %6308 = vst [vmem:[#allocation76_spill] sm:$0xff] %v4472_v30  ;;  %v4474_v26 = vpop.permute.xlu0 %563  ;;  %v640_v33 = vmul.f32 %v4472_v30, %v4406_v16 }
 0x14f   : > { %6309 = vst [vmem:[#allocation77_spill] sm:$0xff] %v4474_v26  ;;  %v643_v34 = vmul.f32 %v4474_v26, %v4369_v6 }
 0x150   : > { %943 = vperm.xlu0 %3746, %v640_v33   ;;  %946 = vperm.xlu1 %3747, %v641_v62  }
 0x151   : > { %v4480_v24 = vpop.permute.xlu1 %559 }
 0x152   : > { %6310 = vst [vmem:[#allocation78_spill] sm:$0xff] %v4480_v24  ;;  %v4482_v20 = vpop.permute.xlu0 %571  ;;  %v642_v28 = vmul.f32 %v4480_v24, %v4355_v51 }
 0x153   : > { %6311 = vst [vmem:[#allocation79_spill] sm:$0xff] %v4482_v20  ;;  %v645_v53 = vmul.f32 %v4482_v20, %v4381_v31  ;;  %v321_v31 = vmul.f32 0.00390625, %v4240_v35 }
 0x154   : > { %949 = vperm.xlu0 %3746, %v642_v28   ;;  %952 = vperm.xlu1 %3747, %v643_v34   ;;  %v323_v34 = vmul.f32 0.00390625, %v4244_v49 }
 0x155   : > { %v4488_v18 = vpop.permute.xlu1 %567  ;;  %v658_v35 = vmul.f32 %v4416_v44, %v321_v31 }
 0x156   : > { %6312 = vst [vmem:[#allocation80_spill] sm:$0xff] %v4488_v18  ;;  %v644_v14 = vmul.f32 %v4488_v18, %v4378_v0  ;;  %v4494_v33 = vpop.permute.xlu0 %579 }
 0x157   : > { %6313 = vst [vmem:[#allocation81_spill] sm:$0xff] %v4494_v33  ;;  %v647_v6 = vmul.f32 %v4494_v33, %v4395_v17 }
 0x158   : > { %955 = vperm.xlu0 %3746, %v644_v14   ;;  %958 = vperm.xlu1 %3747, %v645_v53   ;;  %v650_v14 = vmul.f32 %v4360_v39, %v321_v31  ;;  %v325_v53 = vmul.f32 0.00390625, %v4248_v56 }
 0x159   : > { %v4496_v62 = vpop.permute.xlu1 %575 }
 0x15a   : > { %6314 = vst [vmem:[#allocation82_spill] sm:$0xff] %v4496_v62  ;;  %v646_v51 = vmul.f32 %v4496_v62, %v4392_v46  ;;  %v652_v46 = vmul.f32 %v4383_v48, %v323_v34  ;;  %v654_v17 = vmul.f32 %v4397_v22, %v325_v53  ;;  %v662_v49 = vmul.f32 %v4432_v27, %v325_v53 }
 0x15c   : > { %961 = vperm.xlu0 %3746, %v646_v51   ;;  %964 = vperm.xlu1 %3747, %v647_v6   ;;  %v327_v51 = vmul.f32 0.00390625, %v4252_v60  ;;  %v660_v6 = vmul.f32 %v4424_v23, %v323_v34  ;;  %v668_v60 = vmul.f32 %v4456_v42, %v323_v34 }
 0x15d   : > { %v4502_v28 = vpop.permute.xlu1 %583 }
 0x15e   : > { %6315 = vst [vmem:[#allocation83_spill] sm:$0xff] %v4502_v28  ;;  %v648_v0 = vmul.f32 %v4502_v28, %v4406_v16  ;;  %v656_v16 = vmul.f32 %v4408_v11, %v327_v51  ;;  %v664_v56 = vmul.f32 %v4440_v25, %v327_v51 }
 0x160   : > { %967 = vperm.xlu0 %3746, %v648_v0   ;;  %v666_v0 = vmul.f32 %v4448_v21, %v321_v31 }
 0x164   : > { %973 = vperm.xlu0 %3746, %v650_v14   ;;  %v670_v14 = vmul.f32 %v4464_v36, %v325_v53 }
 0x168   : > { %979 = vperm.xlu0 %3746, %v652_v46   ;;  %v672_v46 = vmul.f32 %v4472_v30, %v327_v51 }
 0x16c   : > { %985 = vperm.xlu0 %3746, %v654_v17   ;;  %v674_v17 = vmul.f32 %v4480_v24, %v321_v31 }
 0x170   : > { %991 = vperm.xlu0 %3746, %v656_v16   ;;  %v676_v16 = vmul.f32 %v4488_v18, %v323_v34 }
 0x174   : > { %997 = vperm.xlu0 %3746, %v658_v35   ;;  %v678_v35 = vmul.f32 %v4496_v62, %v325_v53  ;;  %v4542_v53 = vmul.f32 0.00390625, %v4261_v63  ;;  %v4558_v63 = vmul.f32 0.00390625, %v4269_v2 }
 0x176   : > { %v692_v8 = vmul.f32 %v4424_v23, %v4542_v53  ;;  %v696_v33 = vmul.f32 %v4440_v25, %v4558_v63 }
 0x178   : > { %1003 = vperm.xlu0 %3746, %v660_v6  }
 0x17c   : > { %1009 = vperm.xlu0 %3746, %v662_v49   ;;  %v680_v49 = vmul.f32 %v4502_v28, %v327_v51  ;;  %v684_v51 = vmul.f32 %v4383_v48, %v4542_v53 }
 0x180   : > { %1015 = vperm.xlu0 %3746, %v664_v56  }
 0x184   : > { %1021 = vperm.xlu0 %3746, %v666_v0  }
 0x188   : > { %1027 = vperm.xlu0 %3746, %v668_v60   ;;  %v4533_v60 = vmul.f32 0.00390625, %v4257_v40  ;;  %v4551_v40 = vmul.f32 0.00390625, %v4265_v54 }
 0x18a   : > { %v682_v31 = vmul.f32 %v4360_v39, %v4533_v60  ;;  %v690_v54 = vmul.f32 %v4416_v44, %v4533_v60  ;;  %v698_v26 = vmul.f32 %v4448_v21, %v4533_v60 }
 0x18c   : > { %1033 = vperm.xlu0 %3746, %v670_v14  }
 0x190   : > { %1039 = vperm.xlu0 %3746, %v672_v46  }
 0x194   : > { %1045 = vperm.xlu0 %3746, %v674_v17  }
 0x198   : > { %1051 = vperm.xlu0 %3746, %v676_v16   ;;  %v686_v16 = vmul.f32 %v4397_v22, %v4551_v40 }
 0x19b   : > { %v4525_v6 = vpop.permute.xlu1 %877 }
 0x19c   : > { %1057 = vperm.xlu0 %3746, %v678_v35   ;;  %v4528_v56 = vpop.permute.xlu0 %874 }
 0x19d   : > { %v1262_v58 = vrot.slane %v4528_v56, %v6317_v52 }
 0x19f   : > { %v4530_v0 = vpop.permute.xlu1 %880 }
 0x1a0   : > { %1063 = vperm.xlu0 %3746, %v680_v49  }
 0x1a3   : > { %v4537_v34 = vpop.permute.xlu1 %886  ;;  %v4539_v14 = vpop.permute.xlu0 %883 }
 0x1a4   : > { %1069 = vperm.xlu0 %3746, %v682_v31   ;;  %v688_v31 = vmul.f32 %v4408_v11, %v4558_v63 }
 0x1a7   : > { %v4546_v46 = vpop.permute.xlu1 %892  ;;  %v4548_v17 = vpop.permute.xlu0 %889 }
 0x1a8   : > { %1075 = vperm.xlu0 %3746, %v684_v51  }
 0x1ab   : > { %v899_v35 = vpop.permute.xlu1 %898  ;;  %v4555_v49 = vpop.permute.xlu0 %895 }
 0x1ac   : > { %1081 = vperm.xlu0 %3746, %v686_v16   ;;  %v694_v16 = vmul.f32 %v4432_v27, %v4551_v40  ;;  %v1315_v3 = vrot.slane %v899_v35, %v6317_v52  ;;  %v704_v35 = vmul.f32 %v4472_v30, %v4558_v63  ;;  %v6320_v30 = vld [vmem:[#allocation7_spill] sm:$0xff] }
 0x1af   : > { %v905_v12 = vpop.permute.xlu1 %904  ;;  %v902_v5 = vpop.permute.xlu0 %901 }
 0x1b0   : > { %1087 = vperm.xlu0 %3746, %v688_v31  }
 0x1b3   : > { %v4564_v51 = vpop.permute.xlu1 %910  ;;  %v908_v4 = vpop.permute.xlu0 %907 }
 0x1b4   : > { %1093 = vperm.xlu0 %3746, %v690_v54   ;;  %v1334_v56 = vrot.slane %v4564_v51, %v6320_v30 }
 0x1b7   : > { %v4568_v41 = vpop.permute.xlu1 %916  ;;  %v4570_v2 = vpop.permute.xlu0 %913 }
 0x1b8   : > { %1099 = vperm.xlu0 %3746, %v692_v8   ;;  %v700_v8 = vmul.f32 %v4456_v42, %v4542_v53  ;;  %v6318_v42 = vld [vmem:[#allocation5_spill] sm:$0xff] }
 0x1b9   : > { %v1324_v7 = vrot.slane %v905_v12, %v6318_v42  ;;  %v706_v12 = vmul.f32 %v4480_v24, %v4533_v60 }
 0x1bb   : > { %v923_v55 = vpop.permute.xlu1 %922  ;;  %v4574_v31 = vpop.permute.xlu0 %919 }
 0x1bc   : > { %1105 = vperm.xlu0 %3746, %v694_v16   ;;  %v6316_v16 = vld [vmem:[#allocation4_spill] sm:$0xff] }
 0x1bd   : > { %v1319_v47 = vrot.slane %v902_v5, %v6316_v16 }
 0x1bf   : > { %v929_v20 = vpop.permute.xlu1 %928  ;;  %v926_v54 = vpop.permute.xlu0 %925  ;;  %v1320_v5 = vsel %vm1268_vm0, %v1319_v47, %v1315_v3  ;;  %v1274_v47 = vrot.slane %v4530_v0, %v6318_v42 }
 0x1c0   : > { %1111 = vperm.xlu0 %3746, %v696_v33   ;;  %v702_v33 = vmul.f32 %v4464_v36, %v4551_v40  ;;  %v1358_v29 = vrot.slane %v926_v54, %v6316_v16  ;;  %v1354_v36 = vrot.slane %v923_v55, %v6317_v52  ;;  %v1267_v54 = vrot.slane %v4525_v6, %v6316_v16 }
 0x1c1   : > { %v1363_v27 = vrot.slane %v929_v20, %v6318_v42  ;;  %v1325_v20 = vsel %vm1275_vm1, %v1324_v7, %v1320_v5 }
 0x1c2   : > { %v1269_v61 = vsel %vm1268_vm0, %v1267_v54, %v1262_v58 }
 0x1c3   : > { %v4580_v32 = vpop.permute.xlu1 %934  ;;  %v932_v38 = vpop.permute.xlu0 %931  ;;  %v1276_v5 = vsel %vm1275_vm1, %v1274_v47, %v1269_v61  ;;  %v6322_v61 = vld [vmem:[#allocation9_spill] sm:$0xff] }
 0x1c4   : > { %1117 = vperm.xlu0 %3746, %v698_v26   ;;  %v1373_v7 = vrot.slane %v4580_v32, %v6320_v30 }
 0x1c7   : > { %v4584_v19 = vpop.permute.xlu1 %940  ;;  %v4586_v45 = vpop.permute.xlu0 %937 }
 0x1c8   : > { %1123 = vperm.xlu0 %3746, %v700_v8   ;;  %v6319_v8 = vld [vmem:[#allocation6_spill] sm:$0xff] }
 0x1c9   : > { %v1329_v25 = vrot.slane %v908_v4, %v6319_v8  ;;  %v1281_v55 = vrot.slane %v4539_v14, %v6319_v8  ;;  %v1359_v4 = vsel %vm1268_vm0, %v1358_v29, %v1354_v36  ;;  %v1368_v3 = vrot.slane %v932_v38, %v6319_v8  ;;  %v6321_v14 = vld [vmem:[#allocation8_spill] sm:$0xff] }
 0x1ca   : > { %v1339_v36 = vrot.slane %v4570_v2, %v6321_v14  ;;  %v708_v29 = vmul.f32 %v4488_v18, %v4542_v53  ;;  %v1364_v51 = vsel %vm1275_vm1, %v1363_v27, %v1359_v4  ;;  %v1295_v32 = vrot.slane %v4548_v17, %v6321_v14  ;;  %v6323_v4 = vld [vmem:[#allocation10_spill] sm:$0xff] }
 0x1cb   : > { %v947_v26 = vpop.permute.xlu1 %946  ;;  %v4593_v21 = vpop.permute.xlu0 %943  ;;  %v1330_v0 = vsel %vm1282_vm2, %v1329_v25, %v1325_v20  ;;  %v1288_v25 = vrot.slane %v4537_v34, %v6320_v30  ;;  %v1369_v2 = vsel %vm1282_vm2, %v1368_v3, %v1364_v51  ;;  %v1283_v58 = vsel %vm1282_vm2, %v1281_v55, %v1276_v5 }
 0x1cc   : > { %1129 = vperm.xlu0 %3746, %v702_v33   ;;  %v1393_v60 = vrot.slane %v947_v26, %v6317_v52  ;;  %v1335_v27 = vsel %vm1289_vm3, %v1334_v56, %v1330_v0  ;;  %v1344_v34 = vrot.slane %v4568_v41, %v6322_v61  ;;  %v1349_v55 = vrot.slane %v4574_v31, %v6323_v4 }
 0x1cd   : > { %v1340_v54 = vsel %vm1296_vm4, %v1339_v36, %v1335_v27  ;;  %v1383_v17 = vrot.slane %v4584_v19, %v6322_v61  ;;  %v1374_v3 = vsel %vm1289_vm3, %v1373_v7, %v1369_v2  ;;  %v1290_v41 = vsel %vm1289_vm3, %v1288_v25, %v1283_v58 }
 0x1ce   : > { %v1388_v20 = vrot.slane %v4593_v21, %v6323_v4  ;;  %v1297_v31 = vsel %vm1296_vm4, %v1295_v32, %v1290_v41  ;;  %v1309_v19 = vrot.slane %v4555_v49, %v6323_v4  ;;  %v710_v5 = vmul.f32 %v4496_v62, %v4551_v40 }
 0x1cf   : > { %v953_v33 = vpop.permute.xlu1 %952  ;;  %v950_v6 = vpop.permute.xlu0 %949  ;;  %v712_v40 = vmul.f32 %v4502_v28, %v4558_v63  ;;  %v341_v63 = vmul.f32 0.00390625, %v4282_v13  ;;  %v324_v41 = vmul.f32 0.00390625, %v4250_v59 }
 0x1d0   : > { %v1397_v24 = vrot.slane %v950_v6, %v6316_v16  ;;  %1135 = vperm.xlu0 %3746, %v704_v35   ;;  %v1402_v38 = vrot.slane %v953_v33, %v6318_v42  ;;  %v1378_v35 = vrot.slane %v4586_v45, %v6321_v14 }
 0x1d2   : > { %v1398_v26 = vsel %vm1268_vm0, %v1397_v24, %v1393_v60  ;;  %v1379_v56 = vsel %vm1296_vm4, %v1378_v35, %v1374_v3 }
 0x1d3   : > { %v959_v53 = vpop.permute.xlu1 %958  ;;  %v956_v33 = vpop.permute.xlu0 %955  ;;  %v1403_v45 = vsel %vm1275_vm1, %v1402_v38, %v1398_v26  ;;  %v1384_v51 = vsel %vm1303_vm5, %v1383_v17, %v1379_v56  ;;  %v343_v17 = vmul.f32 0.00390625, %v4286_v15  ;;  %v6324_v56 = vld [vmem:[#allocation13_spill] sm:$0xff] }
 0x1d4   : > { %v1407_v24 = vrot.slane %v956_v33, %v6319_v8  ;;  %1141 = vperm.xlu0 %3746, %v706_v12   ;;  %v1412_v47 = vrot.slane %v959_v53, %v6320_v30  ;;  %v1302_v12 = vrot.slane %v4546_v46, %v6322_v61  ;;  %v1345_v46 = vsel %vm1303_vm5, %v1344_v34, %v1340_v54 }
 0x1d5   : > { %v1350_v21 = vsel %vm1310_vm6, %v1349_v55, %v1345_v46  ;;  %v718_v55 = vmul.f32 %v4397_v22, %v341_v63  ;;  %v720_v3 = vmul.f32 %v4408_v11, %v343_v17  ;;  %v6328_v46 = vld [vmem:[#allocation59_spill] sm:$0xff] }
 0x1d6   : > { %v1408_v6 = vsel %vm1282_vm2, %v1407_v24, %v1403_v45  ;;  %v1304_v49 = vsel %vm1303_vm5, %v1302_v12, %v1297_v31  ;;  %v337_v24 = vmul.f32 0.00390625, %v4274_v1  ;;  %v320_v1 = vmul.f32 0.00390625, %v4242_v43 }
 0x1d7   : > { %v965_v60 = vpop.permute.xlu1 %964  ;;  %v962_v0 = vpop.permute.xlu0 %961  ;;  %v1413_v7 = vsel %vm1289_vm3, %v1412_v47, %v1408_v6  ;;  %v1311_v2 = vsel %vm1310_vm6, %v1309_v19, %v1304_v49  ;;  %v339_v47 = vmul.f32 0.00390625, %v4278_v9  ;;  %v322_v9 = vmul.f32 0.00390625, %v4246_v50  ;;  %v6326_v50 = vld [vmem:[#allocation57_spill] sm:$0xff]  ;;  %v6327_v19 = vld [vmem:[#allocation68_spill] sm:$0xff]  ;;  %v6332_v49 = vld [vmem:[#allocation63_spill] sm:$0xff] }
 0x1d8   : > { %v1417_v36 = vrot.slane %v962_v0, %v6321_v14  ;;  %1147 = vperm.xlu0 %3746, %v708_v29   ;;  %v1422_v38 = vrot.slane %v965_v60, %v6322_v61  ;;  %v1389_v29 = vsel %vm1310_vm6, %v1388_v20, %v1384_v51  ;;  %v1898_v33 = vsel %vm1897_vm7, %v1350_v21, %v1311_v2  ;;  %v6325_v60 = vld [vmem:[#allocation66_spill] sm:$0xff]  ;;  %v6330_v21 = vld [vmem:[#allocation61_spill] sm:$0xff] }
 0x1d9   : > { %v1900_v32 = vsel %vm1899_vm8, %v1389_v29, %v1898_v33  ;;  %v714_v54 = vmul.f32 %v4360_v39, %v337_v24  ;;  %v716_v45 = vmul.f32 %v4383_v48, %v339_v47  ;;  %v649_v6 = vmul.f32 %v4362_v37, %v320_v1  ;;  %v6335_v33 = vld [vmem:[#allocation76_spill] sm:$0xff] }
 0x1da   : > { %v1418_v26 = vsel %vm1296_vm4, %v1417_v36, %v1413_v7  ;;  %v722_v12 = vmul.f32 %v4416_v44, %v337_v24  ;;  %v651_v13 = vmul.f32 %v4371_v10, %v322_v9  ;;  %v724_v15 = vmul.f32 %v4424_v23, %v339_v47 }
 0x1db   : > { %v968_v25 = vpop.permute.xlu0 %967  ;;  %v1423_v53 = vsel %vm1303_vm5, %v1422_v38, %v1418_v26  ;;  %v653_v43 = vmul.f32 %v4373_v57, %v324_v41  ;;  %v326_v20 = vmul.f32 0.00390625, %v6324_v56  ;;  %v726_v0 = vmul.f32 %v6325_v60, %v341_v63  ;;  %v6329_v38 = vld [vmem:[#allocation70_spill] sm:$0xff]  ;;  %v6331_v26 = vld [vmem:[#allocation72_spill] sm:$0xff]  ;;  %v6340_v56 = vld [vmem:[#allocation73_spill] sm:$0xff] }
 0x1dc   : > { %v1427_v35 = vrot.slane %v968_v25, %v6323_v4  ;;  %1153 = vperm.xlu0 %3746, %v710_v5   ;;  %v728_v36 = vmul.f32 %v6327_v19, %v343_v17  ;;  %v657_v59 = vmul.f32 %v6328_v46, %v320_v1  ;;  %v730_v7 = vmul.f32 %v6329_v38, %v337_v24  ;;  %v6333_v25 = vld [vmem:[#allocation74_spill] sm:$0xff] }
 0x1dd   : > { %v655_v31 = vmul.f32 %v6326_v50, %v326_v20  ;;  %v659_v51 = vmul.f32 %v6330_v21, %v322_v9  ;;  %v732_v5 = vmul.f32 %v6331_v26, %v339_v47  ;;  %v661_v29 = vmul.f32 %v6332_v49, %v324_v41  ;;  %v6352_v26 = vld [vmem:[#allocation19_spill] sm:$0xff] }
 0x1de   : > { %v1428_v58 = vsel %vm1310_vm6, %v1427_v35, %v1423_v53  ;;  %v734_v2 = vmul.f32 %v6333_v25, %v341_v63  ;;  %v6334_v35 = vld [vmem:[#allocation65_spill] sm:$0xff] }
 0x1df   : > { %v1902_v27 = vsel %vm1901_vm9, %v1428_v58, %v1900_v32  ;;  %v663_v53 = vmul.f32 %v6334_v35, %v326_v20  ;;  %v4710_v58 = vpop.permute.xlu0 %973  ;;  %v6336_v32 = vld [vmem:[#allocation67_spill] sm:$0xff] }
 0x1e0   : > { %1159 = vperm.xlu0 %3746, %v712_v40   ;;  %v1917_v34 = vsel %vm1916_vm10, %v1902_v27, 0.0  ;;  %v736_v40 = vmul.f32 %v6335_v33, %v343_v17  ;;  %v665_v27 = vmul.f32 %v6336_v32, %v320_v1 }
 0x1e1   : > { %1918 = vadd.xlane.f32.xlu1 %v1917_v34  ;;  %v6337_v34 = vld [vmem:[#allocation78_spill] sm:$0xff] }
 0x1e4   : > { %1165 = vperm.xlu0 %3746, %v714_v54   ;;  %v738_v54 = vmul.f32 %v6337_v34, %v337_v24  ;;  %v744_v24 = vmul.f32 %v4502_v28, %v343_v17 }
 0x1e8   : > { %1171 = vperm.xlu0 %3746, %v716_v45   ;;  %v6338_v45 = vld [vmem:[#allocation69_spill] sm:$0xff] }
 0x1ec   : > { %1177 = vperm.xlu0 %3746, %v718_v55   ;;  %v667_v55 = vmul.f32 %v6338_v45, %v322_v9 }
 0x1f0   : > { %1183 = vperm.xlu0 %3746, %v720_v3   ;;  %v4715_v3 = vpop.permute.xlu0 %979 }
 0x1f2   : > { %970 = vperm.xlu1 %3747, %v649_v6   ;;  %v740_v6 = vmul.f32 %v4488_v18, %v339_v47  ;;  %v6342_v47 = vld [vmem:[#allocation77_spill] sm:$0xff]  ;;  %v6349_v18 = vld [vmem:[#allocation16_spill] sm:$0xff] }
 0x1f3   : > { %v336_v34 = vmul.f32 0.00390625, %v6349_v18 }
 0x1f4   : > { %1189 = vperm.xlu0 %3746, %v722_v12   ;;  %v6339_v12 = vld [vmem:[#allocation71_spill] sm:$0xff] }
 0x1f5   : > { %v729_v39 = vmul.f32 %v6336_v32, %v336_v34 }
 0x1f6   : > { %976 = vperm.xlu1 %3747, %v651_v13   ;;  %v669_v13 = vmul.f32 %v6339_v12, %v324_v41 }
 0x1f8   : > { %1195 = vperm.xlu0 %3746, %v724_v15   ;;  %v742_v15 = vmul.f32 %v4496_v62, %v341_v63  ;;  %v6343_v63 = vld [vmem:[#allocation79_spill] sm:$0xff] }
 0x1fa   : > { %982 = vperm.xlu1 %3747, %v653_v43   ;;  %v4720_v43 = vpop.permute.xlu0 %985 }
 0x1fc   : > { %1201 = vperm.xlu0 %3746, %v726_v0   ;;  %v671_v0 = vmul.f32 %v6340_v56, %v326_v20 }
 0x1fe   : > { %988 = vperm.xlu1 %3747, %v655_v31   ;;  %v6341_v31 = vld [vmem:[#allocation75_spill] sm:$0xff] }
 0x200   : > { %1207 = vperm.xlu0 %3746, %v728_v36   ;;  %v673_v36 = vmul.f32 %v6341_v31, %v320_v1 }
 0x202   : > { %994 = vperm.xlu1 %3747, %v657_v59   ;;  %v4725_v59 = vpop.permute.xlu0 %991 }
 0x204   : > { %1213 = vperm.xlu0 %3746, %v730_v7   ;;  %v675_v7 = vmul.f32 %v6342_v47, %v322_v9 }
 0x206   : > { %1000 = vperm.xlu1 %3747, %v659_v51   ;;  %v4728_v51 = vpop.permute.xlu0 %997 }
 0x208   : > { %1219 = vperm.xlu0 %3746, %v732_v5   ;;  %v677_v5 = vmul.f32 %v6343_v63, %v324_v41 }
 0x20a   : > { %1006 = vperm.xlu1 %3747, %v661_v29   ;;  %v6344_v29 = vld [vmem:[#allocation81_spill] sm:$0xff] }
 0x20c   : > { %1225 = vperm.xlu0 %3746, %v734_v2   ;;  %v679_v2 = vmul.f32 %v6344_v29, %v326_v20 }
 0x20e   : > { %1012 = vperm.xlu1 %3747, %v663_v53   ;;  %v4732_v53 = vpop.permute.xlu0 %1003 }
 0x210   : > { %1231 = vperm.xlu0 %3746, %v736_v40   ;;  %v6345_v40 = vld [vmem:[#allocation12_spill] sm:$0xff] }
 0x211   : > { %v328_v17 = vmul.f32 0.00390625, %v6345_v40 }
 0x212   : > { %1018 = vperm.xlu1 %3747, %v665_v27   ;;  %v6346_v27 = vld [vmem:[#allocation15_spill] sm:$0xff] }
 0x213   : > { %v681_v1 = vmul.f32 %v4362_v37, %v328_v17 }
 0x214   : > { %1237 = vperm.xlu0 %3746, %v738_v54   ;;  %v330_v54 = vmul.f32 0.00390625, %v6346_v27 }
 0x216   : > { %1024 = vperm.xlu1 %3747, %v667_v55   ;;  %v4737_v55 = vpop.permute.xlu0 %1009  ;;  %v683_v9 = vmul.f32 %v4371_v10, %v330_v54 }
 0x218   : > { %1243 = vperm.xlu0 %3746, %v740_v6   ;;  %v6347_v6 = vld [vmem:[#allocation14_spill] sm:$0xff] }
 0x21a   : > { %1030 = vperm.xlu1 %3747, %v669_v13   ;;  %v332_v13 = vmul.f32 0.00390625, %v6347_v6  ;;  %v4742_v20 = vpop.permute.xlu0 %1015 }
 0x21c   : > { %1249 = vperm.xlu0 %3746, %v742_v15   ;;  %v685_v41 = vmul.f32 %v4373_v57, %v332_v13  ;;  %v6348_v15 = vld [vmem:[#allocation17_spill] sm:$0xff]  ;;  %v693_v40 = vmul.f32 %v6332_v49, %v332_v13 }
 0x21e   : > { %1036 = vperm.xlu1 %3747, %v671_v0   ;;  %v334_v0 = vmul.f32 0.00390625, %v6348_v15 }
 0x220   : > { %1255 = vperm.xlu0 %3746, %v744_v24   ;;  %v687_v24 = vmul.f32 %v6326_v50, %v334_v0  ;;  %v695_v27 = vmul.f32 %v6334_v35, %v334_v0 }
 0x222   : > { %1042 = vperm.xlu1 %3747, %v673_v36   ;;  %v4746_v36 = vpop.permute.xlu0 %1021 }
 0x226   : > { %1048 = vperm.xlu1 %3747, %v675_v7   ;;  %v689_v7 = vmul.f32 %v6328_v46, %v328_v17 }
 0x22a   : > { %1054 = vperm.xlu1 %3747, %v677_v5   ;;  %v691_v5 = vmul.f32 %v6330_v21, %v330_v54 }
 0x22e   : > { %1060 = vperm.xlu1 %3747, %v679_v2   ;;  %v4750_v2 = vpop.permute.xlu0 %1027 }
 0x232   : > { %1066 = vperm.xlu1 %3747, %v681_v1   ;;  %v4753_v1 = vpop.permute.xlu0 %1033 }
 0x236   : > { %1072 = vperm.xlu1 %3747, %v683_v9   ;;  %v697_v9 = vmul.f32 %v6336_v32, %v328_v17  ;;  %v4757_v6 = vpop.permute.xlu0 %1039 }
 0x23a   : > { %1078 = vperm.xlu1 %3747, %v685_v41   ;;  %v699_v41 = vmul.f32 %v6338_v45, %v330_v54  ;;  %v4760_v15 = vpop.permute.xlu0 %1045 }
 0x23e   : > { %1084 = vperm.xlu1 %3747, %v687_v24   ;;  %v701_v24 = vmul.f32 %v6339_v12, %v332_v13 }
 0x242   : > { %1090 = vperm.xlu1 %3747, %v689_v7   ;;  %v703_v7 = vmul.f32 %v6340_v56, %v334_v0 }
 0x246   : > { %1096 = vperm.xlu1 %3747, %v691_v5   ;;  %v4764_v5 = vpop.permute.xlu0 %1051 }
 0x24a   : > { %1102 = vperm.xlu1 %3747, %v693_v40   ;;  %v705_v40 = vmul.f32 %v6341_v31, %v328_v17 }
 0x24e   : > { %1108 = vperm.xlu1 %3747, %v695_v27   ;;  %v4767_v27 = vpop.permute.xlu0 %1057 }
 0x252   : > { %1114 = vperm.xlu1 %3747, %v697_v9   ;;  %v707_v9 = vmul.f32 %v6342_v47, %v330_v54  ;;  %v4771_v28 = vpop.permute.xlu0 %1063  ;;  %v6350_v54 = vld [vmem:[#allocation2_spill] sm:$0xff] }
 0x256   : > { %1120 = vperm.xlu1 %3747, %v699_v41   ;;  %v709_v41 = vmul.f32 %v6343_v63, %v332_v13  ;;  %v4779_v17 = vpop.permute.xlu0 %1069 }
 0x25a   : > { %1126 = vperm.xlu1 %3747, %v701_v24   ;;  %v711_v24 = vmul.f32 %v6344_v29, %v334_v0  ;;  %v4789_v33 = vpop.permute.xlu0 %1075  ;;  %v6351_v0 = vld [vmem:[#allocation18_spill] sm:$0xff] }
 0x25b   : > { %v4792_v18 = vmul.f32 0.00390625, %v6351_v0 }
 0x25d   : > { %v717_v25 = vmul.f32 %v4373_v57, %v4792_v18  ;;  %v725_v11 = vmul.f32 %v6332_v49, %v4792_v18  ;;  %v733_v49 = vmul.f32 %v6339_v12, %v4792_v18  ;;  %v1475_v57 = vrot.slane %v4728_v51, %v6316_v16 }
 0x25e   : > { %1132 = vperm.xlu1 %3747, %v703_v7   ;;  %v4803_v38 = vpop.permute.xlu0 %1081 }
 0x262   : > { %1138 = vperm.xlu1 %3747, %v705_v40   ;;  %v713_v40 = vmul.f32 %v4362_v37, %v336_v34  ;;  %v4808_v60 = vpop.permute.xlu0 %1087 }
 0x266   : > { %1144 = vperm.xlu1 %3747, %v707_v9   ;;  %v4783_v9 = vmul.f32 0.00390625, %v6350_v54  ;;  %v4799_v54 = vmul.f32 0.00390625, %v6352_v26  ;;  %v4812_v44 = vpop.permute.xlu0 %1093 }
 0x268   : > { %v719_v19 = vmul.f32 %v6326_v50, %v4799_v54  ;;  %v723_v26 = vmul.f32 %v6330_v21, %v4783_v9  ;;  %v735_v12 = vmul.f32 %v6340_v56, %v4799_v54 }
 0x26a   : > { %1150 = vperm.xlu1 %3747, %v709_v41   ;;  %v4773_v62 = vpop.xlane.xlu1 %1918  ;;  %v715_v41 = vmul.f32 %v4371_v10, %v4783_v9  ;;  %v4820_v48 = vpop.permute.xlu0 %1099 }
 0x26e   : > { %1156 = vperm.xlu1 %3747, %v711_v24   ;;  %v4777_v7 = vpop.permute.xlu1 %970  ;;  %v4823_v21 = vpop.permute.xlu0 %1105 }
 0x272   : > { %1162 = vperm.xlu1 %3747, %v713_v40   ;;  %v4785_v13 = vpop.permute.xlu1 %976  ;;  %v4829_v50 = vpop.permute.xlu0 %1111 }
 0x276   : > { %1168 = vperm.xlu1 %3747, %v715_v41   ;;  %v4794_v24 = vpop.permute.xlu1 %982  ;;  %v721_v41 = vmul.f32 %v6328_v46, %v336_v34  ;;  %v731_v46 = vmul.f32 %v6338_v45, %v4783_v9  ;;  %v4851_v10 = vpop.permute.xlu0 %1117 }
 0x27a   : > { %1174 = vperm.xlu1 %3747, %v717_v25   ;;  %v4801_v40 = vpop.permute.xlu1 %988 }
 0x27e   : > { %1180 = vperm.xlu1 %3747, %v719_v19   ;;  %v995_v0 = vpop.permute.xlu1 %994  ;;  %v727_v19 = vmul.f32 %v6334_v35, %v4799_v54 }
 0x27f   : > { %v1471_v35 = vrot.slane %v995_v0, %v6317_v52  ;;  %v1514_v0 = vrot.slane %v4746_v36, %v6316_v16 }
 0x282   : > { %1186 = vperm.xlu1 %3747, %v721_v41   ;;  %v1001_v23 = vpop.permute.xlu1 %1000 }
 0x283   : > { %v1480_v32 = vrot.slane %v1001_v23, %v6318_v42  ;;  %v1436_v23 = vrot.slane %v4710_v58, %v6316_v16 }
 0x286   : > { %1192 = vperm.xlu1 %3747, %v723_v26   ;;  %v1007_v25 = vpop.permute.xlu1 %1006 }
 0x287   : > { %v1490_v36 = vrot.slane %v1007_v25, %v6320_v30  ;;  %v1446_v25 = vrot.slane %v4715_v3, %v6319_v8 }
 0x28a   : > { %1198 = vperm.xlu1 %3747, %v725_v11   ;;  %v4816_v22 = vpop.permute.xlu1 %1012 }
 0x28e   : > { %1204 = vperm.xlu1 %3747, %v727_v19   ;;  %v1019_v41 = vpop.permute.xlu1 %1018 }
 0x292   : > { %1210 = vperm.xlu1 %3747, %v729_v39   ;;  %v1025_v26 = vpop.permute.xlu1 %1024  ;;  %v1510_v39 = vrot.slane %v1019_v41, %v6317_v52  ;;  %v1476_v41 = vsel %vm1268_vm0, %v1475_v57, %v1471_v35 }
 0x293   : > { %v1519_v45 = vrot.slane %v1025_v26, %v6318_v42  ;;  %v1485_v26 = vrot.slane %v4732_v53, %v6319_v8  ;;  %v1481_v56 = vsel %vm1275_vm1, %v1480_v32, %v1476_v41  ;;  %v1451_v32 = vrot.slane %v4794_v24, %v6320_v30 }
 0x294   : > { %v739_v53 = vmul.f32 %v6342_v47, %v4783_v9  ;;  %v1500_v24 = vrot.slane %v4816_v22, %v6322_v61  ;;  %v1461_v22 = vrot.slane %v4801_v40, %v6322_v61  ;;  %v741_v40 = vmul.f32 %v6343_v63, %v4792_v18 }
 0x295   : > { %v1573_v18 = vrot.slane %v4767_v27, %v6321_v14  ;;  %v743_v27 = vmul.f32 %v6344_v29, %v4799_v54 }
 0x296   : > { %1216 = vperm.xlu1 %3747, %v731_v46   ;;  %v1031_v11 = vpop.permute.xlu1 %1030  ;;  %v1432_v46 = vrot.slane %v4777_v7, %v6317_v52  ;;  %v737_v7 = vmul.f32 %v6341_v31, %v336_v34  ;;  %v1524_v34 = vrot.slane %v4750_v2, %v6319_v8 }
 0x297   : > { %v1529_v57 = vrot.slane %v1031_v11, %v6320_v30  ;;  %v1553_v11 = vrot.slane %v4760_v15, %v6316_v16 }
 0x298   : > { %v1437_v37 = vsel %vm1268_vm0, %v1436_v23, %v1432_v46 }
 0x29a   : > { %1222 = vperm.xlu1 %3747, %v733_v49   ;;  %v1037_v19 = vpop.permute.xlu1 %1036  ;;  %v1441_v49 = vrot.slane %v4785_v13, %v6318_v42  ;;  %v1515_v13 = vsel %vm1268_vm0, %v1514_v0, %v1510_v39  ;;  %v1486_v39 = vsel %vm1282_vm2, %v1485_v26, %v1481_v56  ;;  %v1534_v56 = vrot.slane %v4753_v1, %v6321_v14 }
 0x29b   : > { %v1520_v58 = vsel %vm1275_vm1, %v1519_v45, %v1515_v13  ;;  %v1495_v45 = vrot.slane %v4737_v55, %v6321_v14  ;;  %v1539_v0 = vrot.slane %v1037_v19, %v6322_v61  ;;  %v1563_v19 = vrot.slane %v4764_v5, %v6319_v8 }
 0x29c   : > { %v1525_v9 = vsel %vm1282_vm2, %v1524_v34, %v1520_v58  ;;  %v1505_v58 = vrot.slane %v4742_v20, %v6323_v4 }
 0x29d   : > { %v1530_v55 = vsel %vm1289_vm3, %v1529_v57, %v1525_v9 }
 0x29e   : > { %1228 = vperm.xlu1 %3747, %v735_v12   ;;  %v1043_v51 = vpop.permute.xlu1 %1042  ;;  %v1442_v12 = vsel %vm1275_vm1, %v1441_v49, %v1437_v37  ;;  %v1491_v37 = vsel %vm1289_vm3, %v1490_v36, %v1486_v39  ;;  %v4885_v49 = vpop.permute.xlu0 %1123  ;;  %v1535_v36 = vsel %vm1296_vm4, %v1534_v56, %v1530_v55 }
 0x29f   : > { %v1549_v35 = vrot.slane %v1043_v51, %v6317_v52  ;;  %v1447_v3 = vsel %vm1282_vm2, %v1446_v25, %v1442_v12  ;;  %v1456_v51 = vrot.slane %v4720_v43, %v6321_v14  ;;  %v1540_v5 = vsel %vm1303_vm5, %v1539_v0, %v1535_v36 }
 0x2a0   : > { %v1452_v23 = vsel %vm1289_vm3, %v1451_v32, %v1447_v3  ;;  %v1466_v32 = vrot.slane %v4725_v59, %v6323_v4 }
 0x2a1   : > { %v1554_v15 = vsel %vm1268_vm0, %v1553_v11, %v1549_v35  ;;  %v1457_v43 = vsel %vm1296_vm4, %v1456_v51, %v1452_v23  ;;  %v1544_v35 = vrot.slane %v4757_v6, %v6323_v4  ;;  %v1583_v11 = vrot.slane %v4771_v28, %v6323_v4  ;;  %v3727_v28 = vld [vmem:[%s6082_s1 + $0x9] ss:$0 sm:$0xff] }
 0x2a2   : > { %1234 = vperm.xlu1 %3747, %v737_v7   ;;  %v1049_v2 = vpop.permute.xlu1 %1048  ;;  %v1496_v7 = vsel %vm1296_vm4, %v1495_v45, %v1491_v37  ;;  %v1462_v34 = vsel %vm1303_vm5, %v1461_v22, %v1457_v43  ;;  %v4915_v25 = vpop.permute.xlu0 %1129 }
 0x2a3   : > { %v1558_v46 = vrot.slane %v1049_v2, %v6318_v42  ;;  %v1501_v1 = vsel %vm1303_vm5, %v1500_v24, %v1496_v7  ;;  %v1545_v6 = vsel %vm1310_vm6, %v1544_v35, %v1540_v5  ;;  %v1467_v39 = vsel %vm1310_vm6, %v1466_v32, %v1462_v34 }
 0x2a4   : > { %v1506_v20 = vsel %vm1310_vm6, %v1505_v58, %v1501_v1  ;;  %v1631_v32 = vrot.slane %v4812_v44, %v6316_v16 }
 0x2a5   : > { %v1559_v41 = vsel %vm1275_vm1, %v1558_v46, %v1554_v15  ;;  %v1903_v37 = vsel %vm1897_vm7, %v1506_v20, %v1467_v39 }
 0x2a6   : > { %1240 = vperm.xlu1 %3747, %v739_v53   ;;  %v1055_v26 = vpop.permute.xlu1 %1054  ;;  %v1564_v57 = vsel %vm1282_vm2, %v1563_v19, %v1559_v41  ;;  %v1904_v46 = vsel %vm1899_vm8, %v1545_v6, %v1903_v37  ;;  %v4934_v0 = vpop.permute.xlu0 %1135  ;;  %v1592_v6 = vrot.slane %v4779_v17, %v6316_v16 }
 0x2a7   : > { %v1568_v13 = vrot.slane %v1055_v26, %v6320_v30 }
 0x2a9   : > { %v1569_v12 = vsel %vm1289_vm3, %v1568_v13, %v1564_v57 }
 0x2aa   : > { %1246 = vperm.xlu1 %3747, %v741_v40   ;;  %v1061_v53 = vpop.permute.xlu1 %1060  ;;  %v1574_v59 = vsel %vm1296_vm4, %v1573_v18, %v1569_v12  ;;  %v1142_v56 = vpop.permute.xlu0 %1141 }
 0x2ab   : > { %v1578_v45 = vrot.slane %v1061_v53, %v6322_v61  ;;  %v1670_v53 = vrot.slane %v4851_v10, %v6316_v16 }
 0x2ad   : > { %v1579_v2 = vsel %vm1303_vm5, %v1578_v45, %v1574_v59  ;;  %v1641_v59 = vrot.slane %v4820_v48, %v6319_v8 }
 0x2ae   : > { %1252 = vperm.xlu1 %3747, %v743_v27   ;;  %v1067_v24 = vpop.permute.xlu1 %1066  ;;  %v1584_v9 = vsel %vm1310_vm6, %v1583_v11, %v1579_v2  ;;  %v4938_v22 = vpop.permute.xlu0 %1147 }
 0x2af   : > { %v1905_v3 = vsel %vm1901_vm9, %v1584_v9, %v1904_v46  ;;  %v1588_v18 = vrot.slane %v1067_v24, %v6317_v52  ;;  %v1680_v9 = vrot.slane %v4885_v49, %v6319_v8 }
 0x2b0   : > { %v1920_v55 = vsel %vm1916_vm10, %v1905_v3, 0.0 }
 0x2b1   : > { %1921 = vadd.xlane.f32.xlu0 %v1920_v55  ;;  %v1593_v37 = vsel %vm1268_vm0, %v1592_v6, %v1588_v18  ;;  %v1651_v55 = vrot.slane %v4823_v21, %v6321_v14 }
 0x2b2   : > { %v1073_v54 = vpop.permute.xlu1 %1072  ;;  %1935 = vbcast.lane.b32.xlu1 %v3727_v28, 256  ;;  %v4940_v19 = vpop.permute.xlu0 %1153  ;;  %v1602_v28 = vrot.slane %v4789_v33, %v6319_v8 }
 0x2b3   : > { %v1597_v45 = vrot.slane %v1073_v54, %v6318_v42  ;;  %v1709_v54 = vrot.slane %v1142_v56, %v6316_v16  ;;  %v1690_v56 = vrot.slane %v4915_v25, %v6321_v14 }
 0x2b5   : > { %v1598_v48 = vsel %vm1275_vm1, %v1597_v45, %v1593_v37 }
 0x2b6   : > { %v1079_v15 = vpop.permute.xlu1 %1078  ;;  %v4942_v26 = vpop.permute.xlu0 %1159 }
 0x2b7   : > { %v1607_v3 = vrot.slane %v1079_v15, %v6320_v30  ;;  %v1603_v15 = vsel %vm1282_vm2, %v1602_v28, %v1598_v48 }
 0x2ba   : > { %v4936_v23 = vpop.permute.xlu1 %1084  ;;  %v4944_v13 = vpop.permute.xlu0 %1165 }
 0x2be   : > { %v1091_v41 = vpop.permute.xlu1 %1090  ;;  %v4946_v58 = vpop.permute.xlu0 %1171 }
 0x2bf   : > { %v1627_v5 = vrot.slane %v1091_v41, %v6317_v52 }
 0x2c1   : > { %v1632_v11 = vsel %vm1268_vm0, %v1631_v32, %v1627_v5  ;;  %v1608_v5 = vsel %vm1289_vm3, %v1607_v3, %v1603_v15  ;;  %v1719_v32 = vrot.slane %v4938_v22, %v6319_v8  ;;  %v1700_v22 = vrot.slane %v4934_v0, %v6323_v4 }
 0x2c2   : > { %v1097_v51 = vpop.permute.xlu1 %1096  ;;  %v4949_v35 = vpop.permute.xlu0 %1177  ;;  %v1739_v0 = vrot.slane %v4942_v26, %v6323_v4 }
 0x2c3   : > { %v1636_v34 = vrot.slane %v1097_v51, %v6318_v42 }
 0x2c5   : > { %v1637_v44 = vsel %vm1275_vm1, %v1636_v34, %v1632_v11 }
 0x2c6   : > { %v1103_v7 = vpop.permute.xlu1 %1102  ;;  %v4974_v46 = vpop.permute.xlu0 %1183  ;;  %v1642_v41 = vsel %vm1282_vm2, %v1641_v59, %v1637_v44  ;;  %v1622_v44 = vrot.slane %v4808_v60, %v6323_v4 }
 0x2c7   : > { %v1646_v27 = vrot.slane %v1103_v7, %v6320_v30 }
 0x2c9   : > { %v1647_v7 = vsel %vm1289_vm3, %v1646_v27, %v1642_v41  ;;  %v1729_v27 = vrot.slane %v4940_v19, %v6321_v14 }
 0x2ca   : > { %v1109_v1 = vpop.permute.xlu1 %1108 }
 0x2cb   : > { %v1656_v49 = vrot.slane %v1109_v1, %v6322_v61  ;;  %v1617_v1 = vrot.slane %v4936_v23, %v6322_v61  ;;  %v1661_v23 = vrot.slane %v4829_v50, %v6323_v4 }
 0x2ce   : > { %v1115_v36 = vpop.permute.xlu1 %1114 }
 0x2cf   : > { %v1666_v12 = vrot.slane %v1115_v36, %v6317_v52 }
 0x2d1   : > { %v1671_v2 = vsel %vm1268_vm0, %v1670_v53, %v1666_v12  ;;  %v1612_v12 = vrot.slane %v4803_v38, %v6321_v14 }
 0x2d2   : > { %v1121_v40 = vpop.permute.xlu1 %1120 }
 0x2d3   : > { %v1675_v20 = vrot.slane %v1121_v40, %v6318_v42  ;;  %v1613_v6 = vsel %vm1296_vm4, %v1612_v12, %v1608_v5 }
 0x2d5   : > { %v1676_v10 = vsel %vm1275_vm1, %v1675_v20, %v1671_v2  ;;  %v1190_v20 = vpop.permute.xlu0 %1189 }
 0x2d6   : > { %v1127_v43 = vpop.permute.xlu1 %1126  ;;  %v1681_v36 = vsel %vm1282_vm2, %v1680_v9, %v1676_v10 }
 0x2d7   : > { %v1685_v24 = vrot.slane %v1127_v43, %v6320_v30 }
 0x2d9   : > { %v1686_v33 = vsel %vm1289_vm3, %v1685_v24, %v1681_v36  ;;  %v1196_v9 = vpop.permute.xlu0 %1195 }
 0x2da   : > { %v1133_v57 = vpop.permute.xlu1 %1132  ;;  %v1691_v25 = vsel %vm1296_vm4, %v1690_v56, %v1686_v33 }
 0x2db   : > { %v1695_v43 = vrot.slane %v1133_v57, %v6322_v61  ;;  %v1652_v57 = vsel %vm1296_vm4, %v1651_v55, %v1647_v7 }
 0x2dc   : > { %v1657_v53 = vsel %vm1303_vm5, %v1656_v49, %v1652_v57 }
 0x2dd   : > { %v1696_v38 = vsel %vm1303_vm5, %v1695_v43, %v1691_v25  ;;  %v1662_v50 = vsel %vm1310_vm6, %v1661_v23, %v1657_v53  ;;  %v1202_v41 = vpop.permute.xlu0 %1201 }
 0x2de   : > { %v1139_v39 = vpop.permute.xlu1 %1138  ;;  %v1701_v10 = vsel %vm1310_vm6, %v1700_v22, %v1696_v38 }
 0x2df   : > { %v1705_v17 = vrot.slane %v1139_v39, %v6317_v52  ;;  %v1618_v39 = vsel %vm1303_vm5, %v1617_v1, %v1613_v6 }
 0x2e0   : > { %v1623_v24 = vsel %vm1310_vm6, %v1622_v44, %v1618_v39  ;;  %v1748_v39 = vrot.slane %v4944_v13, %v6316_v16 }
 0x2e1   : > { %v1710_v21 = vsel %vm1268_vm0, %v1709_v54, %v1705_v17  ;;  %v1906_v48 = vsel %vm1897_vm7, %v1662_v50, %v1623_v24  ;;  %v5032_v7 = vpop.permute.xlu0 %1207 }
 0x2e2   : > { %v1145_v51 = vpop.permute.xlu1 %1144  ;;  %v1907_v28 = vsel %vm1899_vm8, %v1701_v10, %v1906_v48  ;;  %v1807_v48 = vrot.slane %v1202_v41, %v6321_v14 }
 0x2e3   : > { %v1714_v40 = vrot.slane %v1145_v51, %v6318_v42 }
 0x2e5   : > { %v1715_v34 = vsel %vm1275_vm1, %v1714_v40, %v1710_v21  ;;  %v1214_v40 = vpop.permute.xlu0 %1213 }
 0x2e6   : > { %v1151_v18 = vpop.permute.xlu1 %1150  ;;  %v1720_v11 = vsel %vm1282_vm2, %v1719_v32, %v1715_v34  ;;  %v1826_v38 = vrot.slane %v1214_v40, %v6316_v16 }
 0x2e7   : > { %v1724_v45 = vrot.slane %v1151_v18, %v6320_v30 }
 0x2e9   : > { %v1725_v59 = vsel %vm1289_vm3, %v1724_v45, %v1720_v11  ;;  %v1220_v33 = vpop.permute.xlu0 %1219  ;;  %v1787_v45 = vrot.slane %v1190_v20, %v6316_v16 }
 0x2ea   : > { %v1157_v2 = vpop.permute.xlu1 %1156  ;;  %v1730_v17 = vsel %vm1296_vm4, %v1729_v27, %v1725_v59  ;;  %v1797_v27 = vrot.slane %v1196_v9, %v6319_v8  ;;  %v1836_v13 = vrot.slane %v1220_v33, %v6319_v8 }
 0x2eb   : > { %v1734_v37 = vrot.slane %v1157_v2, %v6322_v61 }
 0x2ed   : > { %v1735_v60 = vsel %vm1303_vm5, %v1734_v37, %v1730_v17  ;;  %v1226_v56 = vpop.permute.xlu0 %1225 }
 0x2ee   : > { %v1163_v19 = vpop.permute.xlu1 %1162  ;;  %v1740_v3 = vsel %vm1310_vm6, %v1739_v0, %v1735_v60  ;;  %v1758_v60 = vrot.slane %v4946_v58, %v6319_v8  ;;  %v1846_v33 = vrot.slane %v1226_v56, %v6321_v14 }
 0x2ef   : > { %v1908_v55 = vsel %vm1901_vm9, %v1740_v3, %v1907_v28  ;;  %v1744_v23 = vrot.slane %v1163_v19, %v6317_v52 }
 0x2f0   : > { %v1923_v54 = vsel %vm1916_vm10, %v1908_v55, 0.0 }
 0x2f1   : > { %1924 = vadd.xlane.f32.xlu0 %v1923_v54  ;;  %v5036_v1 = vpop.permute.xlu0 %1231  ;;  %v1749_v37 = vsel %vm1268_vm0, %v1748_v39, %v1744_v23 }
 0x2f2   : > { %v1169_v26 = vpop.permute.xlu1 %1168  ;;  %v1856_v23 = vrot.slane %v5036_v1, %v6323_v4 }
 0x2f3   : > { %v1753_v22 = vrot.slane %v1169_v26, %v6318_v42 }
 0x2f5   : > { %v1238_v32 = vpop.permute.xlu0 %1237  ;;  %v1754_v17 = vsel %vm1275_vm1, %v1753_v22, %v1749_v37  ;;  %v1778_v22 = vrot.slane %v4974_v46, %v6323_v4 }
 0x2f6   : > { %v1175_v51 = vpop.permute.xlu1 %1174  ;;  %v1865_v19 = vrot.slane %v1238_v32, %v6316_v16 }
 0x2f7   : > { %v1763_v9 = vrot.slane %v1175_v51, %v6320_v30  ;;  %v1759_v51 = vsel %vm1282_vm2, %v1758_v60, %v1754_v17 }
 0x2f9   : > { %v1244_v11 = vpop.permute.xlu0 %1243 }
 0x2fa   : > { %v5034_v49 = vpop.permute.xlu1 %1180 }
 0x2fd   : > { %v1250_v55 = vpop.permute.xlu0 %1249 }
 0x2fe   : > { %v1187_v36 = vpop.permute.xlu1 %1186  ;;  %v1885_v39 = vrot.slane %v1250_v55, %v6321_v14 }
 0x2ff   : > { %v1783_v57 = vrot.slane %v1187_v36, %v6317_v52 }
 0x301   : > { %v1788_v59 = vsel %vm1268_vm0, %v1787_v45, %v1783_v57 }
 0x302   : > { %v1193_v15 = vpop.permute.xlu1 %1192 }
 0x303   : > { %v1792_v53 = vrot.slane %v1193_v15, %v6318_v42 }
 0x305   : > { %v1793_v50 = vsel %vm1275_vm1, %v1792_v53, %v1788_v59 }
 0x306   : > { %v1199_v43 = vpop.permute.xlu1 %1198  ;;  %v1798_v3 = vsel %vm1282_vm2, %v1797_v27, %v1793_v50 }
 0x307   : > { %v1802_v20 = vrot.slane %v1199_v43, %v6320_v30  ;;  %v1764_v43 = vsel %vm1289_vm3, %v1763_v9, %v1759_v51  ;;  %v6359_v51 = vld [vmem:[#allocation55_spill] sm:$0xff] }
 0x309   : > { %v1803_v54 = vsel %vm1289_vm3, %v1802_v20, %v1798_v3  ;;  %v6354_v3 = vld [vmem:[#allocation21_spill] sm:$0xff] }
 0x30a   : > { %v1205_v21 = vpop.permute.xlu1 %1204  ;;  %v1808_v32 = vsel %vm1296_vm4, %v1807_v48, %v1803_v54  ;;  %v6356_v54 = vld [vmem:[#allocation23_spill] sm:$0xff] }
 0x30b   : > { %v1812_v26 = vrot.slane %v1205_v21, %v6322_v61 }
 0x30e   : > { %v1211_v5 = vpop.permute.xlu1 %1210 }
 0x30f   : > { %v1822_v25 = vrot.slane %v1211_v5, %v6317_v52  ;;  %v1773_v5 = vrot.slane %v5034_v49, %v6322_v61 }
 0x311   : > { %v1827_v2 = vsel %vm1268_vm0, %v1826_v38, %v1822_v25  ;;  %v1817_v25 = vrot.slane %v5032_v7, %v6323_v4 }
 0x312   : > { %v1217_v34 = vpop.permute.xlu1 %1216 }
 0x313   : > { %v1831_v6 = vrot.slane %v1217_v34, %v6318_v42  ;;  %v1768_v34 = vrot.slane %v4949_v35, %v6321_v14 }
 0x315   : > { %v1832_v10 = vsel %vm1275_vm1, %v1831_v6, %v1827_v2  ;;  %v1769_v49 = vsel %vm1296_vm4, %v1768_v34, %v1764_v43  ;;  %v1256_v6 = vpop.permute.xlu0 %1255  ;;  %v6364_v34 = vld [vmem:[#allocation63_spill] sm:$0xff] }
 0x316   : > { %v1223_v12 = vpop.permute.xlu1 %1222  ;;  %v1837_v36 = vsel %vm1282_vm2, %v1836_v13, %v1832_v10  ;;  %v1774_v38 = vsel %vm1303_vm5, %v1773_v5, %v1769_v49  ;;  %v1895_v50 = vrot.slane %v1256_v6, %v6323_v4  ;;  %v6363_v5 = vld [vmem:[#allocation61_spill] sm:$0xff]  ;;  %v6368_v49 = vld [vmem:[#allocation71_spill] sm:$0xff]  ;;  %v2030_v6 = vmul.f32 %v6341_v31, %v6354_v3 }
 0x317   : > { %v1841_v0 = vrot.slane %v1223_v12, %v6320_v30  ;;  %v1875_v12 = vrot.slane %v1244_v11, %v6319_v8  ;;  %v1779_v1 = vsel %vm1310_vm6, %v1778_v22, %v1774_v38 }
 0x319   : > { %v1842_v58 = vsel %vm1289_vm3, %v1841_v0, %v1837_v36 }
 0x31a   : > { %v1229_v18 = vpop.permute.xlu1 %1228  ;;  %v1847_v53 = vsel %vm1296_vm4, %v1846_v33, %v1842_v58 }
 0x31b   : > { %v1851_v41 = vrot.slane %v1229_v18, %v6322_v61  ;;  %v1813_v18 = vsel %vm1303_vm5, %v1812_v26, %v1808_v32  ;;  %v6357_v26 = vld [vmem:[#allocation54_spill] sm:$0xff]  ;;  %v6365_v32 = vld [vmem:[#allocation65_spill] sm:$0xff] }
 0x31c   : > { %v1818_v7 = vsel %vm1310_vm6, %v1817_v25, %v1813_v18  ;;  %v2008_v36 = vmul.f32 %v6357_v26, %v6356_v54  ;;  %v6366_v18 = vld [vmem:[#allocation67_spill] sm:$0xff] }
 0x31d   : > { %v1852_v45 = vsel %vm1303_vm5, %v1851_v41, %v1847_v53  ;;  %v1909_v37 = vsel %vm1897_vm7, %v1818_v7, %v1779_v1  ;;  %v6360_v41 = vld [vmem:[#allocation27_spill] sm:$0xff]  ;;  %v2022_v53 = vmul.f32 %v6366_v18, %v6354_v3 }
 0x31e   : > { %v1235_v44 = vpop.permute.xlu1 %1234  ;;  %v1857_v27 = vsel %vm1310_vm6, %v1856_v23, %v1852_v45 }
 0x31f   : > { %v1861_v24 = vrot.slane %v1235_v44, %v6317_v52  ;;  %v1910_v10 = vsel %vm1899_vm8, %v1857_v27, %v1909_v37  ;;  %v6373_v37 = vld [vmem:[#allocation35_spill] sm:$0xff] }
 0x321   : > { %v1866_v15 = vsel %vm1268_vm0, %v1865_v19, %v1861_v24 }
 0x322   : > { %v1241_v28 = vpop.permute.xlu1 %1240 }
 0x323   : > { %v1870_v40 = vrot.slane %v1241_v28, %v6318_v42  ;;  %v6355_v28 = vld [vmem:[#allocation53_spill] sm:$0xff] }
 0x324   : > { %v2006_v55 = vmul.f32 %v6355_v28, %v6354_v3 }
 0x325   : > { %v1871_v21 = vsel %vm1275_vm1, %v1870_v40, %v1866_v15  ;;  %v6358_v40 = vld [vmem:[#allocation25_spill] sm:$0xff] }
 0x326   : > { %v1247_v57 = vpop.permute.xlu1 %1246  ;;  %v1876_v35 = vsel %vm1282_vm2, %v1875_v12, %v1871_v21  ;;  %v2010_v58 = vmul.f32 %v6359_v51, %v6358_v40  ;;  %v6361_v15 = vld [vmem:[#allocation57_spill] sm:$0xff]  ;;  %v2016_v21 = vmul.f32 %v6363_v5, %v6356_v54  ;;  %v2018_v12 = vmul.f32 %v6364_v34, %v6358_v40 }
 0x327   : > { %v1880_v56 = vrot.slane %v1247_v57, %v6320_v30  ;;  %v2012_v33 = vmul.f32 %v6361_v15, %v6360_v41  ;;  %v2020_v57 = vmul.f32 %v6365_v32, %v6360_v41  ;;  %v2026_v45 = vmul.f32 %v6368_v49, %v6358_v40 }
 0x328   : > { %v2034_v7 = vmul.f32 %v6343_v63, %v6358_v40 }
 0x329   : > { %v1881_v11 = vsel %vm1289_vm3, %v1880_v56, %v1876_v35  ;;  %v6367_v56 = vld [vmem:[#allocation69_spill] sm:$0xff] }
 0x32a   : > { %v1253_v59 = vpop.permute.xlu1 %1252  ;;  %v1886_v20 = vsel %vm1296_vm4, %v1885_v39, %v1881_v11  ;;  %v2024_v25 = vmul.f32 %v6367_v56, %v6356_v54  ;;  %v6369_v35 = vld [vmem:[#allocation73_spill] sm:$0xff]  ;;  %v2032_v39 = vmul.f32 %v6342_v47, %v6356_v54 }
 0x32b   : > { %v1890_v44 = vrot.slane %v1253_v59, %v6322_v61  ;;  %v2028_v23 = vmul.f32 %v6369_v35, %v6360_v41  ;;  %v2036_v59 = vmul.f32 %v6344_v29, %v6360_v41  ;;  %v6374_v41 = vld [vmem:[#allocation20_spill] sm:$0xff] }
 0x32d   : > { %v1891_v2 = vsel %vm1303_vm5, %v1890_v44, %v1886_v20  ;;  %v6370_v44 = vld [vmem:[#allocation29_spill] sm:$0xff] }
 0x32e   : > { %v1896_v46 = vsel %vm1310_vm6, %v1895_v50, %v1891_v2  ;;  %v5109_v13 = vpop.permute.xlu1 %1935  ;;  %v2038_v27 = vmul.f32 %v6355_v28, %v6370_v44  ;;  %v6371_v50 = vld [vmem:[#allocation31_spill] sm:$0xff]  ;;  %v6372_v20 = vld [vmem:[#allocation33_spill] sm:$0xff] }
 0x32f   : > { %v1911_v0 = vsel %vm1901_vm9, %v1896_v46, %v1910_v10  ;;  %6353 = vst [vmem:[#allocation4_spill] sm:$0xff] %v5109_v13  ;;  %v1938_v48 = vadd.f32 %v5109_v13, %v4773_v62  ;;  %v6362_v62 = vld [vmem:[#allocation59_spill] sm:$0xff]  ;;  %v2040_v1 = vmul.f32 %v6357_v26, %v6371_v50  ;;  %v2042_v2 = vmul.f32 %v6359_v51, %v6372_v20 }
 0x330   : > { %v1926_v24 = vsel %vm1916_vm10, %v1911_v0, 0.0  ;;  %v2014_v43 = vmul.f32 %v6362_v62, %v6354_v3  ;;  %v2044_v46 = vmul.f32 %v6361_v15, %v6373_v37  ;;  %v2046_v10 = vmul.f32 %v6362_v62, %v6370_v44 }
 0x331   : > { %1927 = vadd.xlane.f32.xlu0 %v1926_v24  ;;  %v1942_v19 = vmax.f32 %v1938_v48, 0.0  ;;  %v2048_v0 = vmul.f32 %v6363_v5, %v6371_v50  ;;  %v2050_v24 = vmul.f32 %v6364_v34, %v6372_v20  ;;  %v2058_v48 = vmul.f32 %v6368_v49, %v6372_v20 }
 0x332   : > { %v2062_v3 = vmul.f32 %v6341_v31, %v6370_v44  ;;  %v2064_v40 = vmul.f32 %v6342_v47, %v6371_v50 }
 0x33a   : > { %v1922_v17 = vpop.xlane.xlu0 %1921 }
 0x33b   : > { %v1939_v9 = vadd.f32 %v5109_v13, %v1922_v17  ;;  %v2052_v17 = vmul.f32 %v6365_v32, %v6373_v37 }
 0x33d   : > { %v1943_v60 = vmax.f32 %v1939_v9, 0.0  ;;  %v2054_v9 = vmul.f32 %v6366_v18, %v6370_v44  ;;  %v6383_v44 = vld [vmem:[#allocation26_spill] sm:$0xff] }
 0x33f   : > { %1953 = vperm.xlu1 %3747, %v1943_v60   ;;  %v2056_v60 = vmul.f32 %v6367_v56, %v6371_v50 }
 0x347   : > { %1948 = vperm.xlu0 %3746, %v1942_v19   ;;  %v2060_v19 = vmul.f32 %v6369_v35, %v6373_v37 }
 0x34b   : > { %2263 = vperm.xlu0 %3746, %v2006_v55  }
 0x34f   : > { %2269 = vperm.xlu0 %3746, %v2008_v36  }
 0x353   : > { %2275 = vperm.xlu0 %3746, %v2010_v58   ;;  %v2066_v58 = vmul.f32 %v6343_v63, %v6372_v20  ;;  %v6386_v20 = vld [vmem:[#allocation41_spill] sm:$0xff] }
 0x357   : > { %2281 = vperm.xlu0 %3746, %v2012_v33   ;;  %v6375_v33 = vld [vmem:[#allocation52_spill] sm:$0xff] }
 0x35b   : > { %2287 = vperm.xlu0 %3746, %v2014_v43   ;;  %v2007_v43 = vmul.f32 %v6375_v33, %v6374_v41 }
 0x35f   : > { %2293 = vperm.xlu0 %3746, %v2016_v21  }
 0x363   : > { %2299 = vperm.xlu0 %3746, %v2018_v12   ;;  %v2068_v12 = vmul.f32 %v6344_v29, %v6373_v37  ;;  %v6387_v37 = vld [vmem:[#allocation62_spill] sm:$0xff] }
 0x367   : > { %2305 = vperm.xlu0 %3746, %v2020_v57   ;;  %v6377_v57 = vld [vmem:[#allocation22_spill] sm:$0xff] }
 0x36b   : > { %2311 = vperm.xlu0 %3746, %v2022_v53   ;;  %v6378_v53 = vld [vmem:[#allocation56_spill] sm:$0xff] }
 0x36f   : > { %2317 = vperm.xlu0 %3746, %v2024_v25   ;;  %v2009_v25 = vmul.f32 %v6378_v53, %v6377_v57 }
 0x373   : > { %2323 = vperm.xlu0 %3746, %v2026_v45  }
 0x377   : > { %2329 = vperm.xlu0 %3746, %v2028_v23   ;;  %v6379_v23 = vld [vmem:[#allocation37_spill] sm:$0xff] }
 0x37a   : > { %v1925_v38 = vpop.xlane.xlu0 %1924 }
 0x37b   : > { %v1940_v11 = vadd.f32 %v5109_v13, %v1925_v38  ;;  %2335 = vperm.xlu0 %3746, %v2030_v6   ;;  %v2070_v6 = vmul.f32 %v6355_v28, %v6379_v23  ;;  %v6380_v38 = vld [vmem:[#allocation24_spill] sm:$0xff] }
 0x37d   : > { %v1944_v22 = vmax.f32 %v1940_v11, 0.0  ;;  %v6381_v11 = vld [vmem:[#allocation58_spill] sm:$0xff] }
 0x37f   : > { %2341 = vperm.xlu0 %3746, %v2032_v39   ;;  %1958 = vperm.xlu1 %3747, %v1944_v22   ;;  %v2011_v22 = vmul.f32 %v6381_v11, %v6380_v38 }
 0x383   : > { %2347 = vperm.xlu0 %3746, %v2034_v7   ;;  %v6382_v7 = vld [vmem:[#allocation39_spill] sm:$0xff] }
 0x387   : > { %2353 = vperm.xlu0 %3746, %v2036_v59   ;;  %v2072_v59 = vmul.f32 %v6357_v26, %v6382_v7 }
 0x38b   : > { %2359 = vperm.xlu0 %3746, %v2038_v27   ;;  %v6384_v27 = vld [vmem:[#allocation60_spill] sm:$0xff] }
 0x38c   : > { %v2013_v50 = vmul.f32 %v6384_v27, %v6383_v44 }
 0x38f   : > { %2365 = vperm.xlu0 %3746, %v2040_v1  }
 0x393   : > { %2371 = vperm.xlu0 %3746, %v2042_v2   ;;  %v2074_v2 = vmul.f32 %v6359_v51, %v6386_v20 }
 0x397   : > { %2377 = vperm.xlu0 %3746, %v2044_v46   ;;  %v2015_v46 = vmul.f32 %v6387_v37, %v6374_v41 }
 0x39b   : > { %2383 = vperm.xlu0 %3746, %v2046_v10  }
 0x39f   : > { %2389 = vperm.xlu0 %3746, %v2048_v0   ;;  %v6389_v0 = vld [vmem:[#allocation43_spill] sm:$0xff] }
 0x3a3   : > { %2395 = vperm.xlu0 %3746, %v2050_v24   ;;  %v2076_v24 = vmul.f32 %v6361_v15, %v6389_v0 }
 0x3a7   : > { %2401 = vperm.xlu0 %3746, %v2052_v17   ;;  %v6390_v17 = vld [vmem:[#allocation64_spill] sm:$0xff] }
 0x3ab   : > { %2407 = vperm.xlu0 %3746, %v2054_v9   ;;  %v2017_v9 = vmul.f32 %v6390_v17, %v6377_v57 }
 0x3af   : > { %2413 = vperm.xlu0 %3746, %v2056_v60  }
 0x3b3   : > { %2419 = vperm.xlu0 %3746, %v2058_v48   ;;  %v2078_v48 = vmul.f32 %v6362_v62, %v6379_v23 }
 0x3b7   : > { %2425 = vperm.xlu0 %3746, %v2060_v19   ;;  %v6391_v19 = vld [vmem:[#allocation66_spill] sm:$0xff] }
 0x3ba   : > { %v1928_v55 = vpop.xlane.xlu0 %1927 }
 0x3bb   : > { %v1941_v54 = vadd.f32 %v5109_v13, %v1928_v55  ;;  %2431 = vperm.xlu0 %3746, %v2062_v3   ;;  %v2019_v3 = vmul.f32 %v6391_v19, %v6380_v38 }
 0x3bd   : > { %v1945_v36 = vmax.f32 %v1941_v54, 0.0  ;;  %v2080_v54 = vmul.f32 %v6363_v5, %v6382_v7 }
 0x3bf   : > { %2437 = vperm.xlu0 %3746, %v2064_v40   ;;  %1963 = vperm.xlu1 %3747, %v1945_v36   ;;  %v6392_v36 = vld [vmem:[#allocation68_spill] sm:$0xff] }
 0x3c0   : > { %v2021_v40 = vmul.f32 %v6392_v36, %v6383_v44 }
 0x3c2   : > { %v5180_v21 = vpop.permute.xlu0 %1948 }
 0x3c3   : > { %6376 = vst [vmem:[#allocation3_spill] sm:$0xff] %v5180_v21  ;;  %2443 = vperm.xlu0 %3746, %v2066_v58   ;;  %2266 = vperm.xlu1 %3747, %v2007_v43   ;;  %v2082_v43 = vmul.f32 %v6364_v34, %v6386_v20  ;;  %v6401_v21 = vld [vmem:[#allocation78_spill] sm:$0xff]  ;;  %v6403_v34 = vld [vmem:[#allocation80_spill] sm:$0xff] }
 0x3c4   : > { %v2031_v13 = vmul.f32 %v6401_v21, %v6374_v41 }
 0x3c6   : > { %v5186_v45 = vpop.permute.xlu0 %2263 }
 0x3c7   : > { %2449 = vperm.xlu0 %3746, %v2068_v12   ;;  %2272 = vperm.xlu1 %3747, %v2009_v25   ;;  %v6393_v12 = vld [vmem:[#allocation70_spill] sm:$0xff] }
 0x3c8   : > { %v2023_v25 = vmul.f32 %v6393_v12, %v6374_v41 }
 0x3ca   : > { %v5192_v39 = vpop.permute.xlu0 %2269 }
 0x3cb   : > { %2455 = vperm.xlu0 %3746, %v2070_v6   ;;  %2278 = vperm.xlu1 %3747, %v2011_v22   ;;  %v6395_v22 = vld [vmem:[#allocation36_spill] sm:$0xff] }
 0x3ce   : > { %v5198_v1 = vpop.permute.xlu0 %2275 }
 0x3cf   : > { %6385 = vst [vmem:[#allocation5_spill] sm:$0xff] %v5198_v1  ;;  %2461 = vperm.xlu0 %3746, %v2072_v59   ;;  %2284 = vperm.xlu1 %3747, %v2013_v50   ;;  %v2087_v59 = vmul.f32 %v6393_v12, %v6395_v22  ;;  %v6396_v50 = vld [vmem:[#allocation72_spill] sm:$0xff] }
 0x3d2   : > { %v5204_v10 = vpop.permute.xlu0 %2281 }
 0x3d3   : > { %6388 = vst [vmem:[#allocation6_spill] sm:$0xff] %v5204_v10  ;;  %2467 = vperm.xlu0 %3746, %v2074_v2   ;;  %2290 = vperm.xlu1 %3747, %v2015_v46   ;;  %v2025_v2 = vmul.f32 %v6396_v50, %v6377_v57  ;;  %v2033_v10 = vmul.f32 %v6403_v34, %v6377_v57 }
 0x3d6   : > { %v5210_v60 = vpop.permute.xlu0 %2287 }
 0x3d7   : > { %2473 = vperm.xlu0 %3746, %v2076_v24   ;;  %2296 = vperm.xlu1 %3747, %v2017_v9   ;;  %v6397_v24 = vld [vmem:[#allocation44_spill] sm:$0xff] }
 0x3d8   : > { %v2103_v9 = vmul.f32 %v6375_v33, %v6397_v24 }
 0x3da   : > { %v5216_v55 = vpop.permute.xlu0 %2293 }
 0x3db   : > { %2479 = vperm.xlu0 %3746, %v2078_v48   ;;  %2302 = vperm.xlu1 %3747, %v2019_v3   ;;  %v6398_v48 = vld [vmem:[#allocation74_spill] sm:$0xff] }
 0x3dc   : > { %v2027_v3 = vmul.f32 %v6398_v48, %v6380_v38 }
 0x3de   : > { %v5222_v58 = vpop.permute.xlu0 %2299 }
 0x3df   : > { %2485 = vperm.xlu0 %3746, %v2080_v54   ;;  %2308 = vperm.xlu1 %3747, %v2021_v40   ;;  %v2111_v40 = vmul.f32 %v6387_v37, %v6397_v24 }
 0x3e2   : > { %v5228_v6 = vpop.permute.xlu0 %2305 }
 0x3e3   : > { %6394 = vst [vmem:[#allocation7_spill] sm:$0xff] %v5228_v6  ;;  %2491 = vperm.xlu0 %3746, %v2082_v43   ;;  %2314 = vperm.xlu1 %3747, %v2023_v25   ;;  %v6399_v43 = vld [vmem:[#allocation76_spill] sm:$0xff] }
 0x3e4   : > { %v2029_v25 = vmul.f32 %v6399_v43, %v6383_v44 }
 0x3e6   : > { %v5234_v46 = vpop.permute.xlu0 %2311 }
 0x3e7   : > { %2506 = vperm.xlu0 %3746, %v2087_v59   ;;  %2320 = vperm.xlu1 %3747, %v2025_v2   ;;  %v2094_v2 = vmul.f32 %v6341_v31, %v6379_v23  ;;  %v6406_v31 = vld [vmem:[#allocation82_spill] sm:$0xff] }
 0x3e8   : > { %v2035_v6 = vmul.f32 %v6406_v31, %v6380_v38  ;;  %v6412_v38 = vld [vmem:[#allocation30_spill] sm:$0xff] }
 0x3ea   : > { %v5240_v54 = vpop.permute.xlu0 %2317 }
 0x3eb   : > { %2554 = vperm.xlu0 %3746, %v2103_v9   ;;  %2326 = vperm.xlu1 %3747, %v2027_v3   ;;  %v6402_v9 = vld [vmem:[#allocation47_spill] sm:$0xff] }
 0x3ec   : > { %v2104_v3 = vmul.f32 %v6357_v26, %v6402_v9 }
 0x3ee   : > { %v5246_v59 = vpop.permute.xlu0 %2323 }
 0x3ef   : > { %2578 = vperm.xlu0 %3746, %v2111_v40   ;;  %2332 = vperm.xlu1 %3747, %v2029_v25   ;;  %6400 = vst [vmem:[#allocation13_spill] sm:$0xff] %v5246_v59  ;;  %v6405_v40 = vld [vmem:[#allocation45_spill] sm:$0xff]  ;;  %v2127_v59 = vmul.f32 %v6401_v21, %v6397_v24 }
 0x3f0   : > { %v2118_v25 = vmul.f32 %v6366_v18, %v6405_v40 }
 0x3f2   : > { %v5256_v4 = vpop.permute.xlu0 %2329 }
 0x3f3   : > { %2527 = vperm.xlu0 %3746, %v2094_v2   ;;  %2338 = vperm.xlu1 %3747, %v2031_v13   ;;  %6404 = vst [vmem:[#allocation77_spill] sm:$0xff] %v5256_v4  ;;  %v6407_v13 = vld [vmem:[#allocation38_spill] sm:$0xff]  ;;  %v6408_v2 = vld [vmem:[#allocation83_spill] sm:$0xff]  ;;  %v6410_v4 = vld [vmem:[#allocation28_spill] sm:$0xff] }
 0x3f4   : > { %v2089_v26 = vmul.f32 %v6396_v50, %v6407_v13  ;;  %v2037_v57 = vmul.f32 %v6408_v2, %v6383_v44  ;;  %v2039_v61 = vmul.f32 %v6375_v33, %v6410_v4 }
 0x3f6   : > { %v5262_v41 = vpop.permute.xlu0 %2335 }
 0x3f7   : > { %2557 = vperm.xlu0 %3746, %v2104_v3   ;;  %2344 = vperm.xlu1 %3747, %v2033_v10   ;;  %v6409_v3 = vld [vmem:[#allocation46_spill] sm:$0xff] }
 0x3f8   : > { %v2105_v10 = vmul.f32 %v6378_v53, %v6409_v3 }
 0x3fa   : > { %v5272_v1 = vpop.permute.xlu0 %2341 }
 0x3fb   : > { %2599 = vperm.xlu0 %3746, %v2118_v25   ;;  %2350 = vperm.xlu1 %3747, %v2035_v6   ;;  %6411 = vst [vmem:[#allocation79_spill] sm:$0xff] %v5272_v1  ;;  %v2041_v6 = vmul.f32 %v6378_v53, %v6412_v38  ;;  %v2120_v25 = vmul.f32 %v6367_v56, %v6402_v9 }
 0x3fc   : > { %v2090_v1 = vmul.f32 %v6368_v49, %v6386_v20  ;;  %v2121_v49 = vmul.f32 %v6396_v50, %v6409_v3 }
 0x3fe   : > { %v5278_v44 = vpop.permute.xlu0 %2347 }
 0x3ff   : > { %2512 = vperm.xlu0 %3746, %v2089_v26   ;;  %2356 = vperm.xlu1 %3747, %v2037_v57   ;;  %6413 = vst [vmem:[#allocation81_spill] sm:$0xff] %v5278_v44  ;;  %v6414_v26 = vld [vmem:[#allocation32_spill] sm:$0xff] }
 0x400   : > { %v2043_v57 = vmul.f32 %v6381_v11, %v6414_v26 }
 0x402   : > { %v5288_v14 = vpop.permute.xlu0 %2353 }
 0x403   : > { %2560 = vperm.xlu0 %3746, %v2105_v10   ;;  %2362 = vperm.xlu1 %3747, %v2039_v61   ;;  %v6415_v10 = vld [vmem:[#allocation34_spill] sm:$0xff]  ;;  %6416 = vst [vmem:[#allocation12_spill] sm:$0xff] %v5288_v14 }
 0x404   : > { %v2045_v61 = vmul.f32 %v6384_v27, %v6415_v10 }
 0x407   : > { %2368 = vperm.xlu1 %3747, %v2041_v6   ;;  %2605 = vperm.xlu0 %3746, %v2120_v25   ;;  %v2047_v6 = vmul.f32 %v6387_v37, %v6410_v4  ;;  %v6417_v25 = vld [vmem:[#allocation49_spill] sm:$0xff] }
 0x408   : > { %v2106_v44 = vmul.f32 %v6359_v51, %v6417_v25  ;;  %v2053_v51 = vmul.f32 %v6392_v36, %v6415_v10 }
 0x40b   : > { %2374 = vperm.xlu1 %3747, %v2043_v57   ;;  %2626 = vperm.xlu0 %3746, %v2127_v59   ;;  %v5294_v57 = vpop.permute.xlu0 %2359  ;;  %v2049_v59 = vmul.f32 %v6390_v17, %v6412_v38 }
 0x40c   : > { %6418 = vst [vmem:[#allocation15_spill] sm:$0xff] %v5294_v57 }
 0x40f   : > { %2380 = vperm.xlu1 %3747, %v2045_v61   ;;  %2515 = vperm.xlu0 %3746, %v2090_v1   ;;  %v2051_v1 = vmul.f32 %v6391_v19, %v6414_v26  ;;  %v2084_v61 = vmul.f32 %v6365_v32, %v6389_v0  ;;  %v5304_v14 = vpop.permute.xlu0 %2365 }
 0x410   : > { %6419 = vst [vmem:[#allocation14_spill] sm:$0xff] %v5304_v14 }
 0x413   : > { %2386 = vperm.xlu1 %3747, %v2047_v6   ;;  %2563 = vperm.xlu0 %3746, %v2106_v44   ;;  %v2098_v44 = vmul.f32 %v6343_v63, %v6386_v20  ;;  %v5310_v6 = vpop.permute.xlu0 %2371  ;;  %v2059_v20 = vmul.f32 %v6398_v48, %v6414_v26 }
 0x414   : > { %6420 = vst [vmem:[#allocation17_spill] sm:$0xff] %v5310_v6 }
 0x417   : > { %2392 = vperm.xlu1 %3747, %v2049_v59   ;;  %2608 = vperm.xlu0 %3746, %v2121_v49   ;;  %v2055_v49 = vmul.f32 %v6393_v12, %v6410_v4  ;;  %v6421_v59 = vld [vmem:[#allocation48_spill] sm:$0xff]  ;;  %v5320_v14 = vpop.permute.xlu0 %2377 }
 0x418   : > { %v2115_v57 = vmul.f32 %v6391_v19, %v6421_v59  ;;  %6422 = vst [vmem:[#allocation16_spill] sm:$0xff] %v5320_v14  ;;  %v5336_v14 = vpop.permute.xlu1 %1953 }
 0x419   : > { %6425 = vst [vmem:[#allocation18_spill] sm:$0xff] %v5336_v14  ;;  %v6430_v14 = vld [vmem:[#allocation50_spill] sm:$0xff] }
 0x41b   : > { %2398 = vperm.xlu1 %3747, %v2051_v1   ;;  %2497 = vperm.xlu0 %3746, %v2084_v61   ;;  %v2057_v1 = vmul.f32 %v6396_v50, %v6412_v38  ;;  %v2129_v61 = vmul.f32 %v6403_v34, %v6409_v3  ;;  %v2061_v50 = vmul.f32 %v6399_v43, %v6415_v10 }
 0x41f   : > { %2404 = vperm.xlu1 %3747, %v2053_v51   ;;  %2539 = vperm.xlu0 %3746, %v2098_v44   ;;  %v2092_v51 = vmul.f32 %v6369_v35, %v6389_v0  ;;  %v5326_v44 = vpop.permute.xlu0 %2383 }
 0x420   : > { %6423 = vst [vmem:[#allocation2_spill] sm:$0xff] %v5326_v44  ;;  %v6427_v44 = vld [vmem:[#allocation42_spill] sm:$0xff] }
 0x423   : > { %2410 = vperm.xlu1 %3747, %v2055_v49   ;;  %2590 = vperm.xlu0 %3746, %v2115_v57   ;;  %v6424_v57 = vld [vmem:[#allocation51_spill] sm:$0xff] }
 0x424   : > { %v2108_v49 = vmul.f32 %v6361_v15, %v6424_v57  ;;  %v2093_v15 = vmul.f32 %v6399_v43, %v6427_v44 }
 0x427   : > { %2416 = vperm.xlu1 %3747, %v2057_v1   ;;  %2632 = vperm.xlu0 %3746, %v2129_v61   ;;  %v2063_v1 = vmul.f32 %v6401_v21, %v6410_v4  ;;  %v2123_v61 = vmul.f32 %v6398_v48, %v6421_v59 }
 0x42b   : > { %2422 = vperm.xlu1 %3747, %v2059_v20   ;;  %2521 = vperm.xlu0 %3746, %v2092_v51   ;;  %v5338_v20 = vpop.permute.xlu0 %2389  ;;  %v2065_v51 = vmul.f32 %v6403_v34, %v6412_v38  ;;  %v2069_v38 = vmul.f32 %v6408_v2, %v6415_v10 }
 0x42c   : > { %6426 = vst [vmem:[#allocation19_spill] sm:$0xff] %v5338_v20  ;;  %v2109_v20 = vmul.f32 %v6384_v27, %v6430_v14 }
 0x42f   : > { %2428 = vperm.xlu1 %3747, %v2061_v50   ;;  %2569 = vperm.xlu0 %3746, %v2108_v49   ;;  %v5344_v50 = vpop.permute.xlu1 %1958  ;;  %v5346_v4 = vpop.permute.xlu0 %2395  ;;  %v2067_v49 = vmul.f32 %v6406_v31, %v6414_v26  ;;  %v2071_v26 = vmul.f32 %v6375_v33, %v6395_v22  ;;  %v6434_v33 = vld [vmem:[#allocation40_spill] sm:$0xff] }
 0x430   : > { %6428 = vst [vmem:[#allocation21_spill] sm:$0xff] %v5344_v50  ;;  %6429 = vst [vmem:[#allocation53_spill] sm:$0xff] %v5346_v4 }
 0x433   : > { %2434 = vperm.xlu1 %3747, %v2063_v1   ;;  %2614 = vperm.xlu0 %3746, %v2123_v61   ;;  %v2124_v61 = vmul.f32 %v6369_v35, %v6424_v57  ;;  %v2073_v35 = vmul.f32 %v6378_v53, %v6407_v13 }
 0x437   : > { %2440 = vperm.xlu1 %3747, %v2065_v51   ;;  %2524 = vperm.xlu0 %3746, %v2093_v15   ;;  %v5360_v15 = vpop.permute.xlu0 %2401 }
 0x438   : > { %6432 = vst [vmem:[#allocation54_spill] sm:$0xff] %v5360_v15 }
 0x43a   : > { %v5352_v1 = vpop.permute.xlu1 %1963 }
 0x43b   : > { %6431 = vst [vmem:[#allocation23_spill] sm:$0xff] %v5352_v1  ;;  %2446 = vperm.xlu1 %3747, %v2067_v49   ;;  %2572 = vperm.xlu0 %3746, %v2109_v20   ;;  %v2101_v1 = vmul.f32 %v6408_v2, %v6427_v44  ;;  %v5368_v10 = vpop.permute.xlu0 %2407  ;;  %v2132_v20 = vmul.f32 %v6344_v29, %v6424_v57 }
 0x43c   : > { %6433 = vst [vmem:[#allocation25_spill] sm:$0xff] %v5368_v10  ;;  %v2079_v10 = vmul.f32 %v6387_v37, %v6395_v22  ;;  %v2102_v37 = vmul.f32 %v6355_v28, %v6405_v40  ;;  %v2095_v28 = vmul.f32 %v6401_v21, %v6395_v22  ;;  %v2649_v21 = vrot.slane %v5186_v45, %v6317_v52 }
 0x43d   : > { %v2766_v45 = vrot.slane %v5262_v41, %v6317_v52  ;;  %v2096_v41 = vmul.f32 %v6342_v47, %v6382_v7 }
 0x43e   : > { %v5358_v51 = vpop.permute.xlu1 %2266 }
 0x43f   : > { %2452 = vperm.xlu1 %3747, %v2069_v38   ;;  %2617 = vperm.xlu0 %3746, %v2124_v61   ;;  %v2075_v61 = vmul.f32 %v6381_v11, %v6434_v33  ;;  %v5380_v15 = vpop.permute.xlu0 %2413 }
 0x440   : > { %6435 = vst [vmem:[#allocation55_spill] sm:$0xff] %v5380_v15 }
 0x442   : > { %v5366_v49 = vpop.permute.xlu1 %2272 }
 0x443   : > { %2458 = vperm.xlu1 %3747, %v2071_v26   ;;  %2548 = vperm.xlu0 %3746, %v2101_v1   ;;  %v2077_v1 = vmul.f32 %v6384_v27, %v6427_v44  ;;  %v5384_v53 = vpop.permute.xlu0 %2419  ;;  %v2086_v27 = vmul.f32 %v6366_v18, %v6379_v23  ;;  %v2088_v18 = vmul.f32 %v6367_v56, %v6382_v7  ;;  %v6440_v7 = vld [vmem:[#allocation13_spill] sm:$0xff] }
 0x444   : > { %6436 = vst [vmem:[#allocation27_spill] sm:$0xff] %v5384_v53  ;;  %v2110_v53 = vmul.f32 %v6362_v62, %v6405_v40  ;;  %v2688_v62 = vrot.slane %v5210_v60, %v6317_v52  ;;  %v2727_v56 = vrot.slane %v5234_v46, %v6317_v52  ;;  %v2119_v60 = vmul.f32 %v6393_v12, %v6397_v24 }
 0x445   : > { %v2658_v24 = vrot.slane %v5192_v39, %v6318_v42 }
 0x446   : > { %v5374_v38 = vpop.permute.xlu1 %2278 }
 0x447   : > { %2464 = vperm.xlu1 %3747, %v2073_v35   ;;  %2641 = vperm.xlu0 %3746, %v2132_v20   ;;  %v2081_v20 = vmul.f32 %v6390_v17, %v6407_v13  ;;  %v5392_v6 = vpop.permute.xlu0 %2425 }
 0x44a   : > { %v5378_v50 = vpop.permute.xlu1 %2284 }
 0x44b   : > { %2470 = vperm.xlu1 %3747, %v2075_v61  }
 0x44e   : > { %v2291_v26 = vpop.permute.xlu1 %2290 }
 0x44f   : > { %2476 = vperm.xlu1 %3747, %v2077_v1   ;;  %v5398_v1 = vpop.permute.xlu0 %2431 }
 0x450   : > { %6437 = vst [vmem:[#allocation57_spill] sm:$0xff] %v5398_v1 }
 0x452   : > { %v2297_v35 = vpop.permute.xlu1 %2296 }
 0x453   : > { %2482 = vperm.xlu1 %3747, %v2079_v10   ;;  %v5404_v2 = vpop.permute.xlu0 %2437 }
 0x456   : > { %v5390_v4 = vpop.permute.xlu1 %2302 }
 0x457   : > { %2488 = vperm.xlu1 %3747, %v2081_v20   ;;  %v5408_v20 = vpop.permute.xlu0 %2443 }
 0x45a   : > { %v5396_v61 = vpop.permute.xlu1 %2308 }
 0x45b   : > { %2503 = vperm.xlu1 %3747, %v2086_v27   ;;  %v2692_v27 = vrot.slane %v2291_v26, %v6316_v16  ;;  %v2112_v26 = vmul.f32 %v6363_v5, %v6402_v9  ;;  %v5441_v12 = vpop.permute.xlu0 %2449 }
 0x45d   : > { %v2693_v22 = vsel %vm1268_vm0, %v2692_v27, %v2688_v62  ;;  %v6438_v62 = vld [vmem:[#allocation8_spill] sm:$0xff] }
 0x45e   : > { %v2315_v10 = vpop.permute.xlu1 %2314 }
 0x45f   : > { %2551 = vperm.xlu1 %3747, %v2102_v37   ;;  %v2731_v37 = vrot.slane %v2315_v10, %v6316_v16  ;;  %v2702_v10 = vrot.slane %v2297_v35, %v6319_v8  ;;  %v2663_v35 = vrot.slane %v5366_v49, %v6319_v8  ;;  %v2712_v49 = vrot.slane %v5390_v4, %v6438_v62 }
 0x460   : > { %v2673_v4 = vrot.slane %v5374_v38, %v6438_v62 }
 0x461   : > { %v2732_v46 = vsel %vm1268_vm0, %v2731_v37, %v2727_v56 }
 0x462   : > { %v2321_v15 = vpop.permute.xlu1 %2320 }
 0x463   : > { %2575 = vperm.xlu1 %3747, %v2110_v53   ;;  %v2653_v53 = vrot.slane %v5358_v51, %v6316_v16  ;;  %v2697_v51 = vrot.slane %v5216_v55, %v6318_v42  ;;  %v2741_v5 = vrot.slane %v2321_v15, %v6319_v8 }
 0x465   : > { %v2654_v27 = vsel %vm1268_vm0, %v2653_v53, %v2649_v21  ;;  %v2698_v15 = vsel %vm1275_vm1, %v2697_v51, %v2693_v22 }
 0x466   : > { %v2327_v23 = vpop.permute.xlu1 %2326  ;;  %v2703_v37 = vsel %vm1282_vm2, %v2702_v10, %v2698_v15  ;;  %v2659_v21 = vsel %vm1275_vm1, %v2658_v24, %v2654_v27  ;;  %v2746_v10 = vrot.slane %v6440_v7, %v6320_v30  ;;  %v6442_v27 = vld [vmem:[#allocation9_spill] sm:$0xff]  ;;  %v5473_v15 = vpop.permute.xlu0 %2455 }
 0x467   : > { %2509 = vperm.xlu1 %3747, %v2088_v18   ;;  %v2736_v18 = vrot.slane %v5240_v54, %v6318_v42  ;;  %v2707_v54 = vrot.slane %v5222_v58, %v6320_v30  ;;  %v2751_v22 = vrot.slane %v2327_v23, %v6438_v62 }
 0x469   : > { %v2737_v53 = vsel %vm1275_vm1, %v2736_v18, %v2732_v46  ;;  %v6441_v46 = vld [vmem:[#allocation5_spill] sm:$0xff]  ;;  %v2708_v23 = vsel %vm1289_vm3, %v2707_v54, %v2703_v37 }
 0x46a   : > { %v5414_v1 = vpop.permute.xlu1 %2332  ;;  %v2742_v58 = vsel %vm1282_vm2, %v2741_v5, %v2737_v53  ;;  %v6444_v53 = vld [vmem:[#allocation10_spill] sm:$0xff] }
 0x46b   : > { %2530 = vperm.xlu1 %3747, %v2095_v28   ;;  %v2722_v38 = vrot.slane %v5396_v61, %v6444_v53  ;;  %v2761_v37 = vrot.slane %v5414_v1, %v6444_v53 }
 0x46e   : > { %v2339_v28 = vpop.permute.xlu1 %2338 }
 0x46f   : > { %v2770_v55 = vrot.slane %v2339_v28, %v6316_v16  ;;  %2581 = vperm.xlu1 %3747, %v2112_v26   ;;  %v6439_v26 = vld [vmem:[#allocation79_spill] sm:$0xff]  ;;  %v2664_v28 = vsel %vm1282_vm2, %v2663_v35, %v2659_v21  ;;  %v2713_v35 = vsel %vm1296_vm4, %v2712_v49, %v2708_v23  ;;  %v6445_v21 = vld [vmem:[#allocation81_spill] sm:$0xff] }
 0x470   : > { %v2775_v39 = vrot.slane %v6439_v26, %v6318_v42  ;;  %v2747_v26 = vsel %vm1289_vm3, %v2746_v10, %v2742_v58  ;;  %v6446_v49 = vld [vmem:[#allocation77_spill] sm:$0xff]  ;;  %v2683_v58 = vrot.slane %v5378_v50, %v6444_v53  ;;  %v6448_v50 = vld [vmem:[#allocation12_spill] sm:$0xff] }
 0x471   : > { %v2771_v56 = vsel %vm1268_vm0, %v2770_v55, %v2766_v45  ;;  %v2668_v45 = vrot.slane %v6441_v46, %v6320_v30  ;;  %v6443_v55 = vld [vmem:[#allocation7_spill] sm:$0xff]  ;;  %v2752_v54 = vsel %vm1296_vm4, %v2751_v22, %v2747_v26  ;;  %v2795_v23 = vrot.slane %v6448_v50, %v6442_v27 }
 0x472   : > { %v2345_v51 = vpop.permute.xlu1 %2344  ;;  %v2717_v5 = vrot.slane %v6443_v55, %v6442_v27  ;;  %v2776_v24 = vsel %vm1275_vm1, %v2775_v39, %v2771_v56  ;;  %v2756_v39 = vrot.slane %v6446_v49, %v6442_v27 }
 0x473   : > { %v2780_v18 = vrot.slane %v2345_v51, %v6319_v8  ;;  %2602 = vperm.xlu1 %3747, %v2119_v60   ;;  %v2785_v51 = vrot.slane %v6445_v21, %v6320_v30  ;;  %v2669_v7 = vsel %vm1289_vm3, %v2668_v45, %v2664_v28 }
 0x474   : > { %v2674_v61 = vsel %vm1296_vm4, %v2673_v4, %v2669_v7  ;;  %v2718_v22 = vsel %vm1303_vm5, %v2717_v5, %v2713_v35  ;;  %v2757_v45 = vsel %vm1303_vm5, %v2756_v39, %v2752_v54  ;;  %v2113_v4 = vmul.f32 %v6390_v17, %v6409_v3  ;;  %v5506_v35 = vpop.permute.xlu0 %2461  ;;  %v6449_v17 = vld [vmem:[#allocation75_spill] sm:$0xff] }
 0x475   : > { %v2781_v60 = vsel %vm1282_vm2, %v2780_v18, %v2776_v24  ;;  %v6447_v18 = vld [vmem:[#allocation6_spill] sm:$0xff]  ;;  %v2723_v1 = vsel %vm1310_vm6, %v2722_v38, %v2718_v22  ;;  %v2762_v24 = vsel %vm1310_vm6, %v2761_v37, %v2757_v45  ;;  %v2126_v3 = vmul.f32 %v6449_v17, %v6405_v40 }
 0x476   : > { %v2351_v56 = vpop.permute.xlu1 %2350  ;;  %v2678_v28 = vrot.slane %v6447_v18, %v6442_v27  ;;  %v2786_v46 = vsel %vm1289_vm3, %v2785_v51, %v2781_v60  ;;  %v2083_v39 = vmul.f32 %v6391_v19, %v6434_v33  ;;  %v2097_v40 = vmul.f32 %v6403_v34, %v6407_v13  ;;  %v6450_v18 = vld [vmem:[#allocation63_spill] sm:$0xff] }
 0x477   : > { %v2790_v10 = vrot.slane %v2351_v56, %v6438_v62  ;;  %2533 = vperm.xlu1 %3747, %v2096_v41   ;;  %v2128_v19 = vmul.f32 %v6342_v47, %v6402_v9  ;;  %v2091_v34 = vmul.f32 %v6398_v48, %v6434_v33  ;;  %v6451_v47 = vld [vmem:[#allocation71_spill] sm:$0xff]  ;;  %v2085_v48 = vmul.f32 %v6392_v36, %v6427_v44 }
 0x478   : > { %v2679_v41 = vsel %vm1303_vm5, %v2678_v28, %v2674_v61  ;;  %v5519_v49 = vpop.permute.xlu0 %2467  ;;  %v2114_v28 = vmul.f32 %v6450_v18, %v6417_v25  ;;  %v2122_v9 = vmul.f32 %v6451_v47, %v6417_v25  ;;  %v2130_v44 = vmul.f32 %v6343_v63, %v6417_v25 }
 0x479   : > { %v2791_v55 = vsel %vm1296_vm4, %v2790_v10, %v2786_v46  ;;  %v2684_v5 = vsel %vm1310_vm6, %v2683_v58, %v2679_v41  ;;  %v2131_v63 = vmul.f32 %v6406_v31, %v6421_v59 }
 0x47a   : > { %v2357_v26 = vpop.permute.xlu1 %2356  ;;  %v2796_v60 = vsel %vm1303_vm5, %v2795_v23, %v2791_v55  ;;  %v3270_v21 = vsel %vm1897_vm7, %v2723_v1, %v2684_v5  ;;  %v2107_v55 = vmul.f32 %v6381_v11, %v6421_v59  ;;  %v2099_v11 = vmul.f32 %v6406_v31, %v6434_v33 }
 0x47b   : > { %v2800_v38 = vrot.slane %v2357_v26, %v6444_v53  ;;  %2584 = vperm.xlu1 %3747, %v2113_v4   ;;  %v3271_v7 = vsel %vm1899_vm8, %v2762_v24, %v3270_v21  ;;  %v2100_v33 = vmul.f32 %v6344_v29, %v6389_v0  ;;  %v2125_v29 = vmul.f32 %v6399_v43, %v6430_v14 }
 0x47c   : > { %v5529_v10 = vpop.permute.xlu0 %2473  ;;  %v2961_v31 = vrot.slane %v5473_v15, %v6317_v52  ;;  %v2970_v43 = vrot.slane %v5506_v35, %v6318_v42  ;;  %v2980_v15 = vrot.slane %v5519_v49, %v6320_v30  ;;  %v6454_v35 = vld [vmem:[#allocation14_spill] sm:$0xff] }
 0x47d   : > { %v2801_v51 = vsel %vm1310_vm6, %v2800_v38, %v2796_v60  ;;  %v2116_v38 = vmul.f32 %v6365_v32, %v6424_v57  ;;  %v2117_v32 = vmul.f32 %v6392_v36, %v6430_v14  ;;  %v6452_v36 = vld [vmem:[#allocation83_spill] sm:$0xff] }
 0x47e   : > { %v5515_v54 = vpop.permute.xlu1 %2362  ;;  %v3272_v37 = vsel %vm1901_vm9, %v2801_v51, %v3271_v7 }
 0x47f   : > { %2623 = vperm.xlu1 %3747, %v2126_v3   ;;  %v3286_v56 = vsel %vm1916_vm10, %v3272_v37, 0.0  ;;  %v2809_v49 = vrot.slane %v5515_v54, %v6316_v16 }
 0x480   : > { %3287 = vadd.xlane.f32.xlu0 %v3286_v56  ;;  %v5535_v46 = vpop.permute.xlu0 %2479  ;;  %v2133_v56 = vmul.f32 %v6452_v36, %v6430_v14 }
 0x482   : > { %v5523_v61 = vpop.permute.xlu1 %2368 }
 0x483   : > { %2494 = vperm.xlu1 %3747, %v2083_v39  }
 0x484   : > { %v5545_v45 = vpop.permute.xlu0 %2485 }
 0x486   : > { %v5527_v58 = vpop.permute.xlu1 %2374 }
 0x487   : > { %2536 = vperm.xlu1 %3747, %v2097_v40  }
 0x488   : > { %v5551_v50 = vpop.permute.xlu0 %2491 }
 0x48a   : > { %v5533_v22 = vpop.permute.xlu1 %2380 }
 0x48b   : > { %2587 = vperm.xlu1 %3747, %v2114_v28  }
 0x48c   : > { %v5561_v24 = vpop.permute.xlu0 %2506 }
 0x48e   : > { %v5539_v1 = vpop.permute.xlu1 %2386 }
 0x48f   : > { %2629 = vperm.xlu1 %3747, %v2128_v19  }
 0x490   : > { %v5567_v5 = vpop.permute.xlu0 %2554 }
 0x492   : > { %v5543_v13 = vpop.permute.xlu1 %2392 }
 0x493   : > { %2518 = vperm.xlu1 %3747, %v2091_v34  }
 0x494   : > { %v5577_v17 = vpop.permute.xlu0 %2578 }
 0x496   : > { %v5549_v4 = vpop.permute.xlu1 %2398 }
 0x497   : > { %2566 = vperm.xlu1 %3747, %v2107_v55  }
 0x498   : > { %v5583_v51 = vpop.permute.xlu0 %2527 }
 0x49a   : > { %v5555_v23 = vpop.permute.xlu1 %2404 }
 0x49b   : > { %2611 = vperm.xlu1 %3747, %v2122_v9   ;;  %v6453_v9 = vld [vmem:[#allocation15_spill] sm:$0xff] }
 0x49c   : > { %v5593_v7 = vpop.permute.xlu0 %2557 }
 0x49e   : > { %v5559_v41 = vpop.permute.xlu1 %2410 }
 0x49f   : > { %2500 = vperm.xlu1 %3747, %v2085_v48   ;;  %v2805_v48 = vrot.slane %v6453_v9, %v6317_v52 }
 0x4a0   : > { %v5599_v37 = vpop.permute.xlu0 %2599 }
 0x4a2   : > { %v5565_v26 = vpop.permute.xlu1 %2416 }
 0x4a3   : > { %2542 = vperm.xlu1 %3747, %v2099_v11   ;;  %v2814_v11 = vrot.slane %v6454_v35, %v6318_v42 }
 0x4a4   : > { %v5609_v28 = vpop.permute.xlu0 %2512 }
 0x4a6   : > { %v5571_v60 = vpop.permute.xlu1 %2422 }
 0x4a7   : > { %2593 = vperm.xlu1 %3747, %v2116_v38  }
 0x4aa   : > { %v5575_v21 = vpop.permute.xlu1 %2428 }
 0x4ab   : > { %2635 = vperm.xlu1 %3747, %v2130_v44   ;;  %v6455_v44 = vld [vmem:[#allocation17_spill] sm:$0xff] }
 0x4ae   : > { %v5581_v3 = vpop.permute.xlu1 %2434 }
 0x4af   : > { %2545 = vperm.xlu1 %3747, %v2100_v33   ;;  %v2824_v33 = vrot.slane %v6455_v44, %v6320_v30  ;;  %v2912_v44 = vrot.slane %v5392_v6, %v6442_v27 }
 0x4b2   : > { %v5587_v57 = vpop.permute.xlu1 %2440 }
 0x4b3   : > { %2596 = vperm.xlu1 %3747, %v2117_v32   ;;  %v6456_v32 = vld [vmem:[#allocation2_spill] sm:$0xff] }
 0x4b6   : > { %v5591_v25 = vpop.permute.xlu1 %2446 }
 0x4b7   : > { %2638 = vperm.xlu1 %3747, %v2131_v63   ;;  %v2844_v63 = vrot.slane %v6456_v32, %v6317_v52  ;;  %v2810_v32 = vsel %vm1268_vm0, %v2809_v49, %v2805_v48  ;;  %v3000_v48 = vrot.slane %v5535_v46, %v6317_v52  ;;  %v2941_v46 = vrot.slane %v5408_v20, %v6320_v30 }
 0x4b8   : > { %v2907_v20 = vrot.slane %v5571_v60, %v6438_v62 }
 0x4ba   : > { %v5597_v0 = vpop.permute.xlu1 %2452 }
 0x4bb   : > { %2620 = vperm.xlu1 %3747, %v2125_v29   ;;  %v5628_v29 = vpop.permute.xlu0 %2560 }
 0x4be   : > { %v2459_v39 = vpop.permute.xlu1 %2458 }
 0x4bf   : > { %v2965_v59 = vrot.slane %v2459_v39, %v6316_v16  ;;  %2644 = vperm.xlu1 %3747, %v2133_v56   ;;  %v6457_v56 = vld [vmem:[#allocation19_spill] sm:$0xff]  ;;  %v5670_v49 = vpop.permute.xlu0 %2605 }
 0x4c0   : > { %v2853_v39 = vrot.slane %v6457_v56, %v6318_v42 }
 0x4c1   : > { %v2966_v40 = vsel %vm1268_vm0, %v2965_v59, %v2961_v31  ;;  %v6458_v31 = vld [vmem:[#allocation53_spill] sm:$0xff] }
 0x4c2   : > { %v2465_v18 = vpop.permute.xlu1 %2464  ;;  %v2971_v34 = vsel %vm1275_vm1, %v2970_v43, %v2966_v40  ;;  %v2863_v59 = vrot.slane %v6458_v31, %v6320_v30  ;;  %v2990_v40 = vrot.slane %v5529_v10, %v6442_v27  ;;  %v2848_v43 = vrot.slane %v5539_v1, %v6316_v16  ;;  %v6462_v10 = vld [vmem:[#allocation27_spill] sm:$0xff]  ;;  %v6463_v31 = vld [vmem:[#allocation57_spill] sm:$0xff] }
 0x4c3   : > { %v2975_v19 = vrot.slane %v2465_v18, %v6319_v8  ;;  %v2902_v35 = vrot.slane %v6462_v10, %v6320_v30  ;;  %v2926_v1 = vrot.slane %v5581_v3, %v6316_v16 }
 0x4c4   : > { %v2849_v3 = vsel %vm1268_vm0, %v2848_v43, %v2844_v63  ;;  %v2815_v63 = vsel %vm1275_vm1, %v2814_v11, %v2810_v32  ;;  %v2936_v43 = vrot.slane %v5587_v57, %v6319_v8  ;;  %v3019_v32 = vrot.slane %v5551_v50, %v6320_v30 }
 0x4c5   : > { %v2976_v14 = vsel %vm1282_vm2, %v2975_v19, %v2971_v34  ;;  %v6459_v19 = vld [vmem:[#allocation54_spill] sm:$0xff]  ;;  %v6460_v34 = vld [vmem:[#allocation25_spill] sm:$0xff] }
 0x4c6   : > { %v2471_v55 = vpop.permute.xlu1 %2470  ;;  %v2981_v38 = vsel %vm1289_vm3, %v2980_v15, %v2976_v14  ;;  %v2873_v54 = vrot.slane %v6459_v19, %v6442_v27  ;;  %v2883_v14 = vrot.slane %v6460_v34, %v6317_v52  ;;  %v2887_v15 = vrot.slane %v5559_v41, %v6316_v16 }
 0x4c7   : > { %v2985_v47 = vrot.slane %v2471_v55, %v6438_v62  ;;  %v2819_v41 = vrot.slane %v5523_v61, %v6319_v8  ;;  %v2931_v34 = vrot.slane %v5404_v2, %v6318_v42  ;;  %v3009_v2 = vrot.slane %v5545_v45, %v6318_v42 }
 0x4c8   : > { %v2888_v61 = vsel %vm1268_vm0, %v2887_v15, %v2883_v14  ;;  %v2854_v15 = vsel %vm1275_vm1, %v2853_v39, %v2849_v3  ;;  %v2868_v45 = vrot.slane %v5549_v4, %v6438_v62  ;;  %v2829_v4 = vrot.slane %v5527_v58, %v6438_v62 }
 0x4c9   : > { %v2986_v36 = vsel %vm1296_vm4, %v2985_v47, %v2981_v38  ;;  %v6461_v47 = vld [vmem:[#allocation55_spill] sm:$0xff]  ;;  %v2820_v14 = vsel %vm1282_vm2, %v2819_v41, %v2815_v63  ;;  %v2946_v41 = vrot.slane %v5591_v25, %v6438_v62  ;;  %v2878_v58 = vrot.slane %v5555_v23, %v6444_v53 }
 0x4ca   : > { %v2477_v18 = vpop.permute.xlu1 %2476  ;;  %v2892_v9 = vrot.slane %v6461_v47, %v6318_v42  ;;  %v2991_v38 = vsel %vm1303_vm5, %v2990_v40, %v2986_v36  ;;  %v2858_v36 = vrot.slane %v5543_v13, %v6319_v8  ;;  %v2897_v40 = vrot.slane %v5565_v26, %v6319_v8 }
 0x4cb   : > { %v2995_v55 = vrot.slane %v2477_v18, %v6444_v53  ;;  %v2922_v18 = vrot.slane %v6463_v31, %v6317_v52  ;;  %v3043_v31 = vrot.slane %v5561_v24, %v6316_v16  ;;  %v2825_v60 = vsel %vm1289_vm3, %v2824_v33, %v2820_v14 }
 0x4cc   : > { %v2859_v47 = vsel %vm1282_vm2, %v2858_v36, %v2854_v15  ;;  %v2893_v11 = vsel %vm1275_vm1, %v2892_v9, %v2888_v61  ;;  %v2917_v33 = vrot.slane %v5575_v21, %v6444_v53  ;;  %v2830_v61 = vsel %vm1296_vm4, %v2829_v4, %v2825_v60 }
 0x4cd   : > { %v5659_v56 = vsel %vm1310_vm6, %v2995_v55, %v2991_v38  ;;  %v2927_v13 = vsel %vm1268_vm0, %v2926_v1, %v2922_v18  ;;  %v2898_v57 = vsel %vm1282_vm2, %v2897_v40, %v2893_v11  ;;  %v5707_v18 = vpop.permute.xlu0 %2626  ;;  %v2839_v23 = vrot.slane %v5533_v22, %v6444_v53 }
 0x4ce   : > { %v2483_v6 = vpop.permute.xlu1 %2482  ;;  %v2932_v38 = vsel %vm1275_vm1, %v2931_v34, %v2927_v13  ;;  %v2864_v34 = vsel %vm1289_vm3, %v2863_v59, %v2859_v47  ;;  %v2903_v36 = vsel %vm1289_vm3, %v2902_v35, %v2898_v57  ;;  %v2956_v40 = vrot.slane %v5597_v0, %v6444_v53 }
 0x4cf   : > { %v3004_v55 = vrot.slane %v2483_v6, %v6316_v16  ;;  %v2937_v9 = vsel %vm1282_vm2, %v2936_v43, %v2932_v38  ;;  %v2869_v50 = vsel %vm1296_vm4, %v2868_v45, %v2864_v34  ;;  %v2908_v24 = vsel %vm1296_vm4, %v2907_v20, %v2903_v36 }
 0x4d0   : > { %v2942_v59 = vsel %vm1289_vm3, %v2941_v46, %v2937_v9  ;;  %v2951_v21 = vrot.slane %v5441_v12, %v6442_v27  ;;  %v2874_v63 = vsel %vm1303_vm5, %v2873_v54, %v2869_v50  ;;  %v3121_v22 = vrot.slane %v5567_v5, %v6316_v16 }
 0x4d1   : > { %v3005_v26 = vsel %vm1268_vm0, %v3004_v55, %v3000_v48  ;;  %v2947_v35 = vsel %vm1296_vm4, %v2946_v41, %v2942_v59  ;;  %v6464_v55 = vld [vmem:[#allocation16_spill] sm:$0xff]  ;;  %v2879_v43 = vsel %vm1310_vm6, %v2878_v58, %v2874_v63  ;;  %v2913_v0 = vsel %vm1303_vm5, %v2912_v44, %v2908_v24  ;;  %v2516_v15 = vpop.permute.xlu0 %2515 }
 0x4d2   : > { %v2489_v10 = vpop.permute.xlu1 %2488  ;;  %v3010_v1 = vsel %vm1275_vm1, %v3009_v2, %v3005_v26  ;;  %v2834_v2 = vrot.slane %v6464_v55, %v6442_v27  ;;  %v2918_v12 = vsel %vm1310_vm6, %v2917_v33, %v2913_v0  ;;  %v2952_v19 = vsel %vm1303_vm5, %v2951_v21, %v2947_v35 }
 0x4d3   : > { %v3014_v39 = vrot.slane %v2489_v10, %v6319_v8  ;;  %v3126_v54 = vrot.slane %v5593_v7, %v6318_v42  ;;  %v2957_v5 = vsel %vm1310_vm6, %v2956_v40, %v2952_v19  ;;  %v3131_v44 = vrot.slane %v5628_v29, %v6319_v8 }
 0x4d4   : > { %v2835_v14 = vsel %vm1303_vm5, %v2834_v2, %v2830_v61  ;;  %v3160_v20 = vrot.slane %v5577_v17, %v6316_v16  ;;  %v3204_v33 = vrot.slane %v5670_v49, %v6318_v42  ;;  %v3058_v19 = vrot.slane %v2516_v15, %v6320_v30 }
 0x4d5   : > { %v3015_v3 = vsel %vm1282_vm2, %v3014_v39, %v3010_v1  ;;  %v2840_v47 = vsel %vm1310_vm6, %v2839_v23, %v2835_v14  ;;  %v5763_v29 = vpop.permute.xlu0 %2563 }
 0x4d6   : > { %v2504_v6 = vpop.permute.xlu1 %2503  ;;  %v5716_v25 = vsel %vm1289_vm3, %v3019_v32, %v3015_v3  ;;  %v3273_v11 = vsel %vm1897_vm7, %v2879_v43, %v2840_v47 }
 0x4d7   : > { %v3039_v48 = vrot.slane %v2504_v6, %v6317_v52  ;;  %v3274_v57 = vsel %vm1899_vm8, %v2918_v12, %v3273_v11  ;;  %v3195_v6 = vrot.slane %v5599_v37, %v6317_v52 }
 0x4d8   : > { %v3275_v38 = vsel %vm1901_vm9, %v2957_v5, %v3274_v57 }
 0x4d9   : > { %v3044_v13 = vsel %vm1268_vm0, %v3043_v31, %v3039_v48  ;;  %v3289_v9 = vsel %vm1916_vm10, %v3275_v38, 0.0  ;;  %v5769_v60 = vpop.permute.xlu0 %2608 }
 0x4da   : > { %v2552_v46 = vpop.permute.xlu1 %2551 }
 0x4db   : > { %v3117_v26 = vrot.slane %v2552_v46, %v6317_v52  ;;  %v3053_v46 = vrot.slane %v5609_v28, %v6319_v8 }
 0x4dd   : > { %v3122_v45 = vsel %vm1268_vm0, %v3121_v22, %v3117_v26  ;;  %v2498_v50 = vpop.permute.xlu0 %2497 }
 0x4de   : > { %v3127_v10 = vsel %vm1275_vm1, %v3126_v54, %v3122_v45  ;;  %v2576_v1 = vpop.permute.xlu1 %2575 }
 0x4df   : > { %v3156_v7 = vrot.slane %v2576_v1, %v6317_v52  ;;  %v5761_v39 = vsel %vm1282_vm2, %v3131_v44, %v3127_v10  ;;  %v3029_v10 = vrot.slane %v2498_v50, %v6442_v27 }
 0x4e1   : > { %v3161_v32 = vsel %vm1268_vm0, %v3160_v20, %v3156_v7  ;;  %v2540_v23 = vpop.permute.xlu0 %2539 }
 0x4e2   : > { %v2510_v4 = vpop.permute.xlu1 %2509 }
 0x4e3   : > { %v3048_v41 = vrot.slane %v2510_v4, %v6318_v42  ;;  %3290 = vadd.xlane.f32.xlu1 %v3289_v9 }
 0x4e5   : > { %v3049_v31 = vsel %vm1275_vm1, %v3048_v41, %v3044_v13  ;;  %v5784_v40 = vpop.permute.xlu0 %2590 }
 0x4e6   : > { %v2531_v17 = vpop.permute.xlu1 %2530  ;;  %v3054_v12 = vsel %vm1282_vm2, %v3053_v46, %v3049_v31 }
 0x4e7   : > { %v3059_v44 = vsel %vm1289_vm3, %v3058_v19, %v3054_v12  ;;  %v3082_v31 = vrot.slane %v2531_v17, %v6316_v16  ;;  %v3136_v17 = vrot.slane %v5763_v29, %v6320_v30 }
 0x4e9   : > { %v5788_v21 = vpop.permute.xlu0 %2632  ;;  %v3137_v12 = vsel %vm1289_vm3, %v3136_v17, %v5761_v39  ;;  %v3209_v39 = vrot.slane %v5769_v60, %v6319_v8 }
 0x4ea   : > { %v2582_v34 = vpop.permute.xlu1 %2581 }
 0x4eb   : > { %v3165_v3 = vrot.slane %v2582_v34, %v6318_v42 }
 0x4ed   : > { %v5773_v58 = vsel %vm1275_vm1, %v3165_v3, %v3161_v32  ;;  %v2522_v63 = vpop.permute.xlu0 %2521 }
 0x4ee   : > { %v2603_v36 = vpop.permute.xlu1 %2602  ;;  %v3068_v11 = vrot.slane %v2522_v63, %v6442_v27 }
 0x4ef   : > { %v3199_v24 = vrot.slane %v2603_v36, %v6316_v16  ;;  %v3078_v36 = vrot.slane %v5583_v51, %v6317_v52 }
 0x4f1   : > { %v3200_v59 = vsel %vm1268_vm0, %v3199_v24, %v3195_v6  ;;  %v2570_v49 = vpop.permute.xlu0 %2569  ;;  %v3083_v24 = vsel %vm1268_vm0, %v3082_v31, %v3078_v36 }
 0x4f2   : > { %v5782_v48 = vsel %vm1275_vm1, %v3204_v33, %v3200_v59  ;;  %v2534_v61 = vpop.permute.xlu1 %2533  ;;  %v3146_v46 = vrot.slane %v2570_v49, %v6442_v27 }
 0x4f3   : > { %v3087_v50 = vrot.slane %v2534_v61, %v6318_v42 }
 0x4f5   : > { %v5792_v0 = vpop.permute.xlu0 %2614  ;;  %v3088_v59 = vsel %vm1275_vm1, %v3087_v50, %v3083_v24 }
 0x4f6   : > { %v2585_v35 = vpop.permute.xlu1 %2584 }
 0x4f9   : > { %v2525_v5 = vpop.permute.xlu0 %2524 }
 0x4fa   : > { %v5786_v55 = vpop.permute.xlu1 %2623  ;;  %v3073_v20 = vrot.slane %v2525_v5, %v6444_v53 }
 0x4fd   : > { %v2573_v38 = vpop.permute.xlu0 %2572 }
 0x4fe   : > { %v2495_v2 = vpop.permute.xlu1 %2494 }
 0x4ff   : > { %v3024_v54 = vrot.slane %v2495_v2, %v6438_v62 }
 0x501   : > { %v3025_v28 = vsel %vm1296_vm4, %v3024_v54, %v5716_v25  ;;  %v5818_v3 = vpop.permute.xlu0 %2617 }
 0x502   : > { %v2537_v37 = vpop.permute.xlu1 %2536  ;;  %v3030_v7 = vsel %vm1303_vm5, %v3029_v10, %v3025_v28  ;;  %v3224_v31 = vrot.slane %v5818_v3, %v6442_v27 }
 0x503   : > { %v3092_v6 = vrot.slane %v2537_v37, %v6319_v8  ;;  %v3097_v37 = vrot.slane %v2540_v23, %v6320_v30 }
 0x505   : > { %v3093_v63 = vsel %vm1282_vm2, %v3092_v6, %v3088_v59 }
 0x506   : > { %v2588_v13 = vpop.permute.xlu1 %2587 }
 0x507   : > { %v3175_v61 = vrot.slane %v2588_v13, %v6320_v30 }
 0x50a   : > { %v5790_v22 = vpop.permute.xlu1 %2629 }
 0x50e   : > { %v2519_v43 = vpop.permute.xlu1 %2518 }
 0x50f   : > { %v3063_v26 = vrot.slane %v2519_v43, %v6438_v62  ;;  %v2549_v43 = vpop.permute.xlu0 %2548 }
 0x510   : > { %v3112_v19 = vrot.slane %v2549_v43, %v6444_v53 }
 0x511   : > { %v3064_v45 = vsel %vm1296_vm4, %v3063_v26, %v3059_v44  ;;  %v3098_v26 = vsel %vm1289_vm3, %v3097_v37, %v3093_v63  ;;  %v3151_v44 = vrot.slane %v2573_v38, %v6444_v53  ;;  %v3210_v38 = vsel %vm1282_vm2, %v3209_v39, %v5782_v48 }
 0x512   : > { %v2567_v14 = vpop.permute.xlu1 %2566  ;;  %v3069_v57 = vsel %vm1303_vm5, %v3068_v11, %v3064_v45  ;;  %v3248_v48 = vrot.slane %v5788_v21, %v6319_v8 }
 0x513   : > { %v3074_v9 = vsel %vm1310_vm6, %v3073_v20, %v3069_v57  ;;  %v3141_v2 = vrot.slane %v2567_v14, %v6438_v62  ;;  %v2642_v50 = vpop.permute.xlu0 %2641 }
 0x514   : > { %v3263_v21 = vrot.slane %v2642_v50, %v6442_v27 }
 0x515   : > { %v3142_v29 = vsel %vm1296_vm4, %v3141_v2, %v3137_v12 }
 0x516   : > { %v5800_v47 = vpop.permute.xlu1 %2611  ;;  %v3147_v45 = vsel %vm1303_vm5, %v3146_v46, %v3142_v29  ;;  %v6466_v29 = vld [vmem:[#allocation3_spill] sm:$0xff] }
 0x517   : > { %v3214_v11 = vrot.slane %v5800_v47, %v6320_v30  ;;  %v3238_v47 = vrot.slane %v5707_v18, %v6316_v16  ;;  %v3288_v63 = vpop.xlane.xlu0 %3287 }
 0x51a   : > { %v2501_v1 = vpop.permute.xlu1 %2500 }
 0x51b   : > { %v3034_v15 = vrot.slane %v2501_v1, %v6444_v53  ;;  %v3234_v1 = vrot.slane %v5786_v55, %v6317_v52  ;;  %v3152_v55 = vsel %vm1310_vm6, %v3151_v44, %v3147_v45 }
 0x51d   : > { %v3035_v32 = vsel %vm1310_vm6, %v3034_v15, %v3030_v7  ;;  %v3243_v15 = vrot.slane %v5790_v22, %v6318_v42  ;;  %v3219_v22 = vrot.slane %v5792_v0, %v6438_v62 }
 0x51e   : > { %v2543_v4 = vpop.permute.xlu1 %2542  ;;  %v3276_v25 = vsel %vm1897_vm7, %v3035_v32, %v5659_v56  ;;  %v3170_v56 = vrot.slane %v2585_v35, %v6319_v8  ;;  %v3215_v32 = vsel %vm1289_vm3, %v3214_v11, %v3210_v38  ;;  %v5916_v38 = vld [vmem:[%s6082_s1 + $0x8] ss:$0 sm:$0xff] }
 0x51f   : > { %v3277_v41 = vsel %vm1899_vm8, %v3074_v9, %v3276_v25  ;;  %v3102_v51 = vrot.slane %v2543_v4, %v6438_v62  ;;  %v3239_v9 = vsel %vm1268_vm0, %v3238_v47, %v3234_v1  ;;  %v3220_v25 = vsel %vm1296_vm4, %v3219_v22, %v3215_v32 }
 0x520   : > { %v3171_v14 = vsel %vm1282_vm2, %v3170_v56, %v5773_v58  ;;  %v3180_v58 = vrot.slane %v5784_v40, %v6438_v62  ;;  %v3244_v16 = vsel %vm1275_vm1, %v3243_v15, %v3239_v9 }
 0x521   : > { %v3176_v23 = vsel %vm1289_vm3, %v3175_v61, %v3171_v14  ;;  %v3103_v54 = vsel %vm1296_vm4, %v3102_v51, %v3098_v26  ;;  %v3249_v0 = vsel %vm1282_vm2, %v3248_v48, %v3244_v16  ;;  %v6465_v61 = vld [vmem:[#allocation4_spill] sm:$0xff]  ;;  %v5903_v14 = vld [vmem:[%s6082_s1 + $0x4] sm:$0xf] }
 0x522   : > { %v2594_v34 = vpop.permute.xlu1 %2593  ;;  %v3181_v60 = vsel %vm1296_vm4, %v3180_v58, %v3176_v23  ;;  %v3298_v51 = vadd.f32 %v3288_v63, %v6465_v61  ;;  %v1966_v26 = vmul.f32 %v6466_v29, %v5903_v14  ;;  %v6470_v29 = vld [vmem:[#allocation23_spill] sm:$0xff] }
 0x523   : > { %v3185_v49 = vrot.slane %v2594_v34, %v6442_v27 }
 0x524   : > { %v3302_v37 = vmax.f32 %v3298_v51, 0.0 }
 0x525   : > { %v3186_v20 = vsel %vm1303_vm5, %v3185_v49, %v3181_v60 }
 0x526   : > { %v2636_v33 = vpop.permute.xlu1 %2635 }
 0x527   : > { %v3253_v18 = vrot.slane %v2636_v33, %v6320_v30  ;;  %v3225_v30 = vsel %vm1303_vm5, %v3224_v31, %v3220_v25 }
 0x529   : > { %v3254_v6 = vsel %vm1289_vm3, %v3253_v18, %v3249_v0 }
 0x52a   : > { %v2546_v35 = vpop.permute.xlu1 %2545 }
 0x52b   : > { %v3107_v13 = vrot.slane %v2546_v35, %v6442_v27 }
 0x52d   : > { %v3108_v5 = vsel %vm1303_vm5, %v3107_v13, %v3103_v54  ;;  %v1970_v13 = vsel %vm1916_vm10, %v1966_v26, 0.0  ;;  %v1969_v26 = vmul.f32 %v6470_v29, %v5903_v14 }
 0x52e   : > { %v2597_v28 = vpop.permute.xlu1 %2596  ;;  %v3113_v10 = vsel %vm1310_vm6, %v3112_v19, %v3108_v5  ;;  %v1971_v19 = vrot.slane %v1970_v13, 4 }
 0x52f   : > { %v3190_v57 = vrot.slane %v2597_v28, %v6444_v53  ;;  %v3278_v40 = vsel %vm1901_vm9, %v3113_v10, %v3277_v41 }
 0x530   : > { %v3292_v7 = vsel %vm1916_vm10, %v3278_v40, 0.0  ;;  %v1972_v39 = vadd.f32 %v1971_v19, %v1970_v13  ;;  %v6467_v40 = vld [vmem:[#allocation18_spill] sm:$0xff] }
 0x531   : > { %v3191_v52 = vsel %vm1310_vm6, %v3190_v57, %v3186_v20  ;;  %3293 = vadd.xlane.f32.xlu0 %v3292_v7  ;;  %v1967_v15 = vmul.f32 %v6467_v40, %v5903_v14 }
 0x532   : > { %v2639_v4 = vpop.permute.xlu1 %2638  ;;  %v3279_v42 = vsel %vm1897_vm7, %v3191_v52, %v3152_v55  ;;  %v1973_v58 = vrot.slane %v1972_v39, 2 }
 0x533   : > { %v3258_v41 = vrot.slane %v2639_v4, %v6438_v62  ;;  %v1977_v52 = vsel %vm1916_vm10, %v1967_v15, 0.0 }
 0x534   : > { %v1974_v11 = vadd.f32 %v1973_v58, %v1972_v39 }
 0x535   : > { %v3259_v24 = vsel %vm1296_vm4, %v3258_v41, %v3254_v6 }
 0x536   : > { %v2621_v34 = vpop.permute.xlu1 %2620  ;;  %v3264_v59 = vsel %vm1303_vm5, %v3263_v21, %v3259_v24  ;;  %v1975_v1 = vrot.slane %v1974_v11, 1 }
 0x537   : > { %v3229_v36 = vrot.slane %v2621_v34, %v6444_v53 }
 0x538   : > { %v1976_v20 = vadd.f32 %v1975_v1, %v1974_v11 }
 0x539   : > { %v3230_v8 = vsel %vm1310_vm6, %v3229_v36, %v3225_v30 }
 0x53a   : > { %v2645_v62 = vpop.permute.xlu1 %2644  ;;  %v3280_v33 = vsel %vm1899_vm8, %v3230_v8, %v3279_v42  ;;  %v2002_v55 = vadd.f32 %v5916_v38, %v1976_v20  ;;  %v1978_v42 = vrot.slane %v1977_v52, 4 }
 0x53b   : > { %v3268_v3 = vrot.slane %v2645_v62, %v6444_v53 }
 0x53c   : > { %v1979_v9 = vadd.f32 %v1978_v42, %v1977_v52 }
 0x53d   : > { %v3269_v56 = vsel %vm1310_vm6, %v3268_v3, %v3264_v59 }
 0x53e   : > { %v3281_v2 = vsel %vm1901_vm9, %v3269_v56, %v3280_v33  ;;  %v1980_v16 = vrot.slane %v1979_v9, 2 }
 0x53f   : > { %v3295_v17 = vsel %vm1916_vm10, %v3281_v2, 0.0  ;;  %v6468_v2 = vld [vmem:[#allocation11_spill] sm:$0xff] }
 0x540   : > { %3296 = vadd.xlane.f32.xlu0 %v3295_v17  ;;  %v1981_v41 = vadd.f32 %v1980_v16, %v1979_v9 }
 0x542   : > { %v1982_v0 = vrot.slane %v1981_v41, 1 }
 0x544   : > { %v1983_v24 = vadd.f32 %v1982_v0, %v1981_v41 }
 0x546   : > { %v2003_v62 = vadd.f32 %v5916_v38, %v1983_v24 }
 0x556   : > { %3308 = vperm.xlu0 %3746, %v3302_v37  }
 0x56c   : > { %v3291_v27 = vpop.xlane.xlu1 %3290 }
 0x56d   : > { %v3299_v43 = vadd.f32 %v3291_v27, %v6465_v61  ;;  %v6469_v27 = vld [vmem:[#allocation21_spill] sm:$0xff] }
 0x56f   : > { %v3303_v46 = vmax.f32 %v3299_v43, 0.0  ;;  %v1968_v43 = vmul.f32 %v6469_v27, %v5903_v14 }
 0x571   : > { %3313 = vperm.xlu1 %3747, %v3303_v46   ;;  %v1984_v46 = vsel %vm1916_vm10, %v1968_v43, 0.0  ;;  %v3768_v43 = vld [vmem:[%s3868_s15 + $0x30] sm:$0xff] }
 0x5ba   : > { %v3294_v53 = vpop.xlane.xlu0 %3293 }
 0x5bb   : > { %v3300_v12 = vadd.f32 %v3294_v53, %v6465_v61  ;;  %v1985_v53 = vrot.slane %v1984_v46, 4 }
 0x5bd   : > { %v3304_v35 = vmax.f32 %v3300_v12, 0.0  ;;  %v1986_v12 = vadd.f32 %v1985_v53, %v1984_v46  ;;  %v3769_v53 = vld [vmem:[%s3868_s15 + $0x38] sm:$0xff] }
 0x5bf   : > { %3318 = vperm.xlu1 %3747, %v3304_v35   ;;  %v1987_v35 = vrot.slane %v1986_v12, 2 }
 0x5c9   : > { %v3297_v23 = vpop.xlane.xlu0 %3296 }
 0x5ca   : > { %v3301_v54 = vadd.f32 %v3297_v23, %v6465_v61 }
 0x5cc   : > { %v3305_v49 = vmax.f32 %v3301_v54, 0.0  ;;  %v1988_v54 = vadd.f32 %v1987_v35, %v1986_v12  ;;  %v3770_v35 = vld [vmem:[%s3868_s15 + $0x20] sm:$0xff] }
 0x5ce   : > { %3323 = vperm.xlu1 %3747, %v3305_v49   ;;  %v1991_v49 = vsel %vm1916_vm10, %v1969_v26, 0.0  ;;  %v3771_v26 = vld [vmem:[%s3868_s15 + $0x28] sm:$0xff] }
 0x5d1   : > { %v3309_v5 = vpop.permute.xlu0 %3308 }
 0x5d2   : > { %v3326_v44 = vmul.f32 %v3309_v5, %v5903_v14  ;;  %v1992_v5 = vrot.slane %v1991_v49, 4 }
 0x5d4   : > { %v3330_v45 = vsel %vm1916_vm10, %v3326_v44, 0.0  ;;  %v1989_v44 = vrot.slane %v1988_v54, 1 }
 0x5d5   : > { %v3331_v28 = vrot.slane %v3330_v45, 4 }
 0x5d7   : > { %v3332_v10 = vadd.f32 %v3331_v28, %v3330_v45  ;;  %v1993_v28 = vadd.f32 %v1992_v5, %v1991_v49  ;;  %v3773_v49 = vld [vmem:[%s3868_s15 + $0x58] sm:$0xff] }
 0x5d9   : > { %v3333_v60 = vrot.slane %v3332_v10, 2 }
 0x5db   : > { %v3334_v57 = vadd.f32 %v3333_v60, %v3332_v10  ;;  %v1990_v10 = vadd.f32 %v1989_v44, %v1988_v54  ;;  %v3775_v44 = vld [vmem:[%s3868_s15 + $0x48] sm:$0xff] }
 0x5dd   : > { %v3335_v7 = vrot.slane %v3334_v57, 1  ;;  %v2004_v15 = vadd.f32 %v5916_v38, %v1990_v10  ;;  %v3776_v10 = vld [vmem:[%s3868_s15 + $0x70] sm:$0xff] }
 0x5df   : > { %v3336_v47 = vadd.f32 %v3335_v7, %v3334_v57  ;;  %v1994_v57 = vrot.slane %v1993_v28, 2 }
 0x5e1   : > { %v3358_v32 = vadd.f32 %v5916_v38, %v3336_v47 }
 0x5e3   : > { %v3362_v4 = vadd.f32 %v3358_v32, %v2002_v55  ;;  %v1995_v55 = vadd.f32 %v1994_v57, %v1993_v28 }
 0x5e5   : > { %v3729_v22 = vmul.f32 -1.442695, %v3362_v4 }
 0x5e7   : > { %3748 = vpow2.f32 %v3729_v22  ;;  %v1996_v22 = vrot.slane %v1995_v55, 1 }
 0x5ec   : > { %v3314_v18 = vpop.permute.xlu1 %3313 }
 0x5ed   : > { %v3327_v48 = vmul.f32 %v3314_v18, %v5903_v14  ;;  %v1997_v18 = vadd.f32 %v1996_v22, %v1995_v55  ;;  %v3780_v55 = vld [vmem:[%s3868_s15 + $0x90] sm:$0xff]  ;;  %v3782_v22 = vld [vmem:[%s3868_s15 + $0x80] sm:$0xff] }
 0x5ef   : > { %v3337_v25 = vsel %vm1916_vm10, %v3327_v48, 0.0  ;;  %v2005_v41 = vadd.f32 %v5916_v38, %v1997_v18 }
 0x5f0   : > { %v3338_v31 = vrot.slane %v3337_v25, 4 }
 0x5f2   : > { %v3339_v34 = vadd.f32 %v3338_v31, %v3337_v25 }
 0x5f4   : > { %v3749_v50 = vpop.eup %3748  ;;  %v3340_v36 = vrot.slane %v3339_v34, 2 }
 0x5f5   : > { %v3378_v6 = vadd.f32 1.0, %v3749_v50 }
 0x5f6   : > { %v3341_v30 = vadd.f32 %v3340_v36, %v3339_v34 }
 0x5f7   : > { %3750 = vrcp.f32 %v3378_v6 }
 0x5f8   : > { %v3342_v8 = vrot.slane %v3341_v30, 1 }
 0x5fa   : > { %v3343_v21 = vadd.f32 %v3342_v8, %v3341_v30 }
 0x5fc   : > { %v3359_v33 = vadd.f32 %v5916_v38, %v3343_v21  ;;  %v3764_v21 = vld [vmem:[%s3868_s15 + $0x10] sm:$0xff] }
 0x5fe   : > { %v3363_v3 = vadd.f32 %v3359_v33, %v2003_v62  ;;  %v3765_v33 = vld [vmem:[%s3868_s15 + $0x18] sm:$0xff] }
 0x600   : > { %v3730_v59 = vmul.f32 -1.442695, %v3363_v3 }
 0x602   : > { %3752 = vpow2.f32 %v3730_v59  ;;  %v3766_v59 = vld [vmem:[%s3868_s15] sm:$0xff] }
 0x604   : > { %v3751_v56 = vpop.eup %3750 }
 0x605   : > { %v3393_v17 = vrot.slane %v3751_v56, %v6468_v2 }
 0x607   : > { %3399 = vbcast.lane.b32.xlu1 %v3393_v17, 264  ;;  %3395 = vbcast.lane.b32.xlu0 %v3393_v17, 256 }
 0x60b   : > { %3407 = vbcast.lane.b32.xlu1 %v3393_v17, 280  ;;  %3403 = vbcast.lane.b32.xlu0 %v3393_v17, 272 }
 0x60f   : > { %v3753_v63 = vpop.eup %3752  ;;  %3415 = vbcast.lane.b32.xlu1 %v3393_v17, 296  ;;  %3411 = vbcast.lane.b32.xlu0 %v3393_v17, 288 }
 0x610   : > { %v3379_v61 = vadd.f32 1.0, %v3753_v63 }
 0x612   : > { %3754 = vrcp.f32 %v3379_v61 }
 0x613   : > { %3423 = vbcast.lane.b32.xlu1 %v3393_v17, 312  ;;  %3419 = vbcast.lane.b32.xlu0 %v3393_v17, 304  ;;  %v3767_v17 = vld [vmem:[%s3868_s15 + $0x8] sm:$0xff] }
 0x61f   : > { %v3755_v51 = vpop.eup %3754 }
 0x620   : > { %v3428_v37 = vrot.slane %v3755_v51, %v6468_v2 }
 0x622   : > { %3434 = vbcast.lane.b32.xlu1 %v3428_v37, 264  ;;  %3430 = vbcast.lane.b32.xlu0 %v3428_v37, 256 }
 0x626   : > { %3442 = vbcast.lane.b32.xlu1 %v3428_v37, 280  ;;  %3438 = vbcast.lane.b32.xlu0 %v3428_v37, 272 }
 0x62a   : > { %3450 = vbcast.lane.b32.xlu1 %v3428_v37, 296  ;;  %3446 = vbcast.lane.b32.xlu0 %v3428_v37, 288 }
 0x62e   : > { %3458 = vbcast.lane.b32.xlu1 %v3428_v37, 312  ;;  %3454 = vbcast.lane.b32.xlu0 %v3428_v37, 304 }
 0x63a   : > { %v3319_v13 = vpop.permute.xlu1 %3318 }
 0x63b   : > { %v3328_v19 = vmul.f32 %v3319_v13, %v5903_v14 }
 0x63d   : > { %v3344_v23 = vsel %vm1916_vm10, %v3328_v19, 0.0 }
 0x63e   : > { %v3345_v39 = vrot.slane %v3344_v23, 4 }
 0x640   : > { %v3346_v58 = vadd.f32 %v3345_v39, %v3344_v23  ;;  %v3772_v23 = vld [vmem:[%s3868_s15 + $0x50] sm:$0xff] }
 0x642   : > { %v3347_v45 = vrot.slane %v3346_v58, 2 }
 0x644   : > { %v3348_v11 = vadd.f32 %v3347_v45, %v3346_v58  ;;  %v3774_v58 = vld [vmem:[%s3868_s15 + $0x40] sm:$0xff] }
 0x646   : > { %v3349_v1 = vrot.slane %v3348_v11, 1 }
 0x648   : > { %v3350_v60 = vadd.f32 %v3349_v1, %v3348_v11 }
 0x649   : > { %v3324_v40 = vpop.permute.xlu1 %3323 }
 0x64a   : > { %v3360_v20 = vadd.f32 %v5916_v38, %v3350_v60  ;;  %v3329_v7 = vmul.f32 %v3324_v40, %v5903_v14  ;;  %v3777_v60 = vld [vmem:[%s3868_s15 + $0x78] sm:$0xff]  ;;  %v3778_v40 = vld [vmem:[%s3868_s15 + $0x60] sm:$0xff] }
 0x64c   : > { %v3364_v47 = vadd.f32 %v3360_v20, %v2004_v15  ;;  %v3351_v52 = vsel %vm1916_vm10, %v3329_v7, 0.0  ;;  %v3779_v20 = vld [vmem:[%s3868_s15 + $0x68] sm:$0xff] }
 0x64d   : > { %v3352_v32 = vrot.slane %v3351_v52, 4 }
 0x64e   : > { %v3731_v4 = vmul.f32 -1.442695, %v3364_v47 }
 0x64f   : > { %v3353_v42 = vadd.f32 %v3352_v32, %v3351_v52 }
 0x650   : > { %3756 = vpow2.f32 %v3731_v4  ;;  %v3781_v4 = vld [vmem:[%s3868_s15 + $0x98] sm:$0xff] }
 0x651   : > { %v3354_v9 = vrot.slane %v3353_v42, 2 }
 0x653   : > { %v3355_v16 = vadd.f32 %v3354_v9, %v3353_v42 }
 0x655   : > { %v3356_v48 = vrot.slane %v3355_v16, 1 }
 0x657   : > { %v3357_v25 = vadd.f32 %v3356_v48, %v3355_v16  ;;  %v3783_v16 = vld [vmem:[%s3868_s15 + $0x88] sm:$0xff] }
 0x659   : > { %v3361_v31 = vadd.f32 %v5916_v38, %v3357_v25 }
 0x65b   : > { %v3365_v34 = vadd.f32 %v3361_v31, %v2005_v41  ;;  %v3784_v41 = vld [vmem:[%s3868_s15 + $0xb0] sm:$0xff] }
 0x65d   : > { %v3757_v14 = vpop.eup %3756  ;;  %v3732_v50 = vmul.f32 -1.442695, %v3365_v34  ;;  %v3785_v34 = vld [vmem:[%s3868_s15 + $0xb8] sm:$0xff] }
 0x65e   : > { %v3380_v0 = vadd.f32 1.0, %v3757_v14 }
 0x65f   : > { %3758 = vpow2.f32 %v3732_v50  ;;  %v3786_v50 = vld [vmem:[%s3868_s15 + $0xa0] sm:$0xff] }
 0x660   : > { %3760 = vrcp.f32 %v3380_v0 }
 0x66c   : > { %v3759_v36 = vpop.eup %3758 }
 0x66d   : > { %v3761_v6 = vpop.eup %3760  ;;  %v3381_v30 = vadd.f32 1.0, %v3759_v36  ;;  %v3787_v36 = vld [vmem:[%s3868_s15 + $0xa8] sm:$0xff] }
 0x66e   : > { %v3463_v24 = vrot.slane %v3761_v6, %v6468_v2 }
 0x66f   : > { %3762 = vrcp.f32 %v3381_v30 }
 0x670   : > { %3469 = vbcast.lane.b32.xlu1 %v3463_v24, 264  ;;  %3465 = vbcast.lane.b32.xlu0 %v3463_v24, 256 }
 0x674   : > { %3477 = vbcast.lane.b32.xlu1 %v3463_v24, 280  ;;  %3473 = vbcast.lane.b32.xlu0 %v3463_v24, 272 }
 0x678   : > { %3485 = vbcast.lane.b32.xlu1 %v3463_v24, 296  ;;  %3481 = vbcast.lane.b32.xlu0 %v3463_v24, 288 }
 0x679   : > { %v3400_v38 = vpop.permute.xlu1 %3399  ;;  %v3396_v8 = vpop.permute.xlu0 %3395 }
 0x67a   : > { %v3532_v62 = vmul.f32 %v3764_v21, %v3400_v38  ;;  %v3533_v3 = vmul.f32 %v3765_v33, %v3400_v38  ;;  %v3530_v56 = vmul.f32 %v3766_v59, %v3396_v8  ;;  %v3531_v63 = vmul.f32 %v3767_v17, %v3396_v8  ;;  %v3788_v38 = vld [vmem:[%s3868_s15 + $0xd0] sm:$0xff]  ;;  %v3789_v21 = vld [vmem:[%s3868_s15 + $0xd8] sm:$0xff]  ;;  %v3790_v33 = vld [vmem:[%s3868_s15 + $0xc0] sm:$0xff] }
 0x67b   : > { %v3791_v59 = vld [vmem:[%s3868_s15 + $0xc8] sm:$0xff] }
 0x67c   : > { %v3763_v61 = vpop.eup %3762  ;;  %3596 = vst [vmem:[%s5947_s26 + $0x10] sm:$0xff] %v3532_v62  ;;  %3597 = vst [vmem:[%s5947_s26 + $0x18] sm:$0xff] %v3533_v3  ;;  %3493 = vbcast.lane.b32.xlu1 %v3463_v24, 312  ;;  %3489 = vbcast.lane.b32.xlu0 %v3463_v24, 304 }
 0x67d   : > { %3594 = vst [vmem:[%s5947_s26] sm:$0xff] %v3530_v56  ;;  %3595 = vst [vmem:[%s5947_s26 + $0x8] sm:$0xff] %v3531_v63  ;;  %v3498_v51 = vrot.slane %v3763_v61, %v6468_v2  ;;  %v3408_v37 = vpop.permute.xlu1 %3407  ;;  %v3404_v27 = vpop.permute.xlu0 %3403  ;;  %v3792_v61 = vld [vmem:[%s3868_s15 + $0xf0] sm:$0xff] }
 0x67e   : > { %v3536_v46 = vmul.f32 %v3768_v43, %v3408_v37  ;;  %v3537_v12 = vmul.f32 %v3769_v53, %v3408_v37  ;;  %v3534_v29 = vmul.f32 %v3770_v35, %v3404_v27  ;;  %v3535_v13 = vmul.f32 %v3771_v26, %v3404_v27  ;;  %v3793_v37 = vld [vmem:[%s3868_s15 + $0xf8] sm:$0xff]  ;;  %v3794_v43 = vld [vmem:[%s3868_s15 + $0xe0] sm:$0xff]  ;;  %v3795_v53 = vld [vmem:[%s3868_s15 + $0xe8] sm:$0xff] }
 0x67f   : > { %v3796_v26 = vld [vmem:[%s3868_s15 + $0x110] sm:$0xff] }
 0x680   : > { %3600 = vst [vmem:[%s5947_s26 + $0x30] sm:$0xff] %v3536_v46  ;;  %3601 = vst [vmem:[%s5947_s26 + $0x38] sm:$0xff] %v3537_v12  ;;  %3504 = vbcast.lane.b32.xlu1 %v3498_v51, 264  ;;  %3500 = vbcast.lane.b32.xlu0 %v3498_v51, 256 }
 0x681   : > { %3598 = vst [vmem:[%s5947_s26 + $0x20] sm:$0xff] %v3534_v29  ;;  %3599 = vst [vmem:[%s5947_s26 + $0x28] sm:$0xff] %v3535_v13  ;;  %v3416_v2 = vpop.permute.xlu1 %3415  ;;  %v3412_v19 = vpop.permute.xlu0 %3411 }
 0x682   : > { %v3540_v54 = vmul.f32 %v3772_v23, %v3416_v2  ;;  %v3541_v39 = vmul.f32 %v3773_v49, %v3416_v2  ;;  %v3538_v5 = vmul.f32 %v3774_v58, %v3412_v19  ;;  %v3539_v45 = vmul.f32 %v3775_v44, %v3412_v19  ;;  %v3797_v2 = vld [vmem:[%s3868_s15 + $0x118] sm:$0xff]  ;;  %v3798_v23 = vld [vmem:[%s3868_s15 + $0x100] sm:$0xff]  ;;  %v3799_v49 = vld [vmem:[%s3868_s15 + $0x108] sm:$0xff] }
 0x683   : > { %v3800_v44 = vld [vmem:[%s3868_s15 + $0x130] sm:$0xff] }
 0x684   : > { %3604 = vst [vmem:[%s5947_s26 + $0x50] sm:$0xff] %v3540_v54  ;;  %3605 = vst [vmem:[%s5947_s26 + $0x58] sm:$0xff] %v3541_v39  ;;  %3512 = vbcast.lane.b32.xlu1 %v3498_v51, 280  ;;  %3508 = vbcast.lane.b32.xlu0 %v3498_v51, 272 }
 0x685   : > { %3602 = vst [vmem:[%s5947_s26 + $0x40] sm:$0xff] %v3538_v5  ;;  %3603 = vst [vmem:[%s5947_s26 + $0x48] sm:$0xff] %v3539_v45  ;;  %v3424_v11 = vpop.permute.xlu1 %3423  ;;  %v3420_v28 = vpop.permute.xlu0 %3419 }
 0x686   : > { %v3544_v1 = vmul.f32 %v3776_v10, %v3424_v11  ;;  %v3545_v57 = vmul.f32 %v3777_v60, %v3424_v11  ;;  %v3542_v15 = vmul.f32 %v3778_v40, %v3420_v28  ;;  %v3543_v7 = vmul.f32 %v3779_v20, %v3420_v28  ;;  %v3801_v11 = vld [vmem:[%s3868_s15 + $0x138] sm:$0xff]  ;;  %v3802_v10 = vld [vmem:[%s3868_s15 + $0x120] sm:$0xff]  ;;  %v3803_v60 = vld [vmem:[%s3868_s15 + $0x128] sm:$0xff] }
 0x687   : > { %v3804_v20 = vld [vmem:[%s3868_s15 + $0x150] sm:$0xff] }
 0x688   : > { %3608 = vst [vmem:[%s5947_s26 + $0x70] sm:$0xff] %v3544_v1  ;;  %3609 = vst [vmem:[%s5947_s26 + $0x78] sm:$0xff] %v3545_v57  ;;  %3520 = vbcast.lane.b32.xlu1 %v3498_v51, 296  ;;  %3516 = vbcast.lane.b32.xlu0 %v3498_v51, 288 }
 0x689   : > { %3606 = vst [vmem:[%s5947_s26 + $0x60] sm:$0xff] %v3542_v15  ;;  %3607 = vst [vmem:[%s5947_s26 + $0x68] sm:$0xff] %v3543_v7 }
 0x68c   : > { %3528 = vbcast.lane.b32.xlu1 %v3498_v51, 312  ;;  %3524 = vbcast.lane.b32.xlu0 %v3498_v51, 304 }
 0x694   : > { %v3435_v47 = vpop.permute.xlu1 %3434  ;;  %v3431_v52 = vpop.permute.xlu0 %3430 }
 0x695   : > { %v3548_v32 = vmul.f32 %v3780_v55, %v3435_v47  ;;  %v3549_v42 = vmul.f32 %v3781_v4, %v3435_v47  ;;  %v3546_v9 = vmul.f32 %v3782_v22, %v3431_v52  ;;  %v3547_v18 = vmul.f32 %v3783_v16, %v3431_v52  ;;  %v3805_v47 = vld [vmem:[%s3868_s15 + $0x158] sm:$0xff]  ;;  %v3806_v55 = vld [vmem:[%s3868_s15 + $0x140] sm:$0xff]  ;;  %v3807_v4 = vld [vmem:[%s3868_s15 + $0x148] sm:$0xff] }
 0x696   : > { %v3808_v16 = vld [vmem:[%s3868_s15 + $0x170] sm:$0xff] }
 0x697   : > { %3612 = vst [vmem:[%s5947_s26 + $0x90] sm:$0xff] %v3548_v32  ;;  %3613 = vst [vmem:[%s5947_s26 + $0x98] sm:$0xff] %v3549_v42 }
 0x698   : > { %3610 = vst [vmem:[%s5947_s26 + $0x80] sm:$0xff] %v3546_v9  ;;  %3611 = vst [vmem:[%s5947_s26 + $0x88] sm:$0xff] %v3547_v18  ;;  %v3443_v48 = vpop.permute.xlu1 %3442  ;;  %v3439_v25 = vpop.permute.xlu0 %3438 }
 0x699   : > { %v3552_v31 = vmul.f32 %v3784_v41, %v3443_v48  ;;  %v3553_v14 = vmul.f32 %v3785_v34, %v3443_v48  ;;  %v3550_v0 = vmul.f32 %v3786_v50, %v3439_v25  ;;  %v3551_v6 = vmul.f32 %v3787_v36, %v3439_v25  ;;  %v3809_v48 = vld [vmem:[%s3868_s15 + $0x178] sm:$0xff]  ;;  %v3810_v41 = vld [vmem:[%s3868_s15 + $0x160] sm:$0xff]  ;;  %v3811_v34 = vld [vmem:[%s3868_s15 + $0x168] sm:$0xff] }
 0x69a   : > { %v3812_v36 = vld [vmem:[%s3868_s15 + $0x190] sm:$0xff] }
 0x69b   : > { %3616 = vst [vmem:[%s5947_s26 + $0xb0] sm:$0xff] %v3552_v31  ;;  %3617 = vst [vmem:[%s5947_s26 + $0xb8] sm:$0xff] %v3553_v14 }
 0x69c   : > { %3614 = vst [vmem:[%s5947_s26 + $0xa0] sm:$0xff] %v3550_v0  ;;  %3615 = vst [vmem:[%s5947_s26 + $0xa8] sm:$0xff] %v3551_v6  ;;  %v3451_v30 = vpop.permute.xlu1 %3450  ;;  %v3447_v24 = vpop.permute.xlu0 %3446 }
 0x69d   : > { %v3556_v8 = vmul.f32 %v3788_v38, %v3451_v30  ;;  %v3557_v62 = vmul.f32 %v3789_v21, %v3451_v30  ;;  %v3554_v3 = vmul.f32 %v3790_v33, %v3447_v24  ;;  %v3555_v56 = vmul.f32 %v3791_v59, %v3447_v24  ;;  %v3813_v30 = vld [vmem:[%s3868_s15 + $0x198] sm:$0xff]  ;;  %v3814_v38 = vld [vmem:[%s3868_s15 + $0x180] sm:$0xff]  ;;  %v3815_v21 = vld [vmem:[%s3868_s15 + $0x188] sm:$0xff] }
 0x69e   : > { %v3816_v59 = vld [vmem:[%s3868_s15 + $0x1b0] sm:$0xff] }
 0x69f   : > { %3620 = vst [vmem:[%s5947_s26 + $0xd0] sm:$0xff] %v3556_v8  ;;  %3621 = vst [vmem:[%s5947_s26 + $0xd8] sm:$0xff] %v3557_v62 }
 0x6a0   : > { %3618 = vst [vmem:[%s5947_s26 + $0xc0] sm:$0xff] %v3554_v3  ;;  %3619 = vst [vmem:[%s5947_s26 + $0xc8] sm:$0xff] %v3555_v56  ;;  %v3459_v17 = vpop.permute.xlu1 %3458  ;;  %v3455_v63 = vpop.permute.xlu0 %3454 }
 0x6a1   : > { %v3560_v51 = vmul.f32 %v3792_v61, %v3459_v17  ;;  %v3561_v27 = vmul.f32 %v3793_v37, %v3459_v17  ;;  %v3558_v46 = vmul.f32 %v3794_v43, %v3455_v63  ;;  %v3559_v12 = vmul.f32 %v3795_v53, %v3455_v63  ;;  %v3817_v17 = vld [vmem:[%s3868_s15 + $0x1b8] sm:$0xff]  ;;  %v3818_v61 = vld [vmem:[%s3868_s15 + $0x1a0] sm:$0xff]  ;;  %v3819_v37 = vld [vmem:[%s3868_s15 + $0x1a8] sm:$0xff] }
 0x6a2   : > { %v3820_v53 = vld [vmem:[%s3868_s15 + $0x1d0] sm:$0xff] }
 0x6a3   : > { %3624 = vst [vmem:[%s5947_s26 + $0xf0] sm:$0xff] %v3560_v51  ;;  %3625 = vst [vmem:[%s5947_s26 + $0xf8] sm:$0xff] %v3561_v27 }
 0x6a4   : > { %3622 = vst [vmem:[%s5947_s26 + $0xe0] sm:$0xff] %v3558_v46  ;;  %3623 = vst [vmem:[%s5947_s26 + $0xe8] sm:$0xff] %v3559_v12 }
 0x6e2   : > { %v3470_v35 = vpop.permute.xlu1 %3469  ;;  %v3466_v29 = vpop.permute.xlu0 %3465 }
 0x6e3   : > { %v3564_v13 = vmul.f32 %v3796_v26, %v3470_v35  ;;  %v3565_v19 = vmul.f32 %v3797_v2, %v3470_v35  ;;  %v3562_v54 = vmul.f32 %v3798_v23, %v3466_v29  ;;  %v3563_v39 = vmul.f32 %v3799_v49, %v3466_v29  ;;  %v3821_v35 = vld [vmem:[%s3868_s15 + $0x1d8] sm:$0xff]  ;;  %v3822_v26 = vld [vmem:[%s3868_s15 + $0x1c0] sm:$0xff]  ;;  %v3823_v2 = vld [vmem:[%s3868_s15 + $0x1c8] sm:$0xff] }
 0x6e4   : > { %v3824_v49 = vld [vmem:[%s3868_s15 + $0x1f0] sm:$0xff] }
 0x6e5   : > { %3628 = vst [vmem:[%s5947_s26 + $0x110] sm:$0xff] %v3564_v13  ;;  %3629 = vst [vmem:[%s5947_s26 + $0x118] sm:$0xff] %v3565_v19 }
 0x6e6   : > { %3626 = vst [vmem:[%s5947_s26 + $0x100] sm:$0xff] %v3562_v54  ;;  %3627 = vst [vmem:[%s5947_s26 + $0x108] sm:$0xff] %v3563_v39  ;;  %v3478_v58 = vpop.permute.xlu1 %3477  ;;  %v3474_v5 = vpop.permute.xlu0 %3473 }
 0x6e7   : > { %v3568_v45 = vmul.f32 %v3800_v44, %v3478_v58  ;;  %v3569_v28 = vmul.f32 %v3801_v11, %v3478_v58  ;;  %v3566_v1 = vmul.f32 %v3802_v10, %v3474_v5  ;;  %v3567_v57 = vmul.f32 %v3803_v60, %v3474_v5  ;;  %v3825_v58 = vld [vmem:[%s3868_s15 + $0x1f8] sm:$0xff]  ;;  %v3826_v44 = vld [vmem:[%s3868_s15 + $0x1e0] sm:$0xff]  ;;  %v3827_v11 = vld [vmem:[%s3868_s15 + $0x1e8] sm:$0xff] }
 0x6e9   : > { %3632 = vst [vmem:[%s5947_s26 + $0x130] sm:$0xff] %v3568_v45  ;;  %3633 = vst [vmem:[%s5947_s26 + $0x138] sm:$0xff] %v3569_v28 }
 0x6ea   : > { %3630 = vst [vmem:[%s5947_s26 + $0x120] sm:$0xff] %v3566_v1  ;;  %3631 = vst [vmem:[%s5947_s26 + $0x128] sm:$0xff] %v3567_v57  ;;  %v3486_v40 = vpop.permute.xlu1 %3485  ;;  %v3482_v15 = vpop.permute.xlu0 %3481 }
 0x6eb   : > { %v3572_v7 = vmul.f32 %v3804_v20, %v3486_v40  ;;  %v3573_v52 = vmul.f32 %v3805_v47, %v3486_v40  ;;  %v3570_v32 = vmul.f32 %v3806_v55, %v3482_v15  ;;  %v3571_v42 = vmul.f32 %v3807_v4, %v3482_v15 }
 0x6ed   : > { %3636 = vst [vmem:[%s5947_s26 + $0x150] sm:$0xff] %v3572_v7  ;;  %3637 = vst [vmem:[%s5947_s26 + $0x158] sm:$0xff] %v3573_v52 }
 0x6ee   : > { %3634 = vst [vmem:[%s5947_s26 + $0x140] sm:$0xff] %v3570_v32  ;;  %3635 = vst [vmem:[%s5947_s26 + $0x148] sm:$0xff] %v3571_v42  ;;  %v3494_v22 = vpop.permute.xlu1 %3493  ;;  %v3490_v9 = vpop.permute.xlu0 %3489 }
 0x6ef   : > { %v3576_v18 = vmul.f32 %v3808_v16, %v3494_v22  ;;  %v3577_v25 = vmul.f32 %v3809_v48, %v3494_v22  ;;  %v3574_v31 = vmul.f32 %v3810_v41, %v3490_v9  ;;  %v3575_v14 = vmul.f32 %v3811_v34, %v3490_v9 }
 0x6f1   : > { %3640 = vst [vmem:[%s5947_s26 + $0x170] sm:$0xff] %v3576_v18  ;;  %3641 = vst [vmem:[%s5947_s26 + $0x178] sm:$0xff] %v3577_v25 }
 0x6f2   : > { %3638 = vst [vmem:[%s5947_s26 + $0x160] sm:$0xff] %v3574_v31  ;;  %3639 = vst [vmem:[%s5947_s26 + $0x168] sm:$0xff] %v3575_v14  ;;  %v3505_v50 = vpop.permute.xlu1 %3504  ;;  %v3501_v0 = vpop.permute.xlu0 %3500 }
 0x6f3   : > { %v3580_v6 = vmul.f32 %v3812_v36, %v3505_v50  ;;  %v3581_v24 = vmul.f32 %v3813_v30, %v3505_v50  ;;  %v3578_v8 = vmul.f32 %v3814_v38, %v3501_v0  ;;  %v3579_v62 = vmul.f32 %v3815_v21, %v3501_v0 }
 0x6f5   : > { %3644 = vst [vmem:[%s5947_s26 + $0x190] sm:$0xff] %v3580_v6  ;;  %3645 = vst [vmem:[%s5947_s26 + $0x198] sm:$0xff] %v3581_v24 }
 0x6f6   : > { %3642 = vst [vmem:[%s5947_s26 + $0x180] sm:$0xff] %v3578_v8  ;;  %3643 = vst [vmem:[%s5947_s26 + $0x188] sm:$0xff] %v3579_v62  ;;  %v3513_v33 = vpop.permute.xlu1 %3512  ;;  %v3509_v3 = vpop.permute.xlu0 %3508 }
 0x6f7   : > { %v3584_v56 = vmul.f32 %v3816_v59, %v3513_v33  ;;  %v3585_v63 = vmul.f32 %v3817_v17, %v3513_v33  ;;  %v3582_v51 = vmul.f32 %v3818_v61, %v3509_v3  ;;  %v3583_v27 = vmul.f32 %v3819_v37, %v3509_v3 }
 0x6f9   : > { %3648 = vst [vmem:[%s5947_s26 + $0x1b0] sm:$0xff] %v3584_v56  ;;  %3649 = vst [vmem:[%s5947_s26 + $0x1b8] sm:$0xff] %v3585_v63 }
 0x6fa   : > { %3646 = vst [vmem:[%s5947_s26 + $0x1a0] sm:$0xff] %v3582_v51  ;;  %3647 = vst [vmem:[%s5947_s26 + $0x1a8] sm:$0xff] %v3583_v27  ;;  %v3521_v43 = vpop.permute.xlu1 %3520  ;;  %v3517_v46 = vpop.permute.xlu0 %3516 }
 0x6fb   : > { %v3588_v12 = vmul.f32 %v3820_v53, %v3521_v43  ;;  %v3589_v29 = vmul.f32 %v3821_v35, %v3521_v43  ;;  %v3586_v13 = vmul.f32 %v3822_v26, %v3517_v46  ;;  %v3587_v19 = vmul.f32 %v3823_v2, %v3517_v46 }
 0x6fd   : > { %3652 = vst [vmem:[%s5947_s26 + $0x1d0] sm:$0xff] %v3588_v12  ;;  %3653 = vst [vmem:[%s5947_s26 + $0x1d8] sm:$0xff] %v3589_v29 }
 0x6fe   : > { %3650 = vst [vmem:[%s5947_s26 + $0x1c0] sm:$0xff] %v3586_v13  ;;  %3651 = vst [vmem:[%s5947_s26 + $0x1c8] sm:$0xff] %v3587_v19  ;;  %v3529_v23 = vpop.permute.xlu1 %3528  ;;  %v3525_v54 = vpop.permute.xlu0 %3524 }
 0x6ff   : > { %v3592_v39 = vmul.f32 %v3824_v49, %v3529_v23  ;;  %v3593_v5 = vmul.f32 %v3825_v58, %v3529_v23  ;;  %v3590_v45 = vmul.f32 %v3826_v44, %v3525_v54  ;;  %v3591_v28 = vmul.f32 %v3827_v11, %v3525_v54 }
 0x701   : > { %3656 = vst [vmem:[%s5947_s26 + $0x1f0] sm:$0xff] %v3592_v39  ;;  %3657 = vst [vmem:[%s5947_s26 + $0x1f8] sm:$0xff] %v3593_v5 }
 0x702   : > { %3654 = vst [vmem:[%s5947_s26 + $0x1e0] sm:$0xff] %v3590_v45  ;;  %3655 = vst [vmem:[%s5947_s26 + $0x1e8] sm:$0xff] %v3591_v28 }
 0x703 PF: > { %s12_s9 = sadd.s32 1, %s3834_s9  }
 0x704   : > { %p9_p4 = scmp.ge.s32.totalorder %s12_s9, 4  }
 0x706   :  { %11 = sbr.rel (!%p9_p4) target bundleno = 1 (0x1), region = 58 }

</bundles_post_ra>
